<compile_context>
chip_gen: v7x
topology: tpu7x:2x2x1
jax: 0.10.0
libtpu: 0.0.40
codegen_flags: <defaults>
</compile_context>

<pallas_src>
import math
from functools import partial

import jax
import jax.numpy as jnp
from jax.experimental import pallas as pl
from jax.experimental.pallas import tpu as pltpu


# ----------------------------------------------------------------------------- config
class Config:
    encoder_embed_dim = 32
    encoder_attention_heads = 4
    encoder_ffn_embed_dim = 64
    dropout = 0.1          # identity at inference
    encoder_layers = 2


SCORE_PAD = 128  # lane-dense width for the disfluency-score output


# ----------------------------------------------------------------------------- in-kernel helpers
def _softmax(x):
    m = jnp.max(x, axis=-1, keepdims=True)
    e = jnp.exp(x - m)
    return e / jnp.sum(e, axis=-1, keepdims=True)


def _layernorm(x, g, b, eps=1e-5):
    mu = jnp.mean(x, axis=-1, keepdims=True)
    var = jnp.mean((x - mu) ** 2, axis=-1, keepdims=True)
    return (x - mu) * jax.lax.rsqrt(var + eps) * g + b


def _shift_matrix(T, offset):
    # S @ x == x shifted by `offset` rows with zero padding (S[t, s] = 1 iff s == t+offset).
    r = jax.lax.broadcasted_iota(jnp.int32, (T, T), 0)
    c = jax.lax.broadcasted_iota(jnp.int32, (T, T), 1)
    return (c == r + offset).astype(jnp.float32)


def _conv1d_same(x, w_ref, b_ref, *, kernel, pad):
    """Zero-padded 'same' Conv1d over time on a (T, Cin) tile, weights (K, Cin, Cout).

    Each tap is a matmul against a static shift matrix (MXU), avoiding runtime
    concatenates / misaligned time slices that would force vreg relayouts.
    """
    T = x.shape[0]
    acc = b_ref[...]                                   # (1, Cout) broadcasts over T
    for dk in range(kernel):
        xs = jnp.dot(_shift_matrix(T, dk - pad), x, preferred_element_type=jnp.float32)
        acc = acc + jnp.dot(xs, w_ref[dk], preferred_element_type=jnp.float32)
    return jnp.maximum(acc, 0.0)


# ----------------------------------------------------------------------------- fused kernel
def fused_forward_kernel(x_ref,
                         wq, bq, wk, bk, wv, bv, wo, bo,
                         w1, b1, w2, b2, g1, be1, g2, be2,
                         pc1_w, pc1_b, pc2_w, pc2_b,
                         dd1_w, dd1_b, dd2_w, dd2_b,
                         fv_w, fv_b, fo_w, fo_b,
                         fused_ref, pros_ref, scores_ref,
                         *, num_layers, num_heads):
    x = x_ref[...]                                     # (T, E)
    T, E = x.shape
    dh = E // num_heads
    scale = 1.0 / math.sqrt(dh)

    # ---------------- base transformer encoder (post-norm, relu, eval mode) ----------------
    h = x
    for l in range(num_layers):
        # Multi-head self-attention: weights are pre-split per head in the wrapper, so
        # there is no in-kernel lane slicing or concatenation; each head's output is
        # folded through the matching rows of W_o and accumulated.
        attn = bo[l]                                   # (1, E), broadcasts over T
        for hh in range(num_heads):
            q = jnp.dot(h, wq[l, hh], preferred_element_type=jnp.float32) + bq[l, hh]
            k = jnp.dot(h, wk[l, hh], preferred_element_type=jnp.float32) + bk[l, hh]
            v = jnp.dot(h, wv[l, hh], preferred_element_type=jnp.float32) + bv[l, hh]
            s = jnp.dot(q, k.T, preferred_element_type=jnp.float32) * scale   # (T, T)
            a = _softmax(s)
            ctx = jnp.dot(a, v, preferred_element_type=jnp.float32)           # (T, dh)
            attn = attn + jnp.dot(ctx, wo[l, hh], preferred_element_type=jnp.float32)

        h1 = _layernorm(h + attn, g1[l], be1[l])

        ff = jnp.maximum(jnp.dot(h1, w1[l], preferred_element_type=jnp.float32) + b1[l], 0.0)
        ff = jnp.dot(ff, w2[l], preferred_element_type=jnp.float32) + b2[l]

        h = _layernorm(h1 + ff, g2[l], be2[l])

    enc = h                                            # (T, E) encoder output

    # ---------------- prosody extractor: Conv(k=5,p=2)+ReLU -> Conv(k=3,p=1)+ReLU -> mean ----
    h1c = _conv1d_same(enc, pc1_w, pc1_b, kernel=5, pad=2)    # (T, E/2)
    h2c = _conv1d_same(h1c, pc2_w, pc2_b, kernel=3, pad=1)    # (T, E/4)
    pros = jnp.mean(h2c, axis=0, keepdims=True)               # (1, E/4)  == AdaptiveAvgPool1d(1)
    pros_ref[...] = pros

    # ---------------- disfluency detector (lane-dense padded scores) ----------------
    d1 = jnp.maximum(jnp.dot(enc, dd1_w[...], preferred_element_type=jnp.float32)
                     + dd1_b[...], 0.0)                        # (T, E/2)
    scores_ref[...] = (jnp.dot(d1, dd2_w[...], preferred_element_type=jnp.float32)
                       + dd2_b[...])                           # (T, 128); lanes [0:2] are real

    # ---------------- prosody cross-attention fusion (algebraically simplified) ----------
    # All T keys/values are identical broadcasts of the single prosody vector, so the
    # per-head softmax is exactly uniform and the attention output equals the broadcast
    # projected value row, independent of the query / disfluency-weighted path:
    #     fused[t] = (pros @ Wv + bv) @ Wo + bo     for every t.
    v_row = jnp.dot(pros, fv_w[...], preferred_element_type=jnp.float32) + fv_b[...]      # (1, E)
    fused_row = jnp.dot(v_row, fo_w[...], preferred_element_type=jnp.float32) + fo_b[...]  # (1, E)
    fused_ref[...] = jnp.broadcast_to(fused_row, (T, E))


# ----------------------------------------------------------------------------- parameters
def init_params(config, key):
    E = config.encoder_embed_dim
    F = config.encoder_ffn_embed_dim
    H2 = E // 2
    P = E // 4
    keys = iter(jax.random.split(key, 256))

    def lin(fan_in, fan_out):
        bound = 1.0 / math.sqrt(fan_in)
        W = jax.random.uniform(next(keys), (fan_in, fan_out), jnp.float32, -bound, bound)
        b = jax.random.uniform(next(keys), (1, fan_out), jnp.float32, -bound, bound)
        return W, b

    def conv(k, cin, cout):
        bound = 1.0 / math.sqrt(cin * k)
        W = jax.random.uniform(next(keys), (k, cin, cout), jnp.float32, -bound, bound)
        b = jax.random.uniform(next(keys), (1, cout), jnp.float32, -bound, bound)
        return W, b

    params = {'layers': []}
    for _ in range(config.encoder_layers):
        layer = {}
        layer['wq'], layer['bq'] = lin(E, E)
        layer['wk'], layer['bk'] = lin(E, E)
        layer['wv'], layer['bv'] = lin(E, E)
        layer['wo'], layer['bo'] = lin(E, E)
        layer['w1'], layer['b1'] = lin(E, F)
        layer['w2'], layer['b2'] = lin(F, E)
        layer['g1'] = jnp.ones((1, E), jnp.float32)
        layer['be1'] = jnp.zeros((1, E), jnp.float32)
        layer['g2'] = jnp.ones((1, E), jnp.float32)
        layer['be2'] = jnp.zeros((1, E), jnp.float32)
        params['layers'].append(layer)

    params['pc1_w'], params['pc1_b'] = conv(5, E, H2)
    params['pc2_w'], params['pc2_b'] = conv(3, H2, P)
    params['dd1_w'], params['dd1_b'] = lin(E, H2)
    params['dd2_w'], params['dd2_b'] = lin(H2, 2)
    # q/k projections of the fusion MHA are kept for parameter parity but are not consumed
    # by the kernel: with identical keys/values the attention output is independent of them.
    params['fq_w'], params['fq_b'] = lin(E, E)
    params['fk_w'], params['fk_b'] = lin(P, E)
    params['fv_w'], params['fv_b'] = lin(P, E)
    params['fo_w'], params['fo_b'] = lin(E, E)
    return params


# ----------------------------------------------------------------------------- wrapper
def _w_spec(shape):
    n = len(shape)
    return pl.BlockSpec(shape, lambda *_: (0,) * n)


def dysarthria_encoder_forward(params, x, config, mask=None):
    assert mask is None  # TODO(synk): src_key_padding_mask path not implemented
    B, T, E = x.shape
    L = config.encoder_layers
    H = config.encoder_attention_heads
    F = config.encoder_ffn_embed_dim
    H2, P, dh = E // 2, E // 4, E // H

    # ---- pack per-layer weights into stacked, per-head-split kernel layout (trace-time only)
    def stack(name):
        return jnp.stack([layer[name] for layer in params['layers']], axis=0)

    def split_cols(w):   # (L, E, E) -> (L, H, E, dh): head h uses columns [h*dh:(h+1)*dh]
        return w.reshape(L, E, H, dh).transpose(0, 2, 1, 3)

    def split_bias(b):   # (L, 1, E) -> (L, H, 1, dh)
        return b.reshape(L, 1, H, dh).transpose(0, 2, 1, 3)

    def split_rows(w):   # (L, E, E) -> (L, H, dh, E): head h's ctx multiplies rows [h*dh:(h+1)*dh]
        return w.reshape(L, H, dh, E)

    wq, bq = split_cols(stack('wq')), split_bias(stack('bq'))
    wk, bk = split_cols(stack('wk')), split_bias(stack('bk'))
    wv, bv = split_cols(stack('wv')), split_bias(stack('bv'))
    wo, bo = split_rows(stack('wo')), stack('bo')
    w1, b1, w2, b2 = stack('w1'), stack('b1'), stack('w2'), stack('b2')
    g1, be1, g2, be2 = stack('g1'), stack('be1'), stack('g2'), stack('be2')

    # lane-dense disfluency head: pad the 2 output classes to 128 lanes (zeros elsewhere)
    dd2_w_pad = jnp.zeros((H2, SCORE_PAD), jnp.float32).at[:, :2].set(params['dd2_w'])
    dd2_b_pad = jnp.zeros((1, SCORE_PAD), jnp.float32).at[:, :2].set(params['dd2_b'])

    weights = [wq, bq, wk, bk, wv, bv, wo, bo,
               w1, b1, w2, b2, g1, be1, g2, be2,
               params['pc1_w'], params['pc1_b'], params['pc2_w'], params['pc2_b'],
               params['dd1_w'], params['dd1_b'], dd2_w_pad, dd2_b_pad,
               params['fv_w'], params['fv_b'], params['fo_w'], params['fo_b']]

    # rough cost estimate so XLA schedules this tiny custom call sensibly
    flops = int(B * (
        L * (8 * T * E * E + 4 * T * T * E + 4 * T * E * F)
        + 5 * (2 * T * T * E + 2 * T * E * H2) + 3 * (2 * T * T * H2 + 2 * T * H2 * P)
        + 2 * T * E * H2 + 2 * T * H2 * SCORE_PAD
        + 2 * P * E + 2 * E * E))
    transcendentals = int(B * L * H * T * T)
    bytes_accessed = int(4 * (x.size + sum(int(w.size) for w in weights)
                              + B * T * E + B * P + B * T * SCORE_PAD))

    fused, pros3, scores_pad = pl.pallas_call(
        partial(fused_forward_kernel, num_layers=L, num_heads=H),
        out_shape=(jax.ShapeDtypeStruct((B, T, E), jnp.float32),
                   jax.ShapeDtypeStruct((B, 1, P), jnp.float32),
                   jax.ShapeDtypeStruct((B, T, SCORE_PAD), jnp.float32)),
        grid=(B,),
        in_specs=[pl.BlockSpec((None, T, E), lambda b: (b, 0, 0))]
                 + [_w_spec(w.shape) for w in weights],
        out_specs=(pl.BlockSpec((None, T, E), lambda b: (b, 0, 0)),
                   pl.BlockSpec((None, 1, P), lambda b: (b, 0, 0)),
                   pl.BlockSpec((None, T, SCORE_PAD), lambda b: (b, 0, 0))),
        compiler_params=pltpu.CompilerParams(dimension_semantics=("parallel",)),
        cost_estimate=pl.CostEstimate(flops=flops,
                                      transcendentals=transcendentals,
                                      bytes_accessed=bytes_accessed),
    )(x, *weights)

    return {'encoded': fused,
            'prosody_features': pros3[:, 0, :],
            'disfluency_scores': scores_pad[:, :, :2]}


# ----------------------------------------------------------------------------- main
if __name__ == "__main__":
    cfg = Config()
    key = jax.random.PRNGKey(0)
    kp, kx = jax.random.split(key)
    params = init_params(cfg, kp)

    B, T, E = 2, 8, cfg.encoder_embed_dim
    x = jax.random.normal(kx, (B, T, E), jnp.float32)

    out = dysarthria_encoder_forward(params, x, cfg, mask=None)
    out = jax.block_until_ready(out)

    assert out['encoded'].shape == (B, T, E)
    assert out['prosody_features'].shape == (B, E // 4)
    assert out['disfluency_scores'].shape == (B, T, 2)
    assert all(bool(jnp.all(jnp.isfinite(v))) for v in out.values())
    print("KERNEL_OK")
</pallas_src>

<mosaic_0001>
module attributes {stable_mosaic.version = 11 : i64} {
  func.func @fused_forward_kernel(%arg0: i32, %arg1: memref<1x8x32xf32, #tpu.memory_space<vmem>>, %arg2: memref<2x4x32x8xf32, #tpu.memory_space<vmem>>, %arg3: memref<2x4x1x8xf32, #tpu.memory_space<vmem>>, %arg4: memref<2x4x32x8xf32, #tpu.memory_space<vmem>>, %arg5: memref<2x4x1x8xf32, #tpu.memory_space<vmem>>, %arg6: memref<2x4x32x8xf32, #tpu.memory_space<vmem>>, %arg7: memref<2x4x1x8xf32, #tpu.memory_space<vmem>>, %arg8: memref<2x4x8x32xf32, #tpu.memory_space<vmem>>, %arg9: memref<2x1x32xf32, #tpu.memory_space<vmem>>, %arg10: memref<2x32x64xf32, #tpu.memory_space<vmem>>, %arg11: memref<2x1x64xf32, #tpu.memory_space<vmem>>, %arg12: memref<2x64x32xf32, #tpu.memory_space<vmem>>, %arg13: memref<2x1x32xf32, #tpu.memory_space<vmem>>, %arg14: memref<2x1x32xf32, #tpu.memory_space<vmem>>, %arg15: memref<2x1x32xf32, #tpu.memory_space<vmem>>, %arg16: memref<2x1x32xf32, #tpu.memory_space<vmem>>, %arg17: memref<2x1x32xf32, #tpu.memory_space<vmem>>, %arg18: memref<5x32x16xf32, #tpu.memory_space<vmem>>, %arg19: memref<1x16xf32, #tpu.memory_space<vmem>>, %arg20: memref<3x16x8xf32, #tpu.memory_space<vmem>>, %arg21: memref<1x8xf32, #tpu.memory_space<vmem>>, %arg22: memref<32x16xf32, #tpu.memory_space<vmem>>, %arg23: memref<1x16xf32, #tpu.memory_space<vmem>>, %arg24: memref<16x128xf32, #tpu.memory_space<vmem>>, %arg25: memref<1x128xf32, #tpu.memory_space<vmem>>, %arg26: memref<8x32xf32, #tpu.memory_space<vmem>>, %arg27: memref<1x32xf32, #tpu.memory_space<vmem>>, %arg28: memref<32x32xf32, #tpu.memory_space<vmem>>, %arg29: memref<1x32xf32, #tpu.memory_space<vmem>>, %arg30: memref<1x8x32xf32, #tpu.memory_space<vmem>>, %arg31: memref<1x1x8xf32, #tpu.memory_space<vmem>>, %arg32: memref<1x8x128xf32, #tpu.memory_space<vmem>>) attributes {dimension_semantics = [#tpu.dimension_semantics<parallel>], iteration_bounds = array<i64: 2>, scalar_prefetch = 0 : i64, scratch_operands = 0 : i64, tpu.core_type = #tpu.core_type<tc>, window_params = [{transform_indices = @transform_0, window_bounds = array<i64: 1, 8, 32>}, {pipeline_mode = #tpu.pipeline_mode<synchronous>, transform_indices = @transform_1, window_bounds = array<i64: 2, 4, 32, 8>}, {pipeline_mode = #tpu.pipeline_mode<synchronous>, transform_indices = @transform_2, window_bounds = array<i64: 2, 4, 1, 8>}, {pipeline_mode = #tpu.pipeline_mode<synchronous>, transform_indices = @transform_3, window_bounds = array<i64: 2, 4, 32, 8>}, {pipeline_mode = #tpu.pipeline_mode<synchronous>, transform_indices = @transform_4, window_bounds = array<i64: 2, 4, 1, 8>}, {pipeline_mode = #tpu.pipeline_mode<synchronous>, transform_indices = @transform_5, window_bounds = array<i64: 2, 4, 32, 8>}, {pipeline_mode = #tpu.pipeline_mode<synchronous>, transform_indices = @transform_6, window_bounds = array<i64: 2, 4, 1, 8>}, {pipeline_mode = #tpu.pipeline_mode<synchronous>, transform_indices = @transform_7, window_bounds = array<i64: 2, 4, 8, 32>}, {pipeline_mode = #tpu.pipeline_mode<synchronous>, transform_indices = @transform_8, window_bounds = array<i64: 2, 1, 32>}, {pipeline_mode = #tpu.pipeline_mode<synchronous>, transform_indices = @transform_9, window_bounds = array<i64: 2, 32, 64>}, {pipeline_mode = #tpu.pipeline_mode<synchronous>, transform_indices = @transform_10, window_bounds = array<i64: 2, 1, 64>}, {pipeline_mode = #tpu.pipeline_mode<synchronous>, transform_indices = @transform_11, window_bounds = array<i64: 2, 64, 32>}, {pipeline_mode = #tpu.pipeline_mode<synchronous>, transform_indices = @transform_12, window_bounds = array<i64: 2, 1, 32>}, {pipeline_mode = #tpu.pipeline_mode<synchronous>, transform_indices = @transform_13, window_bounds = array<i64: 2, 1, 32>}, {pipeline_mode = #tpu.pipeline_mode<synchronous>, transform_indices = @transform_14, window_bounds = array<i64: 2, 1, 32>}, {pipeline_mode = #tpu.pipeline_mode<synchronous>, transform_indices = @transform_15, window_bounds = array<i64: 2, 1, 32>}, {pipeline_mode = #tpu.pipeline_mode<synchronous>, transform_indices = @transform_16, window_bounds = array<i64: 2, 1, 32>}, {pipeline_mode = #tpu.pipeline_mode<synchronous>, transform_indices = @transform_17, window_bounds = array<i64: 5, 32, 16>}, {pipeline_mode = #tpu.pipeline_mode<synchronous>, transform_indices = @transform_18, window_bounds = array<i64: 1, 16>}, {pipeline_mode = #tpu.pipeline_mode<synchronous>, transform_indices = @transform_19, window_bounds = array<i64: 3, 16, 8>}, {pipeline_mode = #tpu.pipeline_mode<synchronous>, transform_indices = @transform_20, window_bounds = array<i64: 1, 8>}, {pipeline_mode = #tpu.pipeline_mode<synchronous>, transform_indices = @transform_21, window_bounds = array<i64: 32, 16>}, {pipeline_mode = #tpu.pipeline_mode<synchronous>, transform_indices = @transform_22, window_bounds = array<i64: 1, 16>}, {pipeline_mode = #tpu.pipeline_mode<synchronous>, transform_indices = @transform_23, window_bounds = array<i64: 16, 128>}, {pipeline_mode = #tpu.pipeline_mode<synchronous>, transform_indices = @transform_24, window_bounds = array<i64: 1, 128>}, {pipeline_mode = #tpu.pipeline_mode<synchronous>, transform_indices = @transform_25, window_bounds = array<i64: 8, 32>}, {pipeline_mode = #tpu.pipeline_mode<synchronous>, transform_indices = @transform_26, window_bounds = array<i64: 1, 32>}, {pipeline_mode = #tpu.pipeline_mode<synchronous>, transform_indices = @transform_27, window_bounds = array<i64: 32, 32>}, {pipeline_mode = #tpu.pipeline_mode<synchronous>, transform_indices = @transform_28, window_bounds = array<i64: 1, 32>}, {transform_indices = @transform_29, window_bounds = array<i64: 1, 8, 32>}, {transform_indices = @transform_30, window_bounds = array<i64: 1, 1, 8>}, {transform_indices = @transform_31, window_bounds = array<i64: 1, 8, 128>}]} {
    %c0 = arith.constant 0 : index
    %c0_0 = arith.constant 0 : index
    %c0_1 = arith.constant 0 : index
    %0 = vector.load %arg1[%c0, %c0_0, %c0_1] : memref<1x8x32xf32, #tpu.memory_space<vmem>>, vector<1x8x32xf32>
    %1 = vector.shape_cast %0 : vector<1x8x32xf32> to vector<8x32xf32>
    %c0_2 = arith.constant 0 : index
    %c0_3 = arith.constant 0 : index
    %c0_4 = arith.constant 0 : index
    %2 = vector.load %arg9[%c0_2, %c0_3, %c0_4] : memref<2x1x32xf32, #tpu.memory_space<vmem>>, vector<1x1x32xf32>
    %3 = vector.shape_cast %2 : vector<1x1x32xf32> to vector<1x32xf32>
    %c0_5 = arith.constant 0 : index
    %c0_6 = arith.constant 0 : index
    %c0_7 = arith.constant 0 : index
    %c0_8 = arith.constant 0 : index
    %4 = vector.load %arg2[%c0_5, %c0_6, %c0_7, %c0_8] : memref<2x4x32x8xf32, #tpu.memory_space<vmem>>, vector<1x1x32x8xf32>
    %5 = vector.shape_cast %4 : vector<1x1x32x8xf32> to vector<32x8xf32>
    %cst = arith.constant dense<0.000000e+00> : vector<8x8xf32>
    %6 = tpu.matmul %1, %5, %cst {dimension_numbers = #tpu.dot_dimension_numbers<[1], [0], [0], [1], [0, 0, 1, 1], [], []>} : vector<8x32xf32>, vector<32x8xf32>, vector<8x8xf32> -> vector<8x8xf32>
    %c0_9 = arith.constant 0 : index
    %c0_10 = arith.constant 0 : index
    %c0_11 = arith.constant 0 : index
    %c0_12 = arith.constant 0 : index
    %7 = vector.load %arg3[%c0_9, %c0_10, %c0_11, %c0_12] : memref<2x4x1x8xf32, #tpu.memory_space<vmem>>, vector<1x1x1x8xf32>
    %8 = vector.shape_cast %7 : vector<1x1x1x8xf32> to vector<1x8xf32>
    %9 = vector.broadcast %8 : vector<1x8xf32> to vector<8x8xf32>
    %10 = arith.addf %6, %9 : vector<8x8xf32>
    %c0_13 = arith.constant 0 : index
    %c0_14 = arith.constant 0 : index
    %c0_15 = arith.constant 0 : index
    %c0_16 = arith.constant 0 : index
    %11 = vector.load %arg4[%c0_13, %c0_14, %c0_15, %c0_16] : memref<2x4x32x8xf32, #tpu.memory_space<vmem>>, vector<1x1x32x8xf32>
    %12 = vector.shape_cast %11 : vector<1x1x32x8xf32> to vector<32x8xf32>
    %cst_17 = arith.constant dense<0.000000e+00> : vector<8x8xf32>
    %13 = tpu.matmul %1, %12, %cst_17 {dimension_numbers = #tpu.dot_dimension_numbers<[1], [0], [0], [1], [0, 0, 1, 1], [], []>} : vector<8x32xf32>, vector<32x8xf32>, vector<8x8xf32> -> vector<8x8xf32>
    %c0_18 = arith.constant 0 : index
    %c0_19 = arith.constant 0 : index
    %c0_20 = arith.constant 0 : index
    %c0_21 = arith.constant 0 : index
    %14 = vector.load %arg5[%c0_18, %c0_19, %c0_20, %c0_21] : memref<2x4x1x8xf32, #tpu.memory_space<vmem>>, vector<1x1x1x8xf32>
    %15 = vector.shape_cast %14 : vector<1x1x1x8xf32> to vector<1x8xf32>
    %16 = vector.broadcast %15 : vector<1x8xf32> to vector<8x8xf32>
    %17 = arith.addf %13, %16 : vector<8x8xf32>
    %c0_22 = arith.constant 0 : index
    %c0_23 = arith.constant 0 : index
    %c0_24 = arith.constant 0 : index
    %c0_25 = arith.constant 0 : index
    %18 = vector.load %arg6[%c0_22, %c0_23, %c0_24, %c0_25] : memref<2x4x32x8xf32, #tpu.memory_space<vmem>>, vector<1x1x32x8xf32>
    %19 = vector.shape_cast %18 : vector<1x1x32x8xf32> to vector<32x8xf32>
    %cst_26 = arith.constant dense<0.000000e+00> : vector<8x8xf32>
    %20 = tpu.matmul %1, %19, %cst_26 {dimension_numbers = #tpu.dot_dimension_numbers<[1], [0], [0], [1], [0, 0, 1, 1], [], []>} : vector<8x32xf32>, vector<32x8xf32>, vector<8x8xf32> -> vector<8x8xf32>
    %c0_27 = arith.constant 0 : index
    %c0_28 = arith.constant 0 : index
    %c0_29 = arith.constant 0 : index
    %c0_30 = arith.constant 0 : index
    %21 = vector.load %arg7[%c0_27, %c0_28, %c0_29, %c0_30] : memref<2x4x1x8xf32, #tpu.memory_space<vmem>>, vector<1x1x1x8xf32>
    %22 = vector.shape_cast %21 : vector<1x1x1x8xf32> to vector<1x8xf32>
    %23 = vector.broadcast %22 : vector<1x8xf32> to vector<8x8xf32>
    %24 = arith.addf %20, %23 : vector<8x8xf32>
    %25 = tpu.transpose %17, [1, 0] : vector<8x8xf32> -> vector<8x8xf32>
    %cst_31 = arith.constant dense<0.000000e+00> : vector<8x8xf32>
    %26 = tpu.matmul %10, %25, %cst_31 {dimension_numbers = #tpu.dot_dimension_numbers<[1], [0], [0], [1], [0, 0, 1, 1], [], []>} : vector<8x8xf32>, vector<8x8xf32>, vector<8x8xf32> -> vector<8x8xf32>
    %cst_32 = arith.constant 0.353553385 : f32
    %27 = vector.broadcast %cst_32 : f32 to vector<8x8xf32>
    %28 = arith.mulf %26, %27 : vector<8x8xf32>
    %cst_33 = arith.constant dense<0xFF800000> : vector<8xf32>
    %29 = vector.multi_reduction <maximumf>, %28, %cst_33 [1] : vector<8x8xf32> to vector<8xf32>
    %30 = vector.shape_cast %29 : vector<8xf32> to vector<8x1xf32>
    %31 = vector.broadcast %30 : vector<8x1xf32> to vector<8x8xf32>
    %32 = arith.subf %28, %31 : vector<8x8xf32>
    %33 = math.exp %32 : vector<8x8xf32>
    %cst_34 = arith.constant dense<0.000000e+00> : vector<8xf32>
    %34 = vector.multi_reduction <add>, %33, %cst_34 [1] : vector<8x8xf32> to vector<8xf32>
    %35 = vector.shape_cast %34 : vector<8xf32> to vector<8x1xf32>
    %36 = vector.broadcast %35 : vector<8x1xf32> to vector<8x8xf32>
    %37 = arith.divf %33, %36 : vector<8x8xf32>
    %cst_35 = arith.constant dense<0.000000e+00> : vector<8x8xf32>
    %38 = tpu.matmul %37, %24, %cst_35 {dimension_numbers = #tpu.dot_dimension_numbers<[1], [0], [0], [1], [0, 0, 1, 1], [], []>} : vector<8x8xf32>, vector<8x8xf32>, vector<8x8xf32> -> vector<8x8xf32>
    %c0_36 = arith.constant 0 : index
    %c0_37 = arith.constant 0 : index
    %c0_38 = arith.constant 0 : index
    %c0_39 = arith.constant 0 : index
    %39 = vector.load %arg8[%c0_36, %c0_37, %c0_38, %c0_39] : memref<2x4x8x32xf32, #tpu.memory_space<vmem>>, vector<1x1x8x32xf32>
    %40 = vector.shape_cast %39 : vector<1x1x8x32xf32> to vector<8x32xf32>
    %cst_40 = arith.constant dense<0.000000e+00> : vector<8x32xf32>
    %41 = tpu.matmul %38, %40, %cst_40 {dimension_numbers = #tpu.dot_dimension_numbers<[1], [0], [0], [1], [0, 0, 1, 1], [], []>} : vector<8x8xf32>, vector<8x32xf32>, vector<8x32xf32> -> vector<8x32xf32>
    %42 = vector.broadcast %3 : vector<1x32xf32> to vector<8x32xf32>
    %43 = arith.addf %42, %41 : vector<8x32xf32>
    %c0_41 = arith.constant 0 : index
    %c1 = arith.constant 1 : index
    %c0_42 = arith.constant 0 : index
    %c0_43 = arith.constant 0 : index
    %44 = vector.load %arg2[%c0_41, %c1, %c0_42, %c0_43] : memref<2x4x32x8xf32, #tpu.memory_space<vmem>>, vector<1x1x32x8xf32>
    %45 = vector.shape_cast %44 : vector<1x1x32x8xf32> to vector<32x8xf32>
    %cst_44 = arith.constant dense<0.000000e+00> : vector<8x8xf32>
    %46 = tpu.matmul %1, %45, %cst_44 {dimension_numbers = #tpu.dot_dimension_numbers<[1], [0], [0], [1], [0, 0, 1, 1], [], []>} : vector<8x32xf32>, vector<32x8xf32>, vector<8x8xf32> -> vector<8x8xf32>
    %c0_45 = arith.constant 0 : index
    %c1_46 = arith.constant 1 : index
    %c0_47 = arith.constant 0 : index
    %c0_48 = arith.constant 0 : index
    %47 = vector.load %arg3[%c0_45, %c1_46, %c0_47, %c0_48] : memref<2x4x1x8xf32, #tpu.memory_space<vmem>>, vector<1x1x1x8xf32>
    %48 = vector.shape_cast %47 : vector<1x1x1x8xf32> to vector<1x8xf32>
    %49 = vector.broadcast %48 : vector<1x8xf32> to vector<8x8xf32>
    %50 = arith.addf %46, %49 : vector<8x8xf32>
    %c0_49 = arith.constant 0 : index
    %c1_50 = arith.constant 1 : index
    %c0_51 = arith.constant 0 : index
    %c0_52 = arith.constant 0 : index
    %51 = vector.load %arg4[%c0_49, %c1_50, %c0_51, %c0_52] : memref<2x4x32x8xf32, #tpu.memory_space<vmem>>, vector<1x1x32x8xf32>
    %52 = vector.shape_cast %51 : vector<1x1x32x8xf32> to vector<32x8xf32>
    %cst_53 = arith.constant dense<0.000000e+00> : vector<8x8xf32>
    %53 = tpu.matmul %1, %52, %cst_53 {dimension_numbers = #tpu.dot_dimension_numbers<[1], [0], [0], [1], [0, 0, 1, 1], [], []>} : vector<8x32xf32>, vector<32x8xf32>, vector<8x8xf32> -> vector<8x8xf32>
    %c0_54 = arith.constant 0 : index
    %c1_55 = arith.constant 1 : index
    %c0_56 = arith.constant 0 : index
    %c0_57 = arith.constant 0 : index
    %54 = vector.load %arg5[%c0_54, %c1_55, %c0_56, %c0_57] : memref<2x4x1x8xf32, #tpu.memory_space<vmem>>, vector<1x1x1x8xf32>
    %55 = vector.shape_cast %54 : vector<1x1x1x8xf32> to vector<1x8xf32>
    %56 = vector.broadcast %55 : vector<1x8xf32> to vector<8x8xf32>
    %57 = arith.addf %53, %56 : vector<8x8xf32>
    %c0_58 = arith.constant 0 : index
    %c1_59 = arith.constant 1 : index
    %c0_60 = arith.constant 0 : index
    %c0_61 = arith.constant 0 : index
    %58 = vector.load %arg6[%c0_58, %c1_59, %c0_60, %c0_61] : memref<2x4x32x8xf32, #tpu.memory_space<vmem>>, vector<1x1x32x8xf32>
    %59 = vector.shape_cast %58 : vector<1x1x32x8xf32> to vector<32x8xf32>
    %cst_62 = arith.constant dense<0.000000e+00> : vector<8x8xf32>
    %60 = tpu.matmul %1, %59, %cst_62 {dimension_numbers = #tpu.dot_dimension_numbers<[1], [0], [0], [1], [0, 0, 1, 1], [], []>} : vector<8x32xf32>, vector<32x8xf32>, vector<8x8xf32> -> vector<8x8xf32>
    %c0_63 = arith.constant 0 : index
    %c1_64 = arith.constant 1 : index
    %c0_65 = arith.constant 0 : index
    %c0_66 = arith.constant 0 : index
    %61 = vector.load %arg7[%c0_63, %c1_64, %c0_65, %c0_66] : memref<2x4x1x8xf32, #tpu.memory_space<vmem>>, vector<1x1x1x8xf32>
    %62 = vector.shape_cast %61 : vector<1x1x1x8xf32> to vector<1x8xf32>
    %63 = vector.broadcast %62 : vector<1x8xf32> to vector<8x8xf32>
    %64 = arith.addf %60, %63 : vector<8x8xf32>
    %65 = tpu.transpose %57, [1, 0] : vector<8x8xf32> -> vector<8x8xf32>
    %cst_67 = arith.constant dense<0.000000e+00> : vector<8x8xf32>
    %66 = tpu.matmul %50, %65, %cst_67 {dimension_numbers = #tpu.dot_dimension_numbers<[1], [0], [0], [1], [0, 0, 1, 1], [], []>} : vector<8x8xf32>, vector<8x8xf32>, vector<8x8xf32> -> vector<8x8xf32>
    %cst_68 = arith.constant 0.353553385 : f32
    %67 = vector.broadcast %cst_68 : f32 to vector<8x8xf32>
    %68 = arith.mulf %66, %67 : vector<8x8xf32>
    %cst_69 = arith.constant dense<0xFF800000> : vector<8xf32>
    %69 = vector.multi_reduction <maximumf>, %68, %cst_69 [1] : vector<8x8xf32> to vector<8xf32>
    %70 = vector.shape_cast %69 : vector<8xf32> to vector<8x1xf32>
    %71 = vector.broadcast %70 : vector<8x1xf32> to vector<8x8xf32>
    %72 = arith.subf %68, %71 : vector<8x8xf32>
    %73 = math.exp %72 : vector<8x8xf32>
    %cst_70 = arith.constant dense<0.000000e+00> : vector<8xf32>
    %74 = vector.multi_reduction <add>, %73, %cst_70 [1] : vector<8x8xf32> to vector<8xf32>
    %75 = vector.shape_cast %74 : vector<8xf32> to vector<8x1xf32>
    %76 = vector.broadcast %75 : vector<8x1xf32> to vector<8x8xf32>
    %77 = arith.divf %73, %76 : vector<8x8xf32>
    %cst_71 = arith.constant dense<0.000000e+00> : vector<8x8xf32>
    %78 = tpu.matmul %77, %64, %cst_71 {dimension_numbers = #tpu.dot_dimension_numbers<[1], [0], [0], [1], [0, 0, 1, 1], [], []>} : vector<8x8xf32>, vector<8x8xf32>, vector<8x8xf32> -> vector<8x8xf32>
    %c0_72 = arith.constant 0 : index
    %c1_73 = arith.constant 1 : index
    %c0_74 = arith.constant 0 : index
    %c0_75 = arith.constant 0 : index
    %79 = vector.load %arg8[%c0_72, %c1_73, %c0_74, %c0_75] : memref<2x4x8x32xf32, #tpu.memory_space<vmem>>, vector<1x1x8x32xf32>
    %80 = vector.shape_cast %79 : vector<1x1x8x32xf32> to vector<8x32xf32>
    %cst_76 = arith.constant dense<0.000000e+00> : vector<8x32xf32>
    %81 = tpu.matmul %78, %80, %cst_76 {dimension_numbers = #tpu.dot_dimension_numbers<[1], [0], [0], [1], [0, 0, 1, 1], [], []>} : vector<8x8xf32>, vector<8x32xf32>, vector<8x32xf32> -> vector<8x32xf32>
    %82 = arith.addf %43, %81 : vector<8x32xf32>
    %c0_77 = arith.constant 0 : index
    %c2 = arith.constant 2 : index
    %c0_78 = arith.constant 0 : index
    %c0_79 = arith.constant 0 : index
    %83 = vector.load %arg2[%c0_77, %c2, %c0_78, %c0_79] : memref<2x4x32x8xf32, #tpu.memory_space<vmem>>, vector<1x1x32x8xf32>
    %84 = vector.shape_cast %83 : vector<1x1x32x8xf32> to vector<32x8xf32>
    %cst_80 = arith.constant dense<0.000000e+00> : vector<8x8xf32>
    %85 = tpu.matmul %1, %84, %cst_80 {dimension_numbers = #tpu.dot_dimension_numbers<[1], [0], [0], [1], [0, 0, 1, 1], [], []>} : vector<8x32xf32>, vector<32x8xf32>, vector<8x8xf32> -> vector<8x8xf32>
    %c0_81 = arith.constant 0 : index
    %c2_82 = arith.constant 2 : index
    %c0_83 = arith.constant 0 : index
    %c0_84 = arith.constant 0 : index
    %86 = vector.load %arg3[%c0_81, %c2_82, %c0_83, %c0_84] : memref<2x4x1x8xf32, #tpu.memory_space<vmem>>, vector<1x1x1x8xf32>
    %87 = vector.shape_cast %86 : vector<1x1x1x8xf32> to vector<1x8xf32>
    %88 = vector.broadcast %87 : vector<1x8xf32> to vector<8x8xf32>
    %89 = arith.addf %85, %88 : vector<8x8xf32>
    %c0_85 = arith.constant 0 : index
    %c2_86 = arith.constant 2 : index
    %c0_87 = arith.constant 0 : index
    %c0_88 = arith.constant 0 : index
    %90 = vector.load %arg4[%c0_85, %c2_86, %c0_87, %c0_88] : memref<2x4x32x8xf32, #tpu.memory_space<vmem>>, vector<1x1x32x8xf32>
    %91 = vector.shape_cast %90 : vector<1x1x32x8xf32> to vector<32x8xf32>
    %cst_89 = arith.constant dense<0.000000e+00> : vector<8x8xf32>
    %92 = tpu.matmul %1, %91, %cst_89 {dimension_numbers = #tpu.dot_dimension_numbers<[1], [0], [0], [1], [0, 0, 1, 1], [], []>} : vector<8x32xf32>, vector<32x8xf32>, vector<8x8xf32> -> vector<8x8xf32>
    %c0_90 = arith.constant 0 : index
    %c2_91 = arith.constant 2 : index
    %c0_92 = arith.constant 0 : index
    %c0_93 = arith.constant 0 : index
    %93 = vector.load %arg5[%c0_90, %c2_91, %c0_92, %c0_93] : memref<2x4x1x8xf32, #tpu.memory_space<vmem>>, vector<1x1x1x8xf32>
    %94 = vector.shape_cast %93 : vector<1x1x1x8xf32> to vector<1x8xf32>
    %95 = vector.broadcast %94 : vector<1x8xf32> to vector<8x8xf32>
    %96 = arith.addf %92, %95 : vector<8x8xf32>
    %c0_94 = arith.constant 0 : index
    %c2_95 = arith.constant 2 : index
    %c0_96 = arith.constant 0 : index
    %c0_97 = arith.constant 0 : index
    %97 = vector.load %arg6[%c0_94, %c2_95, %c0_96, %c0_97] : memref<2x4x32x8xf32, #tpu.memory_space<vmem>>, vector<1x1x32x8xf32>
    %98 = vector.shape_cast %97 : vector<1x1x32x8xf32> to vector<32x8xf32>
    %cst_98 = arith.constant dense<0.000000e+00> : vector<8x8xf32>
    %99 = tpu.matmul %1, %98, %cst_98 {dimension_numbers = #tpu.dot_dimension_numbers<[1], [0], [0], [1], [0, 0, 1, 1], [], []>} : vector<8x32xf32>, vector<32x8xf32>, vector<8x8xf32> -> vector<8x8xf32>
    %c0_99 = arith.constant 0 : index
    %c2_100 = arith.constant 2 : index
    %c0_101 = arith.constant 0 : index
    %c0_102 = arith.constant 0 : index
    %100 = vector.load %arg7[%c0_99, %c2_100, %c0_101, %c0_102] : memref<2x4x1x8xf32, #tpu.memory_space<vmem>>, vector<1x1x1x8xf32>
    %101 = vector.shape_cast %100 : vector<1x1x1x8xf32> to vector<1x8xf32>
    %102 = vector.broadcast %101 : vector<1x8xf32> to vector<8x8xf32>
    %103 = arith.addf %99, %102 : vector<8x8xf32>
    %104 = tpu.transpose %96, [1, 0] : vector<8x8xf32> -> vector<8x8xf32>
    %cst_103 = arith.constant dense<0.000000e+00> : vector<8x8xf32>
    %105 = tpu.matmul %89, %104, %cst_103 {dimension_numbers = #tpu.dot_dimension_numbers<[1], [0], [0], [1], [0, 0, 1, 1], [], []>} : vector<8x8xf32>, vector<8x8xf32>, vector<8x8xf32> -> vector<8x8xf32>
    %cst_104 = arith.constant 0.353553385 : f32
    %106 = vector.broadcast %cst_104 : f32 to vector<8x8xf32>
    %107 = arith.mulf %105, %106 : vector<8x8xf32>
    %cst_105 = arith.constant dense<0xFF800000> : vector<8xf32>
    %108 = vector.multi_reduction <maximumf>, %107, %cst_105 [1] : vector<8x8xf32> to vector<8xf32>
    %109 = vector.shape_cast %108 : vector<8xf32> to vector<8x1xf32>
    %110 = vector.broadcast %109 : vector<8x1xf32> to vector<8x8xf32>
    %111 = arith.subf %107, %110 : vector<8x8xf32>
    %112 = math.exp %111 : vector<8x8xf32>
    %cst_106 = arith.constant dense<0.000000e+00> : vector<8xf32>
    %113 = vector.multi_reduction <add>, %112, %cst_106 [1] : vector<8x8xf32> to vector<8xf32>
    %114 = vector.shape_cast %113 : vector<8xf32> to vector<8x1xf32>
    %115 = vector.broadcast %114 : vector<8x1xf32> to vector<8x8xf32>
    %116 = arith.divf %112, %115 : vector<8x8xf32>
    %cst_107 = arith.constant dense<0.000000e+00> : vector<8x8xf32>
    %117 = tpu.matmul %116, %103, %cst_107 {dimension_numbers = #tpu.dot_dimension_numbers<[1], [0], [0], [1], [0, 0, 1, 1], [], []>} : vector<8x8xf32>, vector<8x8xf32>, vector<8x8xf32> -> vector<8x8xf32>
    %c0_108 = arith.constant 0 : index
    %c2_109 = arith.constant 2 : index
    %c0_110 = arith.constant 0 : index
    %c0_111 = arith.constant 0 : index
    %118 = vector.load %arg8[%c0_108, %c2_109, %c0_110, %c0_111] : memref<2x4x8x32xf32, #tpu.memory_space<vmem>>, vector<1x1x8x32xf32>
    %119 = vector.shape_cast %118 : vector<1x1x8x32xf32> to vector<8x32xf32>
    %cst_112 = arith.constant dense<0.000000e+00> : vector<8x32xf32>
    %120 = tpu.matmul %117, %119, %cst_112 {dimension_numbers = #tpu.dot_dimension_numbers<[1], [0], [0], [1], [0, 0, 1, 1], [], []>} : vector<8x8xf32>, vector<8x32xf32>, vector<8x32xf32> -> vector<8x32xf32>
    %121 = arith.addf %82, %120 : vector<8x32xf32>
    %c0_113 = arith.constant 0 : index
    %c3 = arith.constant 3 : index
    %c0_114 = arith.constant 0 : index
    %c0_115 = arith.constant 0 : index
    %122 = vector.load %arg2[%c0_113, %c3, %c0_114, %c0_115] : memref<2x4x32x8xf32, #tpu.memory_space<vmem>>, vector<1x1x32x8xf32>
    %123 = vector.shape_cast %122 : vector<1x1x32x8xf32> to vector<32x8xf32>
    %cst_116 = arith.constant dense<0.000000e+00> : vector<8x8xf32>
    %124 = tpu.matmul %1, %123, %cst_116 {dimension_numbers = #tpu.dot_dimension_numbers<[1], [0], [0], [1], [0, 0, 1, 1], [], []>} : vector<8x32xf32>, vector<32x8xf32>, vector<8x8xf32> -> vector<8x8xf32>
    %c0_117 = arith.constant 0 : index
    %c3_118 = arith.constant 3 : index
    %c0_119 = arith.constant 0 : index
    %c0_120 = arith.constant 0 : index
    %125 = vector.load %arg3[%c0_117, %c3_118, %c0_119, %c0_120] : memref<2x4x1x8xf32, #tpu.memory_space<vmem>>, vector<1x1x1x8xf32>
    %126 = vector.shape_cast %125 : vector<1x1x1x8xf32> to vector<1x8xf32>
    %127 = vector.broadcast %126 : vector<1x8xf32> to vector<8x8xf32>
    %128 = arith.addf %124, %127 : vector<8x8xf32>
    %c0_121 = arith.constant 0 : index
    %c3_122 = arith.constant 3 : index
    %c0_123 = arith.constant 0 : index
    %c0_124 = arith.constant 0 : index
    %129 = vector.load %arg4[%c0_121, %c3_122, %c0_123, %c0_124] : memref<2x4x32x8xf32, #tpu.memory_space<vmem>>, vector<1x1x32x8xf32>
    %130 = vector.shape_cast %129 : vector<1x1x32x8xf32> to vector<32x8xf32>
    %cst_125 = arith.constant dense<0.000000e+00> : vector<8x8xf32>
    %131 = tpu.matmul %1, %130, %cst_125 {dimension_numbers = #tpu.dot_dimension_numbers<[1], [0], [0], [1], [0, 0, 1, 1], [], []>} : vector<8x32xf32>, vector<32x8xf32>, vector<8x8xf32> -> vector<8x8xf32>
    %c0_126 = arith.constant 0 : index
    %c3_127 = arith.constant 3 : index
    %c0_128 = arith.constant 0 : index
    %c0_129 = arith.constant 0 : index
    %132 = vector.load %arg5[%c0_126, %c3_127, %c0_128, %c0_129] : memref<2x4x1x8xf32, #tpu.memory_space<vmem>>, vector<1x1x1x8xf32>
    %133 = vector.shape_cast %132 : vector<1x1x1x8xf32> to vector<1x8xf32>
    %134 = vector.broadcast %133 : vector<1x8xf32> to vector<8x8xf32>
    %135 = arith.addf %131, %134 : vector<8x8xf32>
    %c0_130 = arith.constant 0 : index
    %c3_131 = arith.constant 3 : index
    %c0_132 = arith.constant 0 : index
    %c0_133 = arith.constant 0 : index
    %136 = vector.load %arg6[%c0_130, %c3_131, %c0_132, %c0_133] : memref<2x4x32x8xf32, #tpu.memory_space<vmem>>, vector<1x1x32x8xf32>
    %137 = vector.shape_cast %136 : vector<1x1x32x8xf32> to vector<32x8xf32>
    %cst_134 = arith.constant dense<0.000000e+00> : vector<8x8xf32>
    %138 = tpu.matmul %1, %137, %cst_134 {dimension_numbers = #tpu.dot_dimension_numbers<[1], [0], [0], [1], [0, 0, 1, 1], [], []>} : vector<8x32xf32>, vector<32x8xf32>, vector<8x8xf32> -> vector<8x8xf32>
    %c0_135 = arith.constant 0 : index
    %c3_136 = arith.constant 3 : index
    %c0_137 = arith.constant 0 : index
    %c0_138 = arith.constant 0 : index
    %139 = vector.load %arg7[%c0_135, %c3_136, %c0_137, %c0_138] : memref<2x4x1x8xf32, #tpu.memory_space<vmem>>, vector<1x1x1x8xf32>
    %140 = vector.shape_cast %139 : vector<1x1x1x8xf32> to vector<1x8xf32>
    %141 = vector.broadcast %140 : vector<1x8xf32> to vector<8x8xf32>
    %142 = arith.addf %138, %141 : vector<8x8xf32>
    %143 = tpu.transpose %135, [1, 0] : vector<8x8xf32> -> vector<8x8xf32>
    %cst_139 = arith.constant dense<0.000000e+00> : vector<8x8xf32>
    %144 = tpu.matmul %128, %143, %cst_139 {dimension_numbers = #tpu.dot_dimension_numbers<[1], [0], [0], [1], [0, 0, 1, 1], [], []>} : vector<8x8xf32>, vector<8x8xf32>, vector<8x8xf32> -> vector<8x8xf32>
    %cst_140 = arith.constant 0.353553385 : f32
    %145 = vector.broadcast %cst_140 : f32 to vector<8x8xf32>
    %146 = arith.mulf %144, %145 : vector<8x8xf32>
    %cst_141 = arith.constant dense<0xFF800000> : vector<8xf32>
    %147 = vector.multi_reduction <maximumf>, %146, %cst_141 [1] : vector<8x8xf32> to vector<8xf32>
    %148 = vector.shape_cast %147 : vector<8xf32> to vector<8x1xf32>
    %149 = vector.broadcast %148 : vector<8x1xf32> to vector<8x8xf32>
    %150 = arith.subf %146, %149 : vector<8x8xf32>
    %151 = math.exp %150 : vector<8x8xf32>
    %cst_142 = arith.constant dense<0.000000e+00> : vector<8xf32>
    %152 = vector.multi_reduction <add>, %151, %cst_142 [1] : vector<8x8xf32> to vector<8xf32>
    %153 = vector.shape_cast %152 : vector<8xf32> to vector<8x1xf32>
    %154 = vector.broadcast %153 : vector<8x1xf32> to vector<8x8xf32>
    %155 = arith.divf %151, %154 : vector<8x8xf32>
    %cst_143 = arith.constant dense<0.000000e+00> : vector<8x8xf32>
    %156 = tpu.matmul %155, %142, %cst_143 {dimension_numbers = #tpu.dot_dimension_numbers<[1], [0], [0], [1], [0, 0, 1, 1], [], []>} : vector<8x8xf32>, vector<8x8xf32>, vector<8x8xf32> -> vector<8x8xf32>
    %c0_144 = arith.constant 0 : index
    %c3_145 = arith.constant 3 : index
    %c0_146 = arith.constant 0 : index
    %c0_147 = arith.constant 0 : index
    %157 = vector.load %arg8[%c0_144, %c3_145, %c0_146, %c0_147] : memref<2x4x8x32xf32, #tpu.memory_space<vmem>>, vector<1x1x8x32xf32>
    %158 = vector.shape_cast %157 : vector<1x1x8x32xf32> to vector<8x32xf32>
    %cst_148 = arith.constant dense<0.000000e+00> : vector<8x32xf32>
    %159 = tpu.matmul %156, %158, %cst_148 {dimension_numbers = #tpu.dot_dimension_numbers<[1], [0], [0], [1], [0, 0, 1, 1], [], []>} : vector<8x8xf32>, vector<8x32xf32>, vector<8x32xf32> -> vector<8x32xf32>
    %160 = arith.addf %121, %159 : vector<8x32xf32>
    %161 = arith.addf %1, %160 : vector<8x32xf32>
    %c0_149 = arith.constant 0 : index
    %c0_150 = arith.constant 0 : index
    %c0_151 = arith.constant 0 : index
    %162 = vector.load %arg14[%c0_149, %c0_150, %c0_151] : memref<2x1x32xf32, #tpu.memory_space<vmem>>, vector<1x1x32xf32>
    %163 = vector.shape_cast %162 : vector<1x1x32xf32> to vector<1x32xf32>
    %c0_152 = arith.constant 0 : index
    %c0_153 = arith.constant 0 : index
    %c0_154 = arith.constant 0 : index
    %164 = vector.load %arg15[%c0_152, %c0_153, %c0_154] : memref<2x1x32xf32, #tpu.memory_space<vmem>>, vector<1x1x32xf32>
    %165 = vector.shape_cast %164 : vector<1x1x32xf32> to vector<1x32xf32>
    %cst_155 = arith.constant dense<0.000000e+00> : vector<8xf32>
    %166 = vector.multi_reduction <add>, %161, %cst_155 [1] : vector<8x32xf32> to vector<8xf32>
    %167 = vector.shape_cast %166 : vector<8xf32> to vector<8x1xf32>
    %cst_156 = arith.constant 3.200000e+01 : f32
    %168 = vector.broadcast %cst_156 : f32 to vector<8x1xf32>
    %169 = arith.divf %167, %168 : vector<8x1xf32>
    %170 = vector.broadcast %169 : vector<8x1xf32> to vector<8x32xf32>
    %171 = arith.subf %161, %170 : vector<8x32xf32>
    %172 = arith.mulf %171, %171 : vector<8x32xf32>
    %cst_157 = arith.constant dense<0.000000e+00> : vector<8xf32>
    %173 = vector.multi_reduction <add>, %172, %cst_157 [1] : vector<8x32xf32> to vector<8xf32>
    %174 = vector.shape_cast %173 : vector<8xf32> to vector<8x1xf32>
    %cst_158 = arith.constant 3.200000e+01 : f32
    %175 = vector.broadcast %cst_158 : f32 to vector<8x1xf32>
    %176 = arith.divf %174, %175 : vector<8x1xf32>
    %177 = vector.broadcast %169 : vector<8x1xf32> to vector<8x32xf32>
    %178 = arith.subf %161, %177 : vector<8x32xf32>
    %cst_159 = arith.constant 9.99999974E-6 : f32
    %179 = vector.broadcast %cst_159 : f32 to vector<8x1xf32>
    %180 = arith.addf %176, %179 : vector<8x1xf32>
    %181 = math.rsqrt %180 : vector<8x1xf32>
    %182 = vector.broadcast %181 : vector<8x1xf32> to vector<8x32xf32>
    %183 = arith.mulf %178, %182 : vector<8x32xf32>
    %184 = vector.broadcast %163 : vector<1x32xf32> to vector<8x32xf32>
    %185 = arith.mulf %183, %184 : vector<8x32xf32>
    %186 = vector.broadcast %165 : vector<1x32xf32> to vector<8x32xf32>
    %187 = arith.addf %185, %186 : vector<8x32xf32>
    %c0_160 = arith.constant 0 : index
    %c0_161 = arith.constant 0 : index
    %c0_162 = arith.constant 0 : index
    %188 = vector.load %arg10[%c0_160, %c0_161, %c0_162] : memref<2x32x64xf32, #tpu.memory_space<vmem>>, vector<1x32x64xf32>
    %189 = vector.shape_cast %188 : vector<1x32x64xf32> to vector<32x64xf32>
    %cst_163 = arith.constant dense<0.000000e+00> : vector<8x64xf32>
    %190 = tpu.matmul %187, %189, %cst_163 {dimension_numbers = #tpu.dot_dimension_numbers<[1], [0], [0], [1], [0, 0, 1, 1], [], []>} : vector<8x32xf32>, vector<32x64xf32>, vector<8x64xf32> -> vector<8x64xf32>
    %c0_164 = arith.constant 0 : index
    %c0_165 = arith.constant 0 : index
    %c0_166 = arith.constant 0 : index
    %191 = vector.load %arg11[%c0_164, %c0_165, %c0_166] : memref<2x1x64xf32, #tpu.memory_space<vmem>>, vector<1x1x64xf32>
    %192 = vector.shape_cast %191 : vector<1x1x64xf32> to vector<1x64xf32>
    %193 = vector.broadcast %192 : vector<1x64xf32> to vector<8x64xf32>
    %194 = arith.addf %190, %193 : vector<8x64xf32>
    %cst_167 = arith.constant 0.000000e+00 : f32
    %195 = vector.broadcast %cst_167 : f32 to vector<8x64xf32>
    %196 = arith.maximumf %194, %195 : vector<8x64xf32>
    %c0_168 = arith.constant 0 : index
    %c0_169 = arith.constant 0 : index
    %c0_170 = arith.constant 0 : index
    %197 = vector.load %arg12[%c0_168, %c0_169, %c0_170] : memref<2x64x32xf32, #tpu.memory_space<vmem>>, vector<1x64x32xf32>
    %198 = vector.shape_cast %197 : vector<1x64x32xf32> to vector<64x32xf32>
    %cst_171 = arith.constant dense<0.000000e+00> : vector<8x32xf32>
    %199 = tpu.matmul %196, %198, %cst_171 {dimension_numbers = #tpu.dot_dimension_numbers<[1], [0], [0], [1], [0, 0, 1, 1], [], []>} : vector<8x64xf32>, vector<64x32xf32>, vector<8x32xf32> -> vector<8x32xf32>
    %c0_172 = arith.constant 0 : index
    %c0_173 = arith.constant 0 : index
    %c0_174 = arith.constant 0 : index
    %200 = vector.load %arg13[%c0_172, %c0_173, %c0_174] : memref<2x1x32xf32, #tpu.memory_space<vmem>>, vector<1x1x32xf32>
    %201 = vector.shape_cast %200 : vector<1x1x32xf32> to vector<1x32xf32>
    %202 = vector.broadcast %201 : vector<1x32xf32> to vector<8x32xf32>
    %203 = arith.addf %199, %202 : vector<8x32xf32>
    %204 = arith.addf %187, %203 : vector<8x32xf32>
    %c0_175 = arith.constant 0 : index
    %c0_176 = arith.constant 0 : index
    %c0_177 = arith.constant 0 : index
    %205 = vector.load %arg16[%c0_175, %c0_176, %c0_177] : memref<2x1x32xf32, #tpu.memory_space<vmem>>, vector<1x1x32xf32>
    %206 = vector.shape_cast %205 : vector<1x1x32xf32> to vector<1x32xf32>
    %c0_178 = arith.constant 0 : index
    %c0_179 = arith.constant 0 : index
    %c0_180 = arith.constant 0 : index
    %207 = vector.load %arg17[%c0_178, %c0_179, %c0_180] : memref<2x1x32xf32, #tpu.memory_space<vmem>>, vector<1x1x32xf32>
    %208 = vector.shape_cast %207 : vector<1x1x32xf32> to vector<1x32xf32>
    %cst_181 = arith.constant dense<0.000000e+00> : vector<8xf32>
    %209 = vector.multi_reduction <add>, %204, %cst_181 [1] : vector<8x32xf32> to vector<8xf32>
    %210 = vector.shape_cast %209 : vector<8xf32> to vector<8x1xf32>
    %cst_182 = arith.constant 3.200000e+01 : f32
    %211 = vector.broadcast %cst_182 : f32 to vector<8x1xf32>
    %212 = arith.divf %210, %211 : vector<8x1xf32>
    %213 = vector.broadcast %212 : vector<8x1xf32> to vector<8x32xf32>
    %214 = arith.subf %204, %213 : vector<8x32xf32>
    %215 = arith.mulf %214, %214 : vector<8x32xf32>
    %cst_183 = arith.constant dense<0.000000e+00> : vector<8xf32>
    %216 = vector.multi_reduction <add>, %215, %cst_183 [1] : vector<8x32xf32> to vector<8xf32>
    %217 = vector.shape_cast %216 : vector<8xf32> to vector<8x1xf32>
    %cst_184 = arith.constant 3.200000e+01 : f32
    %218 = vector.broadcast %cst_184 : f32 to vector<8x1xf32>
    %219 = arith.divf %217, %218 : vector<8x1xf32>
    %220 = vector.broadcast %212 : vector<8x1xf32> to vector<8x32xf32>
    %221 = arith.subf %204, %220 : vector<8x32xf32>
    %cst_185 = arith.constant 9.99999974E-6 : f32
    %222 = vector.broadcast %cst_185 : f32 to vector<8x1xf32>
    %223 = arith.addf %219, %222 : vector<8x1xf32>
    %224 = math.rsqrt %223 : vector<8x1xf32>
    %225 = vector.broadcast %224 : vector<8x1xf32> to vector<8x32xf32>
    %226 = arith.mulf %221, %225 : vector<8x32xf32>
    %227 = vector.broadcast %206 : vector<1x32xf32> to vector<8x32xf32>
    %228 = arith.mulf %226, %227 : vector<8x32xf32>
    %229 = vector.broadcast %208 : vector<1x32xf32> to vector<8x32xf32>
    %230 = arith.addf %228, %229 : vector<8x32xf32>
    %c1_186 = arith.constant 1 : index
    %c0_187 = arith.constant 0 : index
    %c0_188 = arith.constant 0 : index
    %231 = vector.load %arg9[%c1_186, %c0_187, %c0_188] : memref<2x1x32xf32, #tpu.memory_space<vmem>>, vector<1x1x32xf32>
    %232 = vector.shape_cast %231 : vector<1x1x32xf32> to vector<1x32xf32>
    %c1_189 = arith.constant 1 : index
    %c0_190 = arith.constant 0 : index
    %c0_191 = arith.constant 0 : index
    %c0_192 = arith.constant 0 : index
    %233 = vector.load %arg2[%c1_189, %c0_190, %c0_191, %c0_192] : memref<2x4x32x8xf32, #tpu.memory_space<vmem>>, vector<1x1x32x8xf32>
    %234 = vector.shape_cast %233 : vector<1x1x32x8xf32> to vector<32x8xf32>
    %cst_193 = arith.constant dense<0.000000e+00> : vector<8x8xf32>
    %235 = tpu.matmul %230, %234, %cst_193 {dimension_numbers = #tpu.dot_dimension_numbers<[1], [0], [0], [1], [0, 0, 1, 1], [], []>} : vector<8x32xf32>, vector<32x8xf32>, vector<8x8xf32> -> vector<8x8xf32>
    %c1_194 = arith.constant 1 : index
    %c0_195 = arith.constant 0 : index
    %c0_196 = arith.constant 0 : index
    %c0_197 = arith.constant 0 : index
    %236 = vector.load %arg3[%c1_194, %c0_195, %c0_196, %c0_197] : memref<2x4x1x8xf32, #tpu.memory_space<vmem>>, vector<1x1x1x8xf32>
    %237 = vector.shape_cast %236 : vector<1x1x1x8xf32> to vector<1x8xf32>
    %238 = vector.broadcast %237 : vector<1x8xf32> to vector<8x8xf32>
    %239 = arith.addf %235, %238 : vector<8x8xf32>
    %c1_198 = arith.constant 1 : index
    %c0_199 = arith.constant 0 : index
    %c0_200 = arith.constant 0 : index
    %c0_201 = arith.constant 0 : index
    %240 = vector.load %arg4[%c1_198, %c0_199, %c0_200, %c0_201] : memref<2x4x32x8xf32, #tpu.memory_space<vmem>>, vector<1x1x32x8xf32>
    %241 = vector.shape_cast %240 : vector<1x1x32x8xf32> to vector<32x8xf32>
    %cst_202 = arith.constant dense<0.000000e+00> : vector<8x8xf32>
    %242 = tpu.matmul %230, %241, %cst_202 {dimension_numbers = #tpu.dot_dimension_numbers<[1], [0], [0], [1], [0, 0, 1, 1], [], []>} : vector<8x32xf32>, vector<32x8xf32>, vector<8x8xf32> -> vector<8x8xf32>
    %c1_203 = arith.constant 1 : index
    %c0_204 = arith.constant 0 : index
    %c0_205 = arith.constant 0 : index
    %c0_206 = arith.constant 0 : index
    %243 = vector.load %arg5[%c1_203, %c0_204, %c0_205, %c0_206] : memref<2x4x1x8xf32, #tpu.memory_space<vmem>>, vector<1x1x1x8xf32>
    %244 = vector.shape_cast %243 : vector<1x1x1x8xf32> to vector<1x8xf32>
    %245 = vector.broadcast %244 : vector<1x8xf32> to vector<8x8xf32>
    %246 = arith.addf %242, %245 : vector<8x8xf32>
    %c1_207 = arith.constant 1 : index
    %c0_208 = arith.constant 0 : index
    %c0_209 = arith.constant 0 : index
    %c0_210 = arith.constant 0 : index
    %247 = vector.load %arg6[%c1_207, %c0_208, %c0_209, %c0_210] : memref<2x4x32x8xf32, #tpu.memory_space<vmem>>, vector<1x1x32x8xf32>
    %248 = vector.shape_cast %247 : vector<1x1x32x8xf32> to vector<32x8xf32>
    %cst_211 = arith.constant dense<0.000000e+00> : vector<8x8xf32>
    %249 = tpu.matmul %230, %248, %cst_211 {dimension_numbers = #tpu.dot_dimension_numbers<[1], [0], [0], [1], [0, 0, 1, 1], [], []>} : vector<8x32xf32>, vector<32x8xf32>, vector<8x8xf32> -> vector<8x8xf32>
    %c1_212 = arith.constant 1 : index
    %c0_213 = arith.constant 0 : index
    %c0_214 = arith.constant 0 : index
    %c0_215 = arith.constant 0 : index
    %250 = vector.load %arg7[%c1_212, %c0_213, %c0_214, %c0_215] : memref<2x4x1x8xf32, #tpu.memory_space<vmem>>, vector<1x1x1x8xf32>
    %251 = vector.shape_cast %250 : vector<1x1x1x8xf32> to vector<1x8xf32>
    %252 = vector.broadcast %251 : vector<1x8xf32> to vector<8x8xf32>
    %253 = arith.addf %249, %252 : vector<8x8xf32>
    %254 = tpu.transpose %246, [1, 0] : vector<8x8xf32> -> vector<8x8xf32>
    %cst_216 = arith.constant dense<0.000000e+00> : vector<8x8xf32>
    %255 = tpu.matmul %239, %254, %cst_216 {dimension_numbers = #tpu.dot_dimension_numbers<[1], [0], [0], [1], [0, 0, 1, 1], [], []>} : vector<8x8xf32>, vector<8x8xf32>, vector<8x8xf32> -> vector<8x8xf32>
    %cst_217 = arith.constant 0.353553385 : f32
    %256 = vector.broadcast %cst_217 : f32 to vector<8x8xf32>
    %257 = arith.mulf %255, %256 : vector<8x8xf32>
    %cst_218 = arith.constant dense<0xFF800000> : vector<8xf32>
    %258 = vector.multi_reduction <maximumf>, %257, %cst_218 [1] : vector<8x8xf32> to vector<8xf32>
    %259 = vector.shape_cast %258 : vector<8xf32> to vector<8x1xf32>
    %260 = vector.broadcast %259 : vector<8x1xf32> to vector<8x8xf32>
    %261 = arith.subf %257, %260 : vector<8x8xf32>
    %262 = math.exp %261 : vector<8x8xf32>
    %cst_219 = arith.constant dense<0.000000e+00> : vector<8xf32>
    %263 = vector.multi_reduction <add>, %262, %cst_219 [1] : vector<8x8xf32> to vector<8xf32>
    %264 = vector.shape_cast %263 : vector<8xf32> to vector<8x1xf32>
    %265 = vector.broadcast %264 : vector<8x1xf32> to vector<8x8xf32>
    %266 = arith.divf %262, %265 : vector<8x8xf32>
    %cst_220 = arith.constant dense<0.000000e+00> : vector<8x8xf32>
    %267 = tpu.matmul %266, %253, %cst_220 {dimension_numbers = #tpu.dot_dimension_numbers<[1], [0], [0], [1], [0, 0, 1, 1], [], []>} : vector<8x8xf32>, vector<8x8xf32>, vector<8x8xf32> -> vector<8x8xf32>
    %c1_221 = arith.constant 1 : index
    %c0_222 = arith.constant 0 : index
    %c0_223 = arith.constant 0 : index
    %c0_224 = arith.constant 0 : index
    %268 = vector.load %arg8[%c1_221, %c0_222, %c0_223, %c0_224] : memref<2x4x8x32xf32, #tpu.memory_space<vmem>>, vector<1x1x8x32xf32>
    %269 = vector.shape_cast %268 : vector<1x1x8x32xf32> to vector<8x32xf32>
    %cst_225 = arith.constant dense<0.000000e+00> : vector<8x32xf32>
    %270 = tpu.matmul %267, %269, %cst_225 {dimension_numbers = #tpu.dot_dimension_numbers<[1], [0], [0], [1], [0, 0, 1, 1], [], []>} : vector<8x8xf32>, vector<8x32xf32>, vector<8x32xf32> -> vector<8x32xf32>
    %271 = vector.broadcast %232 : vector<1x32xf32> to vector<8x32xf32>
    %272 = arith.addf %271, %270 : vector<8x32xf32>
    %c1_226 = arith.constant 1 : index
    %c1_227 = arith.constant 1 : index
    %c0_228 = arith.constant 0 : index
    %c0_229 = arith.constant 0 : index
    %273 = vector.load %arg2[%c1_226, %c1_227, %c0_228, %c0_229] : memref<2x4x32x8xf32, #tpu.memory_space<vmem>>, vector<1x1x32x8xf32>
    %274 = vector.shape_cast %273 : vector<1x1x32x8xf32> to vector<32x8xf32>
    %cst_230 = arith.constant dense<0.000000e+00> : vector<8x8xf32>
    %275 = tpu.matmul %230, %274, %cst_230 {dimension_numbers = #tpu.dot_dimension_numbers<[1], [0], [0], [1], [0, 0, 1, 1], [], []>} : vector<8x32xf32>, vector<32x8xf32>, vector<8x8xf32> -> vector<8x8xf32>
    %c1_231 = arith.constant 1 : index
    %c1_232 = arith.constant 1 : index
    %c0_233 = arith.constant 0 : index
    %c0_234 = arith.constant 0 : index
    %276 = vector.load %arg3[%c1_231, %c1_232, %c0_233, %c0_234] : memref<2x4x1x8xf32, #tpu.memory_space<vmem>>, vector<1x1x1x8xf32>
    %277 = vector.shape_cast %276 : vector<1x1x1x8xf32> to vector<1x8xf32>
    %278 = vector.broadcast %277 : vector<1x8xf32> to vector<8x8xf32>
    %279 = arith.addf %275, %278 : vector<8x8xf32>
    %c1_235 = arith.constant 1 : index
    %c1_236 = arith.constant 1 : index
    %c0_237 = arith.constant 0 : index
    %c0_238 = arith.constant 0 : index
    %280 = vector.load %arg4[%c1_235, %c1_236, %c0_237, %c0_238] : memref<2x4x32x8xf32, #tpu.memory_space<vmem>>, vector<1x1x32x8xf32>
    %281 = vector.shape_cast %280 : vector<1x1x32x8xf32> to vector<32x8xf32>
    %cst_239 = arith.constant dense<0.000000e+00> : vector<8x8xf32>
    %282 = tpu.matmul %230, %281, %cst_239 {dimension_numbers = #tpu.dot_dimension_numbers<[1], [0], [0], [1], [0, 0, 1, 1], [], []>} : vector<8x32xf32>, vector<32x8xf32>, vector<8x8xf32> -> vector<8x8xf32>
    %c1_240 = arith.constant 1 : index
    %c1_241 = arith.constant 1 : index
    %c0_242 = arith.constant 0 : index
    %c0_243 = arith.constant 0 : index
    %283 = vector.load %arg5[%c1_240, %c1_241, %c0_242, %c0_243] : memref<2x4x1x8xf32, #tpu.memory_space<vmem>>, vector<1x1x1x8xf32>
    %284 = vector.shape_cast %283 : vector<1x1x1x8xf32> to vector<1x8xf32>
    %285 = vector.broadcast %284 : vector<1x8xf32> to vector<8x8xf32>
    %286 = arith.addf %282, %285 : vector<8x8xf32>
    %c1_244 = arith.constant 1 : index
    %c1_245 = arith.constant 1 : index
    %c0_246 = arith.constant 0 : index
    %c0_247 = arith.constant 0 : index
    %287 = vector.load %arg6[%c1_244, %c1_245, %c0_246, %c0_247] : memref<2x4x32x8xf32, #tpu.memory_space<vmem>>, vector<1x1x32x8xf32>
    %288 = vector.shape_cast %287 : vector<1x1x32x8xf32> to vector<32x8xf32>
    %cst_248 = arith.constant dense<0.000000e+00> : vector<8x8xf32>
    %289 = tpu.matmul %230, %288, %cst_248 {dimension_numbers = #tpu.dot_dimension_numbers<[1], [0], [0], [1], [0, 0, 1, 1], [], []>} : vector<8x32xf32>, vector<32x8xf32>, vector<8x8xf32> -> vector<8x8xf32>
    %c1_249 = arith.constant 1 : index
    %c1_250 = arith.constant 1 : index
    %c0_251 = arith.constant 0 : index
    %c0_252 = arith.constant 0 : index
    %290 = vector.load %arg7[%c1_249, %c1_250, %c0_251, %c0_252] : memref<2x4x1x8xf32, #tpu.memory_space<vmem>>, vector<1x1x1x8xf32>
    %291 = vector.shape_cast %290 : vector<1x1x1x8xf32> to vector<1x8xf32>
    %292 = vector.broadcast %291 : vector<1x8xf32> to vector<8x8xf32>
    %293 = arith.addf %289, %292 : vector<8x8xf32>
    %294 = tpu.transpose %286, [1, 0] : vector<8x8xf32> -> vector<8x8xf32>
    %cst_253 = arith.constant dense<0.000000e+00> : vector<8x8xf32>
    %295 = tpu.matmul %279, %294, %cst_253 {dimension_numbers = #tpu.dot_dimension_numbers<[1], [0], [0], [1], [0, 0, 1, 1], [], []>} : vector<8x8xf32>, vector<8x8xf32>, vector<8x8xf32> -> vector<8x8xf32>
    %cst_254 = arith.constant 0.353553385 : f32
    %296 = vector.broadcast %cst_254 : f32 to vector<8x8xf32>
    %297 = arith.mulf %295, %296 : vector<8x8xf32>
    %cst_255 = arith.constant dense<0xFF800000> : vector<8xf32>
    %298 = vector.multi_reduction <maximumf>, %297, %cst_255 [1] : vector<8x8xf32> to vector<8xf32>
    %299 = vector.shape_cast %298 : vector<8xf32> to vector<8x1xf32>
    %300 = vector.broadcast %299 : vector<8x1xf32> to vector<8x8xf32>
    %301 = arith.subf %297, %300 : vector<8x8xf32>
    %302 = math.exp %301 : vector<8x8xf32>
    %cst_256 = arith.constant dense<0.000000e+00> : vector<8xf32>
    %303 = vector.multi_reduction <add>, %302, %cst_256 [1] : vector<8x8xf32> to vector<8xf32>
    %304 = vector.shape_cast %303 : vector<8xf32> to vector<8x1xf32>
    %305 = vector.broadcast %304 : vector<8x1xf32> to vector<8x8xf32>
    %306 = arith.divf %302, %305 : vector<8x8xf32>
    %cst_257 = arith.constant dense<0.000000e+00> : vector<8x8xf32>
    %307 = tpu.matmul %306, %293, %cst_257 {dimension_numbers = #tpu.dot_dimension_numbers<[1], [0], [0], [1], [0, 0, 1, 1], [], []>} : vector<8x8xf32>, vector<8x8xf32>, vector<8x8xf32> -> vector<8x8xf32>
    %c1_258 = arith.constant 1 : index
    %c1_259 = arith.constant 1 : index
    %c0_260 = arith.constant 0 : index
    %c0_261 = arith.constant 0 : index
    %308 = vector.load %arg8[%c1_258, %c1_259, %c0_260, %c0_261] : memref<2x4x8x32xf32, #tpu.memory_space<vmem>>, vector<1x1x8x32xf32>
    %309 = vector.shape_cast %308 : vector<1x1x8x32xf32> to vector<8x32xf32>
    %cst_262 = arith.constant dense<0.000000e+00> : vector<8x32xf32>
    %310 = tpu.matmul %307, %309, %cst_262 {dimension_numbers = #tpu.dot_dimension_numbers<[1], [0], [0], [1], [0, 0, 1, 1], [], []>} : vector<8x8xf32>, vector<8x32xf32>, vector<8x32xf32> -> vector<8x32xf32>
    %311 = arith.addf %272, %310 : vector<8x32xf32>
    %c1_263 = arith.constant 1 : index
    %c2_264 = arith.constant 2 : index
    %c0_265 = arith.constant 0 : index
    %c0_266 = arith.constant 0 : index
    %312 = vector.load %arg2[%c1_263, %c2_264, %c0_265, %c0_266] : memref<2x4x32x8xf32, #tpu.memory_space<vmem>>, vector<1x1x32x8xf32>
    %313 = vector.shape_cast %312 : vector<1x1x32x8xf32> to vector<32x8xf32>
    %cst_267 = arith.constant dense<0.000000e+00> : vector<8x8xf32>
    %314 = tpu.matmul %230, %313, %cst_267 {dimension_numbers = #tpu.dot_dimension_numbers<[1], [0], [0], [1], [0, 0, 1, 1], [], []>} : vector<8x32xf32>, vector<32x8xf32>, vector<8x8xf32> -> vector<8x8xf32>
    %c1_268 = arith.constant 1 : index
    %c2_269 = arith.constant 2 : index
    %c0_270 = arith.constant 0 : index
    %c0_271 = arith.constant 0 : index
    %315 = vector.load %arg3[%c1_268, %c2_269, %c0_270, %c0_271] : memref<2x4x1x8xf32, #tpu.memory_space<vmem>>, vector<1x1x1x8xf32>
    %316 = vector.shape_cast %315 : vector<1x1x1x8xf32> to vector<1x8xf32>
    %317 = vector.broadcast %316 : vector<1x8xf32> to vector<8x8xf32>
    %318 = arith.addf %314, %317 : vector<8x8xf32>
    %c1_272 = arith.constant 1 : index
    %c2_273 = arith.constant 2 : index
    %c0_274 = arith.constant 0 : index
    %c0_275 = arith.constant 0 : index
    %319 = vector.load %arg4[%c1_272, %c2_273, %c0_274, %c0_275] : memref<2x4x32x8xf32, #tpu.memory_space<vmem>>, vector<1x1x32x8xf32>
    %320 = vector.shape_cast %319 : vector<1x1x32x8xf32> to vector<32x8xf32>
    %cst_276 = arith.constant dense<0.000000e+00> : vector<8x8xf32>
    %321 = tpu.matmul %230, %320, %cst_276 {dimension_numbers = #tpu.dot_dimension_numbers<[1], [0], [0], [1], [0, 0, 1, 1], [], []>} : vector<8x32xf32>, vector<32x8xf32>, vector<8x8xf32> -> vector<8x8xf32>
    %c1_277 = arith.constant 1 : index
    %c2_278 = arith.constant 2 : index
    %c0_279 = arith.constant 0 : index
    %c0_280 = arith.constant 0 : index
    %322 = vector.load %arg5[%c1_277, %c2_278, %c0_279, %c0_280] : memref<2x4x1x8xf32, #tpu.memory_space<vmem>>, vector<1x1x1x8xf32>
    %323 = vector.shape_cast %322 : vector<1x1x1x8xf32> to vector<1x8xf32>
    %324 = vector.broadcast %323 : vector<1x8xf32> to vector<8x8xf32>
    %325 = arith.addf %321, %324 : vector<8x8xf32>
    %c1_281 = arith.constant 1 : index
    %c2_282 = arith.constant 2 : index
    %c0_283 = arith.constant 0 : index
    %c0_284 = arith.constant 0 : index
    %326 = vector.load %arg6[%c1_281, %c2_282, %c0_283, %c0_284] : memref<2x4x32x8xf32, #tpu.memory_space<vmem>>, vector<1x1x32x8xf32>
    %327 = vector.shape_cast %326 : vector<1x1x32x8xf32> to vector<32x8xf32>
    %cst_285 = arith.constant dense<0.000000e+00> : vector<8x8xf32>
    %328 = tpu.matmul %230, %327, %cst_285 {dimension_numbers = #tpu.dot_dimension_numbers<[1], [0], [0], [1], [0, 0, 1, 1], [], []>} : vector<8x32xf32>, vector<32x8xf32>, vector<8x8xf32> -> vector<8x8xf32>
    %c1_286 = arith.constant 1 : index
    %c2_287 = arith.constant 2 : index
    %c0_288 = arith.constant 0 : index
    %c0_289 = arith.constant 0 : index
    %329 = vector.load %arg7[%c1_286, %c2_287, %c0_288, %c0_289] : memref<2x4x1x8xf32, #tpu.memory_space<vmem>>, vector<1x1x1x8xf32>
    %330 = vector.shape_cast %329 : vector<1x1x1x8xf32> to vector<1x8xf32>
    %331 = vector.broadcast %330 : vector<1x8xf32> to vector<8x8xf32>
    %332 = arith.addf %328, %331 : vector<8x8xf32>
    %333 = tpu.transpose %325, [1, 0] : vector<8x8xf32> -> vector<8x8xf32>
    %cst_290 = arith.constant dense<0.000000e+00> : vector<8x8xf32>
    %334 = tpu.matmul %318, %333, %cst_290 {dimension_numbers = #tpu.dot_dimension_numbers<[1], [0], [0], [1], [0, 0, 1, 1], [], []>} : vector<8x8xf32>, vector<8x8xf32>, vector<8x8xf32> -> vector<8x8xf32>
    %cst_291 = arith.constant 0.353553385 : f32
    %335 = vector.broadcast %cst_291 : f32 to vector<8x8xf32>
    %336 = arith.mulf %334, %335 : vector<8x8xf32>
    %cst_292 = arith.constant dense<0xFF800000> : vector<8xf32>
    %337 = vector.multi_reduction <maximumf>, %336, %cst_292 [1] : vector<8x8xf32> to vector<8xf32>
    %338 = vector.shape_cast %337 : vector<8xf32> to vector<8x1xf32>
    %339 = vector.broadcast %338 : vector<8x1xf32> to vector<8x8xf32>
    %340 = arith.subf %336, %339 : vector<8x8xf32>
    %341 = math.exp %340 : vector<8x8xf32>
    %cst_293 = arith.constant dense<0.000000e+00> : vector<8xf32>
    %342 = vector.multi_reduction <add>, %341, %cst_293 [1] : vector<8x8xf32> to vector<8xf32>
    %343 = vector.shape_cast %342 : vector<8xf32> to vector<8x1xf32>
    %344 = vector.broadcast %343 : vector<8x1xf32> to vector<8x8xf32>
    %345 = arith.divf %341, %344 : vector<8x8xf32>
    %cst_294 = arith.constant dense<0.000000e+00> : vector<8x8xf32>
    %346 = tpu.matmul %345, %332, %cst_294 {dimension_numbers = #tpu.dot_dimension_numbers<[1], [0], [0], [1], [0, 0, 1, 1], [], []>} : vector<8x8xf32>, vector<8x8xf32>, vector<8x8xf32> -> vector<8x8xf32>
    %c1_295 = arith.constant 1 : index
    %c2_296 = arith.constant 2 : index
    %c0_297 = arith.constant 0 : index
    %c0_298 = arith.constant 0 : index
    %347 = vector.load %arg8[%c1_295, %c2_296, %c0_297, %c0_298] : memref<2x4x8x32xf32, #tpu.memory_space<vmem>>, vector<1x1x8x32xf32>
    %348 = vector.shape_cast %347 : vector<1x1x8x32xf32> to vector<8x32xf32>
    %cst_299 = arith.constant dense<0.000000e+00> : vector<8x32xf32>
    %349 = tpu.matmul %346, %348, %cst_299 {dimension_numbers = #tpu.dot_dimension_numbers<[1], [0], [0], [1], [0, 0, 1, 1], [], []>} : vector<8x8xf32>, vector<8x32xf32>, vector<8x32xf32> -> vector<8x32xf32>
    %350 = arith.addf %311, %349 : vector<8x32xf32>
    %c1_300 = arith.constant 1 : index
    %c3_301 = arith.constant 3 : index
    %c0_302 = arith.constant 0 : index
    %c0_303 = arith.constant 0 : index
    %351 = vector.load %arg2[%c1_300, %c3_301, %c0_302, %c0_303] : memref<2x4x32x8xf32, #tpu.memory_space<vmem>>, vector<1x1x32x8xf32>
    %352 = vector.shape_cast %351 : vector<1x1x32x8xf32> to vector<32x8xf32>
    %cst_304 = arith.constant dense<0.000000e+00> : vector<8x8xf32>
    %353 = tpu.matmul %230, %352, %cst_304 {dimension_numbers = #tpu.dot_dimension_numbers<[1], [0], [0], [1], [0, 0, 1, 1], [], []>} : vector<8x32xf32>, vector<32x8xf32>, vector<8x8xf32> -> vector<8x8xf32>
    %c1_305 = arith.constant 1 : index
    %c3_306 = arith.constant 3 : index
    %c0_307 = arith.constant 0 : index
    %c0_308 = arith.constant 0 : index
    %354 = vector.load %arg3[%c1_305, %c3_306, %c0_307, %c0_308] : memref<2x4x1x8xf32, #tpu.memory_space<vmem>>, vector<1x1x1x8xf32>
    %355 = vector.shape_cast %354 : vector<1x1x1x8xf32> to vector<1x8xf32>
    %356 = vector.broadcast %355 : vector<1x8xf32> to vector<8x8xf32>
    %357 = arith.addf %353, %356 : vector<8x8xf32>
    %c1_309 = arith.constant 1 : index
    %c3_310 = arith.constant 3 : index
    %c0_311 = arith.constant 0 : index
    %c0_312 = arith.constant 0 : index
    %358 = vector.load %arg4[%c1_309, %c3_310, %c0_311, %c0_312] : memref<2x4x32x8xf32, #tpu.memory_space<vmem>>, vector<1x1x32x8xf32>
    %359 = vector.shape_cast %358 : vector<1x1x32x8xf32> to vector<32x8xf32>
    %cst_313 = arith.constant dense<0.000000e+00> : vector<8x8xf32>
    %360 = tpu.matmul %230, %359, %cst_313 {dimension_numbers = #tpu.dot_dimension_numbers<[1], [0], [0], [1], [0, 0, 1, 1], [], []>} : vector<8x32xf32>, vector<32x8xf32>, vector<8x8xf32> -> vector<8x8xf32>
    %c1_314 = arith.constant 1 : index
    %c3_315 = arith.constant 3 : index
    %c0_316 = arith.constant 0 : index
    %c0_317 = arith.constant 0 : index
    %361 = vector.load %arg5[%c1_314, %c3_315, %c0_316, %c0_317] : memref<2x4x1x8xf32, #tpu.memory_space<vmem>>, vector<1x1x1x8xf32>
    %362 = vector.shape_cast %361 : vector<1x1x1x8xf32> to vector<1x8xf32>
    %363 = vector.broadcast %362 : vector<1x8xf32> to vector<8x8xf32>
    %364 = arith.addf %360, %363 : vector<8x8xf32>
    %c1_318 = arith.constant 1 : index
    %c3_319 = arith.constant 3 : index
    %c0_320 = arith.constant 0 : index
    %c0_321 = arith.constant 0 : index
    %365 = vector.load %arg6[%c1_318, %c3_319, %c0_320, %c0_321] : memref<2x4x32x8xf32, #tpu.memory_space<vmem>>, vector<1x1x32x8xf32>
    %366 = vector.shape_cast %365 : vector<1x1x32x8xf32> to vector<32x8xf32>
    %cst_322 = arith.constant dense<0.000000e+00> : vector<8x8xf32>
    %367 = tpu.matmul %230, %366, %cst_322 {dimension_numbers = #tpu.dot_dimension_numbers<[1], [0], [0], [1], [0, 0, 1, 1], [], []>} : vector<8x32xf32>, vector<32x8xf32>, vector<8x8xf32> -> vector<8x8xf32>
    %c1_323 = arith.constant 1 : index
    %c3_324 = arith.constant 3 : index
    %c0_325 = arith.constant 0 : index
    %c0_326 = arith.constant 0 : index
    %368 = vector.load %arg7[%c1_323, %c3_324, %c0_325, %c0_326] : memref<2x4x1x8xf32, #tpu.memory_space<vmem>>, vector<1x1x1x8xf32>
    %369 = vector.shape_cast %368 : vector<1x1x1x8xf32> to vector<1x8xf32>
    %370 = vector.broadcast %369 : vector<1x8xf32> to vector<8x8xf32>
    %371 = arith.addf %367, %370 : vector<8x8xf32>
    %372 = tpu.transpose %364, [1, 0] : vector<8x8xf32> -> vector<8x8xf32>
    %cst_327 = arith.constant dense<0.000000e+00> : vector<8x8xf32>
    %373 = tpu.matmul %357, %372, %cst_327 {dimension_numbers = #tpu.dot_dimension_numbers<[1], [0], [0], [1], [0, 0, 1, 1], [], []>} : vector<8x8xf32>, vector<8x8xf32>, vector<8x8xf32> -> vector<8x8xf32>
    %cst_328 = arith.constant 0.353553385 : f32
    %374 = vector.broadcast %cst_328 : f32 to vector<8x8xf32>
    %375 = arith.mulf %373, %374 : vector<8x8xf32>
    %cst_329 = arith.constant dense<0xFF800000> : vector<8xf32>
    %376 = vector.multi_reduction <maximumf>, %375, %cst_329 [1] : vector<8x8xf32> to vector<8xf32>
    %377 = vector.shape_cast %376 : vector<8xf32> to vector<8x1xf32>
    %378 = vector.broadcast %377 : vector<8x1xf32> to vector<8x8xf32>
    %379 = arith.subf %375, %378 : vector<8x8xf32>
    %380 = math.exp %379 : vector<8x8xf32>
    %cst_330 = arith.constant dense<0.000000e+00> : vector<8xf32>
    %381 = vector.multi_reduction <add>, %380, %cst_330 [1] : vector<8x8xf32> to vector<8xf32>
    %382 = vector.shape_cast %381 : vector<8xf32> to vector<8x1xf32>
    %383 = vector.broadcast %382 : vector<8x1xf32> to vector<8x8xf32>
    %384 = arith.divf %380, %383 : vector<8x8xf32>
    %cst_331 = arith.constant dense<0.000000e+00> : vector<8x8xf32>
    %385 = tpu.matmul %384, %371, %cst_331 {dimension_numbers = #tpu.dot_dimension_numbers<[1], [0], [0], [1], [0, 0, 1, 1], [], []>} : vector<8x8xf32>, vector<8x8xf32>, vector<8x8xf32> -> vector<8x8xf32>
    %c1_332 = arith.constant 1 : index
    %c3_333 = arith.constant 3 : index
    %c0_334 = arith.constant 0 : index
    %c0_335 = arith.constant 0 : index
    %386 = vector.load %arg8[%c1_332, %c3_333, %c0_334, %c0_335] : memref<2x4x8x32xf32, #tpu.memory_space<vmem>>, vector<1x1x8x32xf32>
    %387 = vector.shape_cast %386 : vector<1x1x8x32xf32> to vector<8x32xf32>
    %cst_336 = arith.constant dense<0.000000e+00> : vector<8x32xf32>
    %388 = tpu.matmul %385, %387, %cst_336 {dimension_numbers = #tpu.dot_dimension_numbers<[1], [0], [0], [1], [0, 0, 1, 1], [], []>} : vector<8x8xf32>, vector<8x32xf32>, vector<8x32xf32> -> vector<8x32xf32>
    %389 = arith.addf %350, %388 : vector<8x32xf32>
    %390 = arith.addf %230, %389 : vector<8x32xf32>
    %c1_337 = arith.constant 1 : index
    %c0_338 = arith.constant 0 : index
    %c0_339 = arith.constant 0 : index
    %391 = vector.load %arg14[%c1_337, %c0_338, %c0_339] : memref<2x1x32xf32, #tpu.memory_space<vmem>>, vector<1x1x32xf32>
    %392 = vector.shape_cast %391 : vector<1x1x32xf32> to vector<1x32xf32>
    %c1_340 = arith.constant 1 : index
    %c0_341 = arith.constant 0 : index
    %c0_342 = arith.constant 0 : index
    %393 = vector.load %arg15[%c1_340, %c0_341, %c0_342] : memref<2x1x32xf32, #tpu.memory_space<vmem>>, vector<1x1x32xf32>
    %394 = vector.shape_cast %393 : vector<1x1x32xf32> to vector<1x32xf32>
    %cst_343 = arith.constant dense<0.000000e+00> : vector<8xf32>
    %395 = vector.multi_reduction <add>, %390, %cst_343 [1] : vector<8x32xf32> to vector<8xf32>
    %396 = vector.shape_cast %395 : vector<8xf32> to vector<8x1xf32>
    %cst_344 = arith.constant 3.200000e+01 : f32
    %397 = vector.broadcast %cst_344 : f32 to vector<8x1xf32>
    %398 = arith.divf %396, %397 : vector<8x1xf32>
    %399 = vector.broadcast %398 : vector<8x1xf32> to vector<8x32xf32>
    %400 = arith.subf %390, %399 : vector<8x32xf32>
    %401 = arith.mulf %400, %400 : vector<8x32xf32>
    %cst_345 = arith.constant dense<0.000000e+00> : vector<8xf32>
    %402 = vector.multi_reduction <add>, %401, %cst_345 [1] : vector<8x32xf32> to vector<8xf32>
    %403 = vector.shape_cast %402 : vector<8xf32> to vector<8x1xf32>
    %cst_346 = arith.constant 3.200000e+01 : f32
    %404 = vector.broadcast %cst_346 : f32 to vector<8x1xf32>
    %405 = arith.divf %403, %404 : vector<8x1xf32>
    %406 = vector.broadcast %398 : vector<8x1xf32> to vector<8x32xf32>
    %407 = arith.subf %390, %406 : vector<8x32xf32>
    %cst_347 = arith.constant 9.99999974E-6 : f32
    %408 = vector.broadcast %cst_347 : f32 to vector<8x1xf32>
    %409 = arith.addf %405, %408 : vector<8x1xf32>
    %410 = math.rsqrt %409 : vector<8x1xf32>
    %411 = vector.broadcast %410 : vector<8x1xf32> to vector<8x32xf32>
    %412 = arith.mulf %407, %411 : vector<8x32xf32>
    %413 = vector.broadcast %392 : vector<1x32xf32> to vector<8x32xf32>
    %414 = arith.mulf %412, %413 : vector<8x32xf32>
    %415 = vector.broadcast %394 : vector<1x32xf32> to vector<8x32xf32>
    %416 = arith.addf %414, %415 : vector<8x32xf32>
    %c1_348 = arith.constant 1 : index
    %c0_349 = arith.constant 0 : index
    %c0_350 = arith.constant 0 : index
    %417 = vector.load %arg10[%c1_348, %c0_349, %c0_350] : memref<2x32x64xf32, #tpu.memory_space<vmem>>, vector<1x32x64xf32>
    %418 = vector.shape_cast %417 : vector<1x32x64xf32> to vector<32x64xf32>
    %cst_351 = arith.constant dense<0.000000e+00> : vector<8x64xf32>
    %419 = tpu.matmul %416, %418, %cst_351 {dimension_numbers = #tpu.dot_dimension_numbers<[1], [0], [0], [1], [0, 0, 1, 1], [], []>} : vector<8x32xf32>, vector<32x64xf32>, vector<8x64xf32> -> vector<8x64xf32>
    %c1_352 = arith.constant 1 : index
    %c0_353 = arith.constant 0 : index
    %c0_354 = arith.constant 0 : index
    %420 = vector.load %arg11[%c1_352, %c0_353, %c0_354] : memref<2x1x64xf32, #tpu.memory_space<vmem>>, vector<1x1x64xf32>
    %421 = vector.shape_cast %420 : vector<1x1x64xf32> to vector<1x64xf32>
    %422 = vector.broadcast %421 : vector<1x64xf32> to vector<8x64xf32>
    %423 = arith.addf %419, %422 : vector<8x64xf32>
    %cst_355 = arith.constant 0.000000e+00 : f32
    %424 = vector.broadcast %cst_355 : f32 to vector<8x64xf32>
    %425 = arith.maximumf %423, %424 : vector<8x64xf32>
    %c1_356 = arith.constant 1 : index
    %c0_357 = arith.constant 0 : index
    %c0_358 = arith.constant 0 : index
    %426 = vector.load %arg12[%c1_356, %c0_357, %c0_358] : memref<2x64x32xf32, #tpu.memory_space<vmem>>, vector<1x64x32xf32>
    %427 = vector.shape_cast %426 : vector<1x64x32xf32> to vector<64x32xf32>
    %cst_359 = arith.constant dense<0.000000e+00> : vector<8x32xf32>
    %428 = tpu.matmul %425, %427, %cst_359 {dimension_numbers = #tpu.dot_dimension_numbers<[1], [0], [0], [1], [0, 0, 1, 1], [], []>} : vector<8x64xf32>, vector<64x32xf32>, vector<8x32xf32> -> vector<8x32xf32>
    %c1_360 = arith.constant 1 : index
    %c0_361 = arith.constant 0 : index
    %c0_362 = arith.constant 0 : index
    %429 = vector.load %arg13[%c1_360, %c0_361, %c0_362] : memref<2x1x32xf32, #tpu.memory_space<vmem>>, vector<1x1x32xf32>
    %430 = vector.shape_cast %429 : vector<1x1x32xf32> to vector<1x32xf32>
    %431 = vector.broadcast %430 : vector<1x32xf32> to vector<8x32xf32>
    %432 = arith.addf %428, %431 : vector<8x32xf32>
    %433 = arith.addf %416, %432 : vector<8x32xf32>
    %c1_363 = arith.constant 1 : index
    %c0_364 = arith.constant 0 : index
    %c0_365 = arith.constant 0 : index
    %434 = vector.load %arg16[%c1_363, %c0_364, %c0_365] : memref<2x1x32xf32, #tpu.memory_space<vmem>>, vector<1x1x32xf32>
    %435 = vector.shape_cast %434 : vector<1x1x32xf32> to vector<1x32xf32>
    %c1_366 = arith.constant 1 : index
    %c0_367 = arith.constant 0 : index
    %c0_368 = arith.constant 0 : index
    %436 = vector.load %arg17[%c1_366, %c0_367, %c0_368] : memref<2x1x32xf32, #tpu.memory_space<vmem>>, vector<1x1x32xf32>
    %437 = vector.shape_cast %436 : vector<1x1x32xf32> to vector<1x32xf32>
    %cst_369 = arith.constant dense<0.000000e+00> : vector<8xf32>
    %438 = vector.multi_reduction <add>, %433, %cst_369 [1] : vector<8x32xf32> to vector<8xf32>
    %439 = vector.shape_cast %438 : vector<8xf32> to vector<8x1xf32>
    %cst_370 = arith.constant 3.200000e+01 : f32
    %440 = vector.broadcast %cst_370 : f32 to vector<8x1xf32>
    %441 = arith.divf %439, %440 : vector<8x1xf32>
    %442 = vector.broadcast %441 : vector<8x1xf32> to vector<8x32xf32>
    %443 = arith.subf %433, %442 : vector<8x32xf32>
    %444 = arith.mulf %443, %443 : vector<8x32xf32>
    %cst_371 = arith.constant dense<0.000000e+00> : vector<8xf32>
    %445 = vector.multi_reduction <add>, %444, %cst_371 [1] : vector<8x32xf32> to vector<8xf32>
    %446 = vector.shape_cast %445 : vector<8xf32> to vector<8x1xf32>
    %cst_372 = arith.constant 3.200000e+01 : f32
    %447 = vector.broadcast %cst_372 : f32 to vector<8x1xf32>
    %448 = arith.divf %446, %447 : vector<8x1xf32>
    %449 = vector.broadcast %441 : vector<8x1xf32> to vector<8x32xf32>
    %450 = arith.subf %433, %449 : vector<8x32xf32>
    %cst_373 = arith.constant 9.99999974E-6 : f32
    %451 = vector.broadcast %cst_373 : f32 to vector<8x1xf32>
    %452 = arith.addf %448, %451 : vector<8x1xf32>
    %453 = math.rsqrt %452 : vector<8x1xf32>
    %454 = vector.broadcast %453 : vector<8x1xf32> to vector<8x32xf32>
    %455 = arith.mulf %450, %454 : vector<8x32xf32>
    %456 = vector.broadcast %435 : vector<1x32xf32> to vector<8x32xf32>
    %457 = arith.mulf %455, %456 : vector<8x32xf32>
    %458 = vector.broadcast %437 : vector<1x32xf32> to vector<8x32xf32>
    %459 = arith.addf %457, %458 : vector<8x32xf32>
    %c0_374 = arith.constant 0 : index
    %c0_375 = arith.constant 0 : index
    %460 = vector.load %arg19[%c0_374, %c0_375] : memref<1x16xf32, #tpu.memory_space<vmem>>, vector<1x16xf32>
    %461 = tpu.iota {dimensions = array<i32: 0>} : vector<8x8xi32>
    %462 = tpu.iota {dimensions = array<i32: 1>} : vector<8x8xi32>
    %c-2_i32 = arith.constant -2 : i32
    %463 = vector.broadcast %c-2_i32 : i32 to vector<8x8xi32>
    %464 = arith.addi %461, %463 : vector<8x8xi32>
    %465 = arith.cmpi eq, %462, %464 : vector<8x8xi32>
    %466 = arith.extui %465 : vector<8x8xi1> to vector<8x8xi32>
    %467 = arith.sitofp %466 : vector<8x8xi32> to vector<8x8xf32>
    %cst_376 = arith.constant dense<0.000000e+00> : vector<8x32xf32>
    %468 = tpu.matmul %467, %459, %cst_376 {dimension_numbers = #tpu.dot_dimension_numbers<[1], [0], [0], [1], [0, 0, 1, 1], [], []>} : vector<8x8xf32>, vector<8x32xf32>, vector<8x32xf32> -> vector<8x32xf32>
    %c0_377 = arith.constant 0 : index
    %c0_378 = arith.constant 0 : index
    %c0_379 = arith.constant 0 : index
    %469 = vector.load %arg18[%c0_377, %c0_378, %c0_379] : memref<5x32x16xf32, #tpu.memory_space<vmem>>, vector<1x32x16xf32>
    %470 = vector.shape_cast %469 : vector<1x32x16xf32> to vector<32x16xf32>
    %cst_380 = arith.constant dense<0.000000e+00> : vector<8x16xf32>
    %471 = tpu.matmul %468, %470, %cst_380 {dimension_numbers = #tpu.dot_dimension_numbers<[1], [0], [0], [1], [0, 0, 1, 1], [], []>} : vector<8x32xf32>, vector<32x16xf32>, vector<8x16xf32> -> vector<8x16xf32>
    %472 = vector.broadcast %460 : vector<1x16xf32> to vector<8x16xf32>
    %473 = arith.addf %472, %471 : vector<8x16xf32>
    %474 = tpu.iota {dimensions = array<i32: 0>} : vector<8x8xi32>
    %475 = tpu.iota {dimensions = array<i32: 1>} : vector<8x8xi32>
    %c-1_i32 = arith.constant -1 : i32
    %476 = vector.broadcast %c-1_i32 : i32 to vector<8x8xi32>
    %477 = arith.addi %474, %476 : vector<8x8xi32>
    %478 = arith.cmpi eq, %475, %477 : vector<8x8xi32>
    %479 = arith.extui %478 : vector<8x8xi1> to vector<8x8xi32>
    %480 = arith.sitofp %479 : vector<8x8xi32> to vector<8x8xf32>
    %cst_381 = arith.constant dense<0.000000e+00> : vector<8x32xf32>
    %481 = tpu.matmul %480, %459, %cst_381 {dimension_numbers = #tpu.dot_dimension_numbers<[1], [0], [0], [1], [0, 0, 1, 1], [], []>} : vector<8x8xf32>, vector<8x32xf32>, vector<8x32xf32> -> vector<8x32xf32>
    %c1_382 = arith.constant 1 : index
    %c0_383 = arith.constant 0 : index
    %c0_384 = arith.constant 0 : index
    %482 = vector.load %arg18[%c1_382, %c0_383, %c0_384] : memref<5x32x16xf32, #tpu.memory_space<vmem>>, vector<1x32x16xf32>
    %483 = vector.shape_cast %482 : vector<1x32x16xf32> to vector<32x16xf32>
    %cst_385 = arith.constant dense<0.000000e+00> : vector<8x16xf32>
    %484 = tpu.matmul %481, %483, %cst_385 {dimension_numbers = #tpu.dot_dimension_numbers<[1], [0], [0], [1], [0, 0, 1, 1], [], []>} : vector<8x32xf32>, vector<32x16xf32>, vector<8x16xf32> -> vector<8x16xf32>
    %485 = arith.addf %473, %484 : vector<8x16xf32>
    %486 = tpu.iota {dimensions = array<i32: 0>} : vector<8x8xi32>
    %487 = tpu.iota {dimensions = array<i32: 1>} : vector<8x8xi32>
    %c0_i32 = arith.constant 0 : i32
    %488 = vector.broadcast %c0_i32 : i32 to vector<8x8xi32>
    %489 = arith.addi %486, %488 : vector<8x8xi32>
    %490 = arith.cmpi eq, %487, %489 : vector<8x8xi32>
    %491 = arith.extui %490 : vector<8x8xi1> to vector<8x8xi32>
    %492 = arith.sitofp %491 : vector<8x8xi32> to vector<8x8xf32>
    %cst_386 = arith.constant dense<0.000000e+00> : vector<8x32xf32>
    %493 = tpu.matmul %492, %459, %cst_386 {dimension_numbers = #tpu.dot_dimension_numbers<[1], [0], [0], [1], [0, 0, 1, 1], [], []>} : vector<8x8xf32>, vector<8x32xf32>, vector<8x32xf32> -> vector<8x32xf32>
    %c2_387 = arith.constant 2 : index
    %c0_388 = arith.constant 0 : index
    %c0_389 = arith.constant 0 : index
    %494 = vector.load %arg18[%c2_387, %c0_388, %c0_389] : memref<5x32x16xf32, #tpu.memory_space<vmem>>, vector<1x32x16xf32>
    %495 = vector.shape_cast %494 : vector<1x32x16xf32> to vector<32x16xf32>
    %cst_390 = arith.constant dense<0.000000e+00> : vector<8x16xf32>
    %496 = tpu.matmul %493, %495, %cst_390 {dimension_numbers = #tpu.dot_dimension_numbers<[1], [0], [0], [1], [0, 0, 1, 1], [], []>} : vector<8x32xf32>, vector<32x16xf32>, vector<8x16xf32> -> vector<8x16xf32>
    %497 = arith.addf %485, %496 : vector<8x16xf32>
    %498 = tpu.iota {dimensions = array<i32: 0>} : vector<8x8xi32>
    %499 = tpu.iota {dimensions = array<i32: 1>} : vector<8x8xi32>
    %c1_i32 = arith.constant 1 : i32
    %500 = vector.broadcast %c1_i32 : i32 to vector<8x8xi32>
    %501 = arith.addi %498, %500 : vector<8x8xi32>
    %502 = arith.cmpi eq, %499, %501 : vector<8x8xi32>
    %503 = arith.extui %502 : vector<8x8xi1> to vector<8x8xi32>
    %504 = arith.sitofp %503 : vector<8x8xi32> to vector<8x8xf32>
    %cst_391 = arith.constant dense<0.000000e+00> : vector<8x32xf32>
    %505 = tpu.matmul %504, %459, %cst_391 {dimension_numbers = #tpu.dot_dimension_numbers<[1], [0], [0], [1], [0, 0, 1, 1], [], []>} : vector<8x8xf32>, vector<8x32xf32>, vector<8x32xf32> -> vector<8x32xf32>
    %c3_392 = arith.constant 3 : index
    %c0_393 = arith.constant 0 : index
    %c0_394 = arith.constant 0 : index
    %506 = vector.load %arg18[%c3_392, %c0_393, %c0_394] : memref<5x32x16xf32, #tpu.memory_space<vmem>>, vector<1x32x16xf32>
    %507 = vector.shape_cast %506 : vector<1x32x16xf32> to vector<32x16xf32>
    %cst_395 = arith.constant dense<0.000000e+00> : vector<8x16xf32>
    %508 = tpu.matmul %505, %507, %cst_395 {dimension_numbers = #tpu.dot_dimension_numbers<[1], [0], [0], [1], [0, 0, 1, 1], [], []>} : vector<8x32xf32>, vector<32x16xf32>, vector<8x16xf32> -> vector<8x16xf32>
    %509 = arith.addf %497, %508 : vector<8x16xf32>
    %510 = tpu.iota {dimensions = array<i32: 0>} : vector<8x8xi32>
    %511 = tpu.iota {dimensions = array<i32: 1>} : vector<8x8xi32>
    %c2_i32 = arith.constant 2 : i32
    %512 = vector.broadcast %c2_i32 : i32 to vector<8x8xi32>
    %513 = arith.addi %510, %512 : vector<8x8xi32>
    %514 = arith.cmpi eq, %511, %513 : vector<8x8xi32>
    %515 = arith.extui %514 : vector<8x8xi1> to vector<8x8xi32>
    %516 = arith.sitofp %515 : vector<8x8xi32> to vector<8x8xf32>
    %cst_396 = arith.constant dense<0.000000e+00> : vector<8x32xf32>
    %517 = tpu.matmul %516, %459, %cst_396 {dimension_numbers = #tpu.dot_dimension_numbers<[1], [0], [0], [1], [0, 0, 1, 1], [], []>} : vector<8x8xf32>, vector<8x32xf32>, vector<8x32xf32> -> vector<8x32xf32>
    %c4 = arith.constant 4 : index
    %c0_397 = arith.constant 0 : index
    %c0_398 = arith.constant 0 : index
    %518 = vector.load %arg18[%c4, %c0_397, %c0_398] : memref<5x32x16xf32, #tpu.memory_space<vmem>>, vector<1x32x16xf32>
    %519 = vector.shape_cast %518 : vector<1x32x16xf32> to vector<32x16xf32>
    %cst_399 = arith.constant dense<0.000000e+00> : vector<8x16xf32>
    %520 = tpu.matmul %517, %519, %cst_399 {dimension_numbers = #tpu.dot_dimension_numbers<[1], [0], [0], [1], [0, 0, 1, 1], [], []>} : vector<8x32xf32>, vector<32x16xf32>, vector<8x16xf32> -> vector<8x16xf32>
    %521 = arith.addf %509, %520 : vector<8x16xf32>
    %cst_400 = arith.constant 0.000000e+00 : f32
    %522 = vector.broadcast %cst_400 : f32 to vector<8x16xf32>
    %523 = arith.maximumf %521, %522 : vector<8x16xf32>
    %c0_401 = arith.constant 0 : index
    %c0_402 = arith.constant 0 : index
    %524 = vector.load %arg21[%c0_401, %c0_402] : memref<1x8xf32, #tpu.memory_space<vmem>>, vector<1x8xf32>
    %525 = tpu.iota {dimensions = array<i32: 0>} : vector<8x8xi32>
    %526 = tpu.iota {dimensions = array<i32: 1>} : vector<8x8xi32>
    %c-1_i32_403 = arith.constant -1 : i32
    %527 = vector.broadcast %c-1_i32_403 : i32 to vector<8x8xi32>
    %528 = arith.addi %525, %527 : vector<8x8xi32>
    %529 = arith.cmpi eq, %526, %528 : vector<8x8xi32>
    %530 = arith.extui %529 : vector<8x8xi1> to vector<8x8xi32>
    %531 = arith.sitofp %530 : vector<8x8xi32> to vector<8x8xf32>
    %cst_404 = arith.constant dense<0.000000e+00> : vector<8x16xf32>
    %532 = tpu.matmul %531, %523, %cst_404 {dimension_numbers = #tpu.dot_dimension_numbers<[1], [0], [0], [1], [0, 0, 1, 1], [], []>} : vector<8x8xf32>, vector<8x16xf32>, vector<8x16xf32> -> vector<8x16xf32>
    %c0_405 = arith.constant 0 : index
    %c0_406 = arith.constant 0 : index
    %c0_407 = arith.constant 0 : index
    %533 = vector.load %arg20[%c0_405, %c0_406, %c0_407] : memref<3x16x8xf32, #tpu.memory_space<vmem>>, vector<1x16x8xf32>
    %534 = vector.shape_cast %533 : vector<1x16x8xf32> to vector<16x8xf32>
    %cst_408 = arith.constant dense<0.000000e+00> : vector<8x8xf32>
    %535 = tpu.matmul %532, %534, %cst_408 {dimension_numbers = #tpu.dot_dimension_numbers<[1], [0], [0], [1], [0, 0, 1, 1], [], []>} : vector<8x16xf32>, vector<16x8xf32>, vector<8x8xf32> -> vector<8x8xf32>
    %536 = vector.broadcast %524 : vector<1x8xf32> to vector<8x8xf32>
    %537 = arith.addf %536, %535 : vector<8x8xf32>
    %538 = tpu.iota {dimensions = array<i32: 0>} : vector<8x8xi32>
    %539 = tpu.iota {dimensions = array<i32: 1>} : vector<8x8xi32>
    %c0_i32_409 = arith.constant 0 : i32
    %540 = vector.broadcast %c0_i32_409 : i32 to vector<8x8xi32>
    %541 = arith.addi %538, %540 : vector<8x8xi32>
    %542 = arith.cmpi eq, %539, %541 : vector<8x8xi32>
    %543 = arith.extui %542 : vector<8x8xi1> to vector<8x8xi32>
    %544 = arith.sitofp %543 : vector<8x8xi32> to vector<8x8xf32>
    %cst_410 = arith.constant dense<0.000000e+00> : vector<8x16xf32>
    %545 = tpu.matmul %544, %523, %cst_410 {dimension_numbers = #tpu.dot_dimension_numbers<[1], [0], [0], [1], [0, 0, 1, 1], [], []>} : vector<8x8xf32>, vector<8x16xf32>, vector<8x16xf32> -> vector<8x16xf32>
    %c1_411 = arith.constant 1 : index
    %c0_412 = arith.constant 0 : index
    %c0_413 = arith.constant 0 : index
    %546 = vector.load %arg20[%c1_411, %c0_412, %c0_413] : memref<3x16x8xf32, #tpu.memory_space<vmem>>, vector<1x16x8xf32>
    %547 = vector.shape_cast %546 : vector<1x16x8xf32> to vector<16x8xf32>
    %cst_414 = arith.constant dense<0.000000e+00> : vector<8x8xf32>
    %548 = tpu.matmul %545, %547, %cst_414 {dimension_numbers = #tpu.dot_dimension_numbers<[1], [0], [0], [1], [0, 0, 1, 1], [], []>} : vector<8x16xf32>, vector<16x8xf32>, vector<8x8xf32> -> vector<8x8xf32>
    %549 = arith.addf %537, %548 : vector<8x8xf32>
    %550 = tpu.iota {dimensions = array<i32: 0>} : vector<8x8xi32>
    %551 = tpu.iota {dimensions = array<i32: 1>} : vector<8x8xi32>
    %c1_i32_415 = arith.constant 1 : i32
    %552 = vector.broadcast %c1_i32_415 : i32 to vector<8x8xi32>
    %553 = arith.addi %550, %552 : vector<8x8xi32>
    %554 = arith.cmpi eq, %551, %553 : vector<8x8xi32>
    %555 = arith.extui %554 : vector<8x8xi1> to vector<8x8xi32>
    %556 = arith.sitofp %555 : vector<8x8xi32> to vector<8x8xf32>
    %cst_416 = arith.constant dense<0.000000e+00> : vector<8x16xf32>
    %557 = tpu.matmul %556, %523, %cst_416 {dimension_numbers = #tpu.dot_dimension_numbers<[1], [0], [0], [1], [0, 0, 1, 1], [], []>} : vector<8x8xf32>, vector<8x16xf32>, vector<8x16xf32> -> vector<8x16xf32>
    %c2_417 = arith.constant 2 : index
    %c0_418 = arith.constant 0 : index
    %c0_419 = arith.constant 0 : index
    %558 = vector.load %arg20[%c2_417, %c0_418, %c0_419] : memref<3x16x8xf32, #tpu.memory_space<vmem>>, vector<1x16x8xf32>
    %559 = vector.shape_cast %558 : vector<1x16x8xf32> to vector<16x8xf32>
    %cst_420 = arith.constant dense<0.000000e+00> : vector<8x8xf32>
    %560 = tpu.matmul %557, %559, %cst_420 {dimension_numbers = #tpu.dot_dimension_numbers<[1], [0], [0], [1], [0, 0, 1, 1], [], []>} : vector<8x16xf32>, vector<16x8xf32>, vector<8x8xf32> -> vector<8x8xf32>
    %561 = arith.addf %549, %560 : vector<8x8xf32>
    %cst_421 = arith.constant 0.000000e+00 : f32
    %562 = vector.broadcast %cst_421 : f32 to vector<8x8xf32>
    %563 = arith.maximumf %561, %562 : vector<8x8xf32>
    %cst_422 = arith.constant dense<0.000000e+00> : vector<8xf32>
    %564 = vector.multi_reduction <add>, %563, %cst_422 [0] : vector<8x8xf32> to vector<8xf32>
    %565 = vector.shape_cast %564 : vector<8xf32> to vector<1x8xf32>
    %cst_423 = arith.constant 8.000000e+00 : f32
    %566 = vector.broadcast %cst_423 : f32 to vector<1x8xf32>
    %567 = arith.divf %565, %566 : vector<1x8xf32>
    %c0_424 = arith.constant 0 : index
    %c0_425 = arith.constant 0 : index
    %c0_426 = arith.constant 0 : index
    %568 = vector.load %arg31[%c0_424, %c0_425, %c0_426] : memref<1x1x8xf32, #tpu.memory_space<vmem>>, vector<1x1x8xf32>
    %569 = vector.shape_cast %568 : vector<1x1x8xf32> to vector<1x8xf32>
    %570 = vector.shape_cast %567 : vector<1x8xf32> to vector<1x1x8xf32>
    tpu.vector_store %arg31[%c0_424, %c0_425, %c0_426], %570 {strides = array<i32>} : memref<1x1x8xf32, #tpu.memory_space<vmem>>, vector<1x1x8xf32>,
    %c0_427 = arith.constant 0 : index
    %c0_428 = arith.constant 0 : index
    %571 = vector.load %arg22[%c0_427, %c0_428] : memref<32x16xf32, #tpu.memory_space<vmem>>, vector<32x16xf32>
    %cst_429 = arith.constant dense<0.000000e+00> : vector<8x16xf32>
    %572 = tpu.matmul %459, %571, %cst_429 {dimension_numbers = #tpu.dot_dimension_numbers<[1], [0], [0], [1], [0, 0, 1, 1], [], []>} : vector<8x32xf32>, vector<32x16xf32>, vector<8x16xf32> -> vector<8x16xf32>
    %c0_430 = arith.constant 0 : index
    %c0_431 = arith.constant 0 : index
    %573 = vector.load %arg23[%c0_430, %c0_431] : memref<1x16xf32, #tpu.memory_space<vmem>>, vector<1x16xf32>
    %574 = vector.broadcast %573 : vector<1x16xf32> to vector<8x16xf32>
    %575 = arith.addf %572, %574 : vector<8x16xf32>
    %cst_432 = arith.constant 0.000000e+00 : f32
    %576 = vector.broadcast %cst_432 : f32 to vector<8x16xf32>
    %577 = arith.maximumf %575, %576 : vector<8x16xf32>
    %c0_433 = arith.constant 0 : index
    %c0_434 = arith.constant 0 : index
    %578 = vector.load %arg24[%c0_433, %c0_434] : memref<16x128xf32, #tpu.memory_space<vmem>>, vector<16x128xf32>
    %cst_435 = arith.constant dense<0.000000e+00> : vector<8x128xf32>
    %579 = tpu.matmul %577, %578, %cst_435 {dimension_numbers = #tpu.dot_dimension_numbers<[1], [0], [0], [1], [0, 0, 1, 1], [], []>} : vector<8x16xf32>, vector<16x128xf32>, vector<8x128xf32> -> vector<8x128xf32>
    %c0_436 = arith.constant 0 : index
    %c0_437 = arith.constant 0 : index
    %580 = vector.load %arg25[%c0_436, %c0_437] : memref<1x128xf32, #tpu.memory_space<vmem>>, vector<1x128xf32>
    %581 = vector.broadcast %580 : vector<1x128xf32> to vector<8x128xf32>
    %582 = arith.addf %579, %581 : vector<8x128xf32>
    %c0_438 = arith.constant 0 : index
    %c0_439 = arith.constant 0 : index
    %c0_440 = arith.constant 0 : index
    %583 = vector.load %arg32[%c0_438, %c0_439, %c0_440] : memref<1x8x128xf32, #tpu.memory_space<vmem>>, vector<1x8x128xf32>
    %584 = vector.shape_cast %583 : vector<1x8x128xf32> to vector<8x128xf32>
    %585 = vector.shape_cast %582 : vector<8x128xf32> to vector<1x8x128xf32>
    tpu.vector_store %arg32[%c0_438, %c0_439, %c0_440], %585 {strides = array<i32>} : memref<1x8x128xf32, #tpu.memory_space<vmem>>, vector<1x8x128xf32>,
    %c0_441 = arith.constant 0 : index
    %c0_442 = arith.constant 0 : index
    %586 = vector.load %arg26[%c0_441, %c0_442] : memref<8x32xf32, #tpu.memory_space<vmem>>, vector<8x32xf32>
    %cst_443 = arith.constant dense<0.000000e+00> : vector<1x32xf32>
    %587 = tpu.matmul %567, %586, %cst_443 {dimension_numbers = #tpu.dot_dimension_numbers<[1], [0], [0], [1], [0, 0, 1, 1], [], []>} : vector<1x8xf32>, vector<8x32xf32>, vector<1x32xf32> -> vector<1x32xf32>
    %c0_444 = arith.constant 0 : index
    %c0_445 = arith.constant 0 : index
    %588 = vector.load %arg27[%c0_444, %c0_445] : memref<1x32xf32, #tpu.memory_space<vmem>>, vector<1x32xf32>
    %589 = arith.addf %587, %588 : vector<1x32xf32>
    %c0_446 = arith.constant 0 : index
    %c0_447 = arith.constant 0 : index
    %590 = vector.load %arg28[%c0_446, %c0_447] : memref<32x32xf32, #tpu.memory_space<vmem>>, vector<32x32xf32>
    %cst_448 = arith.constant dense<0.000000e+00> : vector<1x32xf32>
    %591 = tpu.matmul %589, %590, %cst_448 {dimension_numbers = #tpu.dot_dimension_numbers<[1], [0], [0], [1], [0, 0, 1, 1], [], []>} : vector<1x32xf32>, vector<32x32xf32>, vector<1x32xf32> -> vector<1x32xf32>
    %c0_449 = arith.constant 0 : index
    %c0_450 = arith.constant 0 : index
    %592 = vector.load %arg29[%c0_449, %c0_450] : memref<1x32xf32, #tpu.memory_space<vmem>>, vector<1x32xf32>
    %593 = arith.addf %591, %592 : vector<1x32xf32>
    %594 = vector.shape_cast %593 : vector<1x32xf32> to vector<1x32xf32>
    %595 = vector.broadcast %594 : vector<1x32xf32> to vector<8x32xf32>
    %c0_451 = arith.constant 0 : index
    %c0_452 = arith.constant 0 : index
    %c0_453 = arith.constant 0 : index
    %596 = vector.load %arg30[%c0_451, %c0_452, %c0_453] : memref<1x8x32xf32, #tpu.memory_space<vmem>>, vector<1x8x32xf32>
    %597 = vector.shape_cast %596 : vector<1x8x32xf32> to vector<8x32xf32>
    %598 = vector.shape_cast %595 : vector<8x32xf32> to vector<1x8x32xf32>
    tpu.vector_store %arg30[%c0_451, %c0_452, %c0_453], %598 {strides = array<i32>} : memref<1x8x32xf32, #tpu.memory_space<vmem>>, vector<1x8x32xf32>,
    return
  }
  func.func @transform_0(%arg0: i32) -> (i32, i32, i32) {
    %c0_i32 = arith.constant 0 : i32
    %c0_i32_0 = arith.constant 0 : i32
    %c0_i32_1 = arith.constant 0 : i32
    return %arg0, %c0_i32, %c0_i32_0 : i32, i32, i32
  }
  func.func @transform_1(%arg0: i32) -> (i32, i32, i32, i32) {
    %c0_i32 = arith.constant 0 : i32
    %c0_i32_0 = arith.constant 0 : i32
    %c0_i32_1 = arith.constant 0 : i32
    %c0_i32_2 = arith.constant 0 : i32
    %c0_i32_3 = arith.constant 0 : i32
    return %c0_i32, %c0_i32_0, %c0_i32_1, %c0_i32_2 : i32, i32, i32, i32
  }
  func.func @transform_2(%arg0: i32) -> (i32, i32, i32, i32) {
    %c0_i32 = arith.constant 0 : i32
    %c0_i32_0 = arith.constant 0 : i32
    %c0_i32_1 = arith.constant 0 : i32
    %c0_i32_2 = arith.constant 0 : i32
    %c0_i32_3 = arith.constant 0 : i32
    return %c0_i32, %c0_i32_0, %c0_i32_1, %c0_i32_2 : i32, i32, i32, i32
  }
  func.func @transform_3(%arg0: i32) -> (i32, i32, i32, i32) {
    %c0_i32 = arith.constant 0 : i32
    %c0_i32_0 = arith.constant 0 : i32
    %c0_i32_1 = arith.constant 0 : i32
    %c0_i32_2 = arith.constant 0 : i32
    %c0_i32_3 = arith.constant 0 : i32
    return %c0_i32, %c0_i32_0, %c0_i32_1, %c0_i32_2 : i32, i32, i32, i32
  }
  func.func @transform_4(%arg0: i32) -> (i32, i32, i32, i32) {
    %c0_i32 = arith.constant 0 : i32
    %c0_i32_0 = arith.constant 0 : i32
    %c0_i32_1 = arith.constant 0 : i32
    %c0_i32_2 = arith.constant 0 : i32
    %c0_i32_3 = arith.constant 0 : i32
    return %c0_i32, %c0_i32_0, %c0_i32_1, %c0_i32_2 : i32, i32, i32, i32
  }
  func.func @transform_5(%arg0: i32) -> (i32, i32, i32, i32) {
    %c0_i32 = arith.constant 0 : i32
    %c0_i32_0 = arith.constant 0 : i32
    %c0_i32_1 = arith.constant 0 : i32
    %c0_i32_2 = arith.constant 0 : i32
    %c0_i32_3 = arith.constant 0 : i32
    return %c0_i32, %c0_i32_0, %c0_i32_1, %c0_i32_2 : i32, i32, i32, i32
  }
  func.func @transform_6(%arg0: i32) -> (i32, i32, i32, i32) {
    %c0_i32 = arith.constant 0 : i32
    %c0_i32_0 = arith.constant 0 : i32
    %c0_i32_1 = arith.constant 0 : i32
    %c0_i32_2 = arith.constant 0 : i32
    %c0_i32_3 = arith.constant 0 : i32
    return %c0_i32, %c0_i32_0, %c0_i32_1, %c0_i32_2 : i32, i32, i32, i32
  }
  func.func @transform_7(%arg0: i32) -> (i32, i32, i32, i32) {
    %c0_i32 = arith.constant 0 : i32
    %c0_i32_0 = arith.constant 0 : i32
    %c0_i32_1 = arith.constant 0 : i32
    %c0_i32_2 = arith.constant 0 : i32
    %c0_i32_3 = arith.constant 0 : i32
    return %c0_i32, %c0_i32_0, %c0_i32_1, %c0_i32_2 : i32, i32, i32, i32
  }
  func.func @transform_8(%arg0: i32) -> (i32, i32, i32) {
    %c0_i32 = arith.constant 0 : i32
    %c0_i32_0 = arith.constant 0 : i32
    %c0_i32_1 = arith.constant 0 : i32
    %c0_i32_2 = arith.constant 0 : i32
    return %c0_i32, %c0_i32_0, %c0_i32_1 : i32, i32, i32
  }
  func.func @transform_9(%arg0: i32) -> (i32, i32, i32) {
    %c0_i32 = arith.constant 0 : i32
    %c0_i32_0 = arith.constant 0 : i32
    %c0_i32_1 = arith.constant 0 : i32
    %c0_i32_2 = arith.constant 0 : i32
    return %c0_i32, %c0_i32_0, %c0_i32_1 : i32, i32, i32
  }
  func.func @transform_10(%arg0: i32) -> (i32, i32, i32) {
    %c0_i32 = arith.constant 0 : i32
    %c0_i32_0 = arith.constant 0 : i32
    %c0_i32_1 = arith.constant 0 : i32
    %c0_i32_2 = arith.constant 0 : i32
    return %c0_i32, %c0_i32_0, %c0_i32_1 : i32, i32, i32
  }
  func.func @transform_11(%arg0: i32) -> (i32, i32, i32) {
    %c0_i32 = arith.constant 0 : i32
    %c0_i32_0 = arith.constant 0 : i32
    %c0_i32_1 = arith.constant 0 : i32
    %c0_i32_2 = arith.constant 0 : i32
    return %c0_i32, %c0_i32_0, %c0_i32_1 : i32, i32, i32
  }
  func.func @transform_12(%arg0: i32) -> (i32, i32, i32) {
    %c0_i32 = arith.constant 0 : i32
    %c0_i32_0 = arith.constant 0 : i32
    %c0_i32_1 = arith.constant 0 : i32
    %c0_i32_2 = arith.constant 0 : i32
    return %c0_i32, %c0_i32_0, %c0_i32_1 : i32, i32, i32
  }
  func.func @transform_13(%arg0: i32) -> (i32, i32, i32) {
    %c0_i32 = arith.constant 0 : i32
    %c0_i32_0 = arith.constant 0 : i32
    %c0_i32_1 = arith.constant 0 : i32
    %c0_i32_2 = arith.constant 0 : i32
    return %c0_i32, %c0_i32_0, %c0_i32_1 : i32, i32, i32
  }
  func.func @transform_14(%arg0: i32) -> (i32, i32, i32) {
    %c0_i32 = arith.constant 0 : i32
    %c0_i32_0 = arith.constant 0 : i32
    %c0_i32_1 = arith.constant 0 : i32
    %c0_i32_2 = arith.constant 0 : i32
    return %c0_i32, %c0_i32_0, %c0_i32_1 : i32, i32, i32
  }
  func.func @transform_15(%arg0: i32) -> (i32, i32, i32) {
    %c0_i32 = arith.constant 0 : i32
    %c0_i32_0 = arith.constant 0 : i32
    %c0_i32_1 = arith.constant 0 : i32
    %c0_i32_2 = arith.constant 0 : i32
    return %c0_i32, %c0_i32_0, %c0_i32_1 : i32, i32, i32
  }
  func.func @transform_16(%arg0: i32) -> (i32, i32, i32) {
    %c0_i32 = arith.constant 0 : i32
    %c0_i32_0 = arith.constant 0 : i32
    %c0_i32_1 = arith.constant 0 : i32
    %c0_i32_2 = arith.constant 0 : i32
    return %c0_i32, %c0_i32_0, %c0_i32_1 : i32, i32, i32
  }
  func.func @transform_17(%arg0: i32) -> (i32, i32, i32) {
    %c0_i32 = arith.constant 0 : i32
    %c0_i32_0 = arith.constant 0 : i32
    %c0_i32_1 = arith.constant 0 : i32
    %c0_i32_2 = arith.constant 0 : i32
    return %c0_i32, %c0_i32_0, %c0_i32_1 : i32, i32, i32
  }
  func.func @transform_18(%arg0: i32) -> (i32, i32) {
    %c0_i32 = arith.constant 0 : i32
    %c0_i32_0 = arith.constant 0 : i32
    %c0_i32_1 = arith.constant 0 : i32
    return %c0_i32, %c0_i32_0 : i32, i32
  }
  func.func @transform_19(%arg0: i32) -> (i32, i32, i32) {
    %c0_i32 = arith.constant 0 : i32
    %c0_i32_0 = arith.constant 0 : i32
    %c0_i32_1 = arith.constant 0 : i32
    %c0_i32_2 = arith.constant 0 : i32
    return %c0_i32, %c0_i32_0, %c0_i32_1 : i32, i32, i32
  }
  func.func @transform_20(%arg0: i32) -> (i32, i32) {
    %c0_i32 = arith.constant 0 : i32
    %c0_i32_0 = arith.constant 0 : i32
    %c0_i32_1 = arith.constant 0 : i32
    return %c0_i32, %c0_i32_0 : i32, i32
  }
  func.func @transform_21(%arg0: i32) -> (i32, i32) {
    %c0_i32 = arith.constant 0 : i32
    %c0_i32_0 = arith.constant 0 : i32
    %c0_i32_1 = arith.constant 0 : i32
    return %c0_i32, %c0_i32_0 : i32, i32
  }
  func.func @transform_22(%arg0: i32) -> (i32, i32) {
    %c0_i32 = arith.constant 0 : i32
    %c0_i32_0 = arith.constant 0 : i32
    %c0_i32_1 = arith.constant 0 : i32
    return %c0_i32, %c0_i32_0 : i32, i32
  }
  func.func @transform_23(%arg0: i32) -> (i32, i32) {
    %c0_i32 = arith.constant 0 : i32
    %c0_i32_0 = arith.constant 0 : i32
    %c0_i32_1 = arith.constant 0 : i32
    return %c0_i32, %c0_i32_0 : i32, i32
  }
  func.func @transform_24(%arg0: i32) -> (i32, i32) {
    %c0_i32 = arith.constant 0 : i32
    %c0_i32_0 = arith.constant 0 : i32
    %c0_i32_1 = arith.constant 0 : i32
    return %c0_i32, %c0_i32_0 : i32, i32
  }
  func.func @transform_25(%arg0: i32) -> (i32, i32) {
    %c0_i32 = arith.constant 0 : i32
    %c0_i32_0 = arith.constant 0 : i32
    %c0_i32_1 = arith.constant 0 : i32
    return %c0_i32, %c0_i32_0 : i32, i32
  }
  func.func @transform_26(%arg0: i32) -> (i32, i32) {
    %c0_i32 = arith.constant 0 : i32
    %c0_i32_0 = arith.constant 0 : i32
    %c0_i32_1 = arith.constant 0 : i32
    return %c0_i32, %c0_i32_0 : i32, i32
  }
  func.func @transform_27(%arg0: i32) -> (i32, i32) {
    %c0_i32 = arith.constant 0 : i32
    %c0_i32_0 = arith.constant 0 : i32
    %c0_i32_1 = arith.constant 0 : i32
    return %c0_i32, %c0_i32_0 : i32, i32
  }
  func.func @transform_28(%arg0: i32) -> (i32, i32) {
    %c0_i32 = arith.constant 0 : i32
    %c0_i32_0 = arith.constant 0 : i32
    %c0_i32_1 = arith.constant 0 : i32
    return %c0_i32, %c0_i32_0 : i32, i32
  }
  func.func @transform_29(%arg0: i32) -> (i32, i32, i32) {
    %c0_i32 = arith.constant 0 : i32
    %c0_i32_0 = arith.constant 0 : i32
    %c0_i32_1 = arith.constant 0 : i32
    return %arg0, %c0_i32, %c0_i32_0 : i32, i32, i32
  }
  func.func @transform_30(%arg0: i32) -> (i32, i32, i32) {
    %c0_i32 = arith.constant 0 : i32
    %c0_i32_0 = arith.constant 0 : i32
    %c0_i32_1 = arith.constant 0 : i32
    return %arg0, %c0_i32, %c0_i32_0 : i32, i32, i32
  }
  func.func @transform_31(%arg0: i32) -> (i32, i32, i32) {
    %c0_i32 = arith.constant 0 : i32
    %c0_i32_0 = arith.constant 0 : i32
    %c0_i32_1 = arith.constant 0 : i32
    return %arg0, %c0_i32, %c0_i32_0 : i32, i32, i32
  }
}

</mosaic_0001>

<bundles_post_ra>
// kernel: tpu_custom_call.1
= control target key start
LH: loop header
LB: loop body
LE: loop exit
PB: predicated region body
PF: predicated region fallthrough
CT: control target
= control target key end

     0   :  { %s8766_s6 = smov 1   ;;  %s8767_s10 = smov 2   ;;  %s9765_s0 = inlined_call_operand.smem [shape: u32[32], index: -1, kind: input, shape index: {}] }
   0x1   :  { %s8811_s5 = sld [smem:[%s9765_s0]]   ;;  %s8768_s14 = smov 3  }
   0x2   :  { %s8816_s9 = sld [smem:[%s9765_s0 + %s8766_s6]]   ;;  %s8769_s18 = smov 4  }
   0x3   :  { %s8821_s13 = sld [smem:[%s9765_s0 + %s8767_s10]]   ;;  %s8770_s22 = smov 5  }
   0x4   :  { %s8826_s17 = sld [smem:[%s9765_s0 + %s8768_s14]]   ;;  %s8771_s26 = smov 6  }
   0x5   :  { %s8831_s21 = sld [smem:[%s9765_s0 + %s8769_s18]]   ;;  %s8772_s30 = smov 7  }
   0x6   :  { %s8836_s25 = sld [smem:[%s9765_s0 + %s8770_s22]]   ;;  %s8773_s4 = smov 8  }
   0x7   :  { %9792 = sst [smem:[#allocation9_spill]] %s8811_s5  ;;  %s8774_s10 = smov 9  }
   0x8   :  { %9793 = sst [smem:[#allocation10_spill]] %s8816_s9  ;;  %s8775_s15 = smov 10  }
   0x9   :  { %9794 = sst [smem:[#allocation11_spill]] %s8821_s13  ;;  %s8776_s20 = smov 11  }
   0xa   :  { %9795 = sst [smem:[#allocation12_spill]] %s8826_s17  ;;  %s8778_s1 = smov 13  }
   0xb   :  { %s8841_s29 = sld [smem:[%s9765_s0 + %s8771_s26]]   ;;  %s8777_s26 = smov 12  }
   0xc   :  { %s8846_s3 = sld [smem:[%s9765_s0 + %s8772_s30]]   ;;  %s8779_s7 = smov 14  }
   0xd   :  { %s8851_s8 = sld [smem:[%s9765_s0 + %s8773_s4]]   ;;  %s8781_s22 = smov 16  }
   0xe   :  { %s8856_s14 = sld [smem:[%s9765_s0 + %s8774_s10]]   ;;  %s8782_s28 = smov 17  }
   0xf   :  { %s8861_s19 = sld [smem:[%s9765_s0 + %s8775_s15]]   ;;  %s8780_s15 = smov 15  }
  0x10   :  { %s8866_s24 = sld [smem:[%s9765_s0 + %s8776_s20]]  }
  0x11   :  { %s8871_s30 = sld [smem:[%s9765_s0 + %s8777_s26]]  }
  0x12   :  { %9796 = sst [smem:[#allocation13_spill]] %s8846_s3 }
  0x13   :  { %9797 = sst [smem:[#allocation14_spill]] %s8851_s8 }
  0x14   :  { %9798 = sst [smem:[#allocation15_spill]] %s8856_s14 }
  0x15   :  { %s8876_s6 = sld [smem:[%s9765_s0 + %s8778_s1]]  }
  0x16   :  { %s8881_s12 = sld [smem:[%s9765_s0 + %s8779_s7]]   ;;  %s8783_s7 = smov 18  }
  0x17   :  { %9799 = sst [smem:[#allocation16_spill]] %s8871_s30 }
  0x18   :  { %s8886_s20 = sld [smem:[%s9765_s0 + %s8780_s15]]   ;;  %s8784_s15 = smov 19  }
  0x19   :  { %s8891_s27 = sld [smem:[%s9765_s0 + %s8781_s22]]   ;;  %s8785_s22 = smov 20  }
  0x1a   :  { %s8896_s4 = sld [smem:[%s9765_s0 + %s8782_s28]]   ;;  %s8786_s28 = smov 21  }
  0x1b   :  { %9800 = sst [smem:[#allocation17_spill]] %s8876_s6 }
  0x1c   :  { %9801 = sst [smem:[#allocation18_spill]] %s8881_s12 }
  0x1d   :  { %s8901_s30 = sld [smem:[%s9765_s0 + %s8783_s7]]   ;;  %s8787_s7 = smov 22  }
  0x1e   :  { %9802 = sst [smem:[#allocation19_spill]] %s8886_s20 }
  0x1f   :  { %9803 = sst [smem:[#allocation20_spill]] %s8891_s27 }
  0x20   :  { %9804 = sst [smem:[#allocation21_spill]] %s8896_s4 }
  0x21   :  { %s8906_s20 = sld [smem:[%s9765_s0 + %s8784_s15]]   ;;  %s8788_s15 = smov 23  }
  0x22   :  { %s8911_s27 = sld [smem:[%s9765_s0 + %s8785_s22]]   ;;  %s8789_s22 = smov 24  }
  0x23   :  { %9805 = sst [smem:[#allocation22_spill]] %s8901_s30 }
  0x24   :  { %s8916_s4 = sld [smem:[%s9765_s0 + %s8786_s28]]   ;;  %s8790_s28 = smov 25  }
  0x25   :  { %s8921_s30 = sld [smem:[%s9765_s0 + %s8787_s7]]   ;;  %s8791_s7 = smov 26  }
  0x27   :  { %9806 = sst [smem:[#allocation23_spill]] %s8906_s20 }
  0x28   :  { %9807 = sst [smem:[#allocation24_spill]] %s8911_s27 }
  0x29   :  { %s8926_s20 = sld [smem:[%s9765_s0 + %s8788_s15]]   ;;  %s8792_s15 = smov 27  }
  0x2a   :  { %9808 = sst [smem:[#allocation25_spill]] %s8916_s4 }
  0x2b   :  { %9809 = sst [smem:[#allocation26_spill]] %s8921_s30 }
  0x2c   :  { %s8931_s27 = sld [smem:[%s9765_s0 + %s8789_s22]]   ;;  %s8793_s22 = smov 28  }
  0x2d   :  { %s8936_s4 = sld [smem:[%s9765_s0 + %s8790_s28]]   ;;  %s8794_s28 = smov 29  }
  0x2e   :  { %s8941_s30 = sld [smem:[%s9765_s0 + %s8791_s7]]   ;;  %s8795_s7 = smov 30  }
  0x2f   :  { %9810 = sst [smem:[#allocation27_spill]] %s8926_s20 }
  0x30   :  { %s8946_s20 = sld [smem:[%s9765_s0 + %s8792_s15]]   ;;  %s8796_s15 = smov 31  }
  0x32   :  { %9811 = sst [smem:[#allocation28_spill]] %s8931_s27 }
  0x33   :  { %9812 = sst [smem:[#allocation29_spill]] %s8936_s4 }
  0x34   :  { %9813 = sst [smem:[#allocation30_spill]] %s8941_s30 }
  0x35   :  { %s8951_s27 = sld [smem:[%s9765_s0 + %s8793_s22]]  }
  0x36   :  { %9814 = sst [smem:[#allocation31_spill]] %s8946_s20 }
  0x37   :  { %s8956_s4 = sld [smem:[%s9765_s0 + %s8794_s28]]  }
  0x38   :  { %s8961_s30 = sld [smem:[%s9765_s0 + %s8795_s7]]  }
  0x39   :  { %s8966_s20 = sld [smem:[%s9765_s0 + %s8796_s15]]  }
  0x3a   :  { %69 = vsyncpa [#allocation3], 0 }
  0x3b   :  { %71 = vsyncpa [#allocation3 + $0x1], 0 }
  0x3c   :  { %72 = vsyncpa [#allocation5], 0 }
  0x3d   :  { %74 = vsyncpa [#allocation5 + $0x1], 0  ;;  %s8968_s22 = smov 0   ;;  %s8970_s23 = smov 0  }
  0x3e   :  { %s8972_s26 = smov 0   ;;  %s8974_s28 = smov 0  }
  0x3f LB: > { %s9815_s17 = sld [smem:[#allocation12_spill]]  ;;  %s9816_s14 = sld [smem:[#allocation15_spill]]  ;;  %s8764_s28 = sphi %s8974_s28, %s9846_s28   ;;  %s8760_s26 = sphi %s8972_s26, %s9845_s26   ;;  %s8756_s23 = sphi %s8970_s23, %s9844_s23   ;;  %s8752_s22 = sphi %s8968_s22, %s9843_s22  }
  0x40   : > { %s9817_s13 = sld [smem:[#allocation11_spill]]  ;;  %s9818_s12 = sld [smem:[#allocation18_spill]] }
  0x41   : > { %s9819_s9 = sld [smem:[#allocation10_spill]]  ;;  %s9820_s8 = sld [smem:[#allocation14_spill]] }
  0x42   : > { %s9821_s6 = sld [smem:[#allocation17_spill]]  ;;  %s9822_s3 = sld [smem:[#allocation13_spill]] }
  0x43   : > { %s8989_s0 = sadd.s32 4294967295, %s8764_s28   ;;  %s9774_s1 = sadd.s32 4294967294, %s8764_s28  }
  0x44   : > { %s8993_s2 = sadd.s32 1, %s8764_s28   ;;  %s701_s7 = sadd.s32 1, %s8760_s26 }
  0x45   : > { %s698_s10 = ssub.s32 %s8764_s28, %s8993_s2  ;;  %p711_p0 = scmp.ne.s32.totalorder %s8760_s26, %s8756_s23 }
  0x46   : > { %p699_p1 = scmp.eq.s32.totalorder %s698_s10, 0  ;;  %p712_p2 = scmp.eq.s32.totalorder %s8989_s0, 1 }
  0x47   : > { %p717_p3 = scmp.ne.s32.totalorder %s8756_s23, %s8752_s22  ;;  %p718_p4 = scmp.eq.s32.totalorder %s9774_s1, 1 }
  0x48   : > { %s9006_s11 = scalar_select %p699_p1, %s8760_s26, %s701_s7  }
  0x49   : > { %p9008_p5 = por %p712_p2, %p711_p0  ;;  %p9012_p6 = por %p718_p4, %p717_p3 }
  0x4a   : > { %p7127_p7 = scmp.ge.s32.totalorder %s8764_s28, 1  ;;  %p879_p8 = scmp.lt.s32.totalorder %s8764_s28, 3 }
  0x4b   : > { %s9824_s16 = scalar_select %p9012_p6, 1, 0 }
  0x4c   : > { %p880_p9 = pnand %p7127_p7, %p879_p8 }
  0x4d   : > { %v1058_v0 = vld [vmem:[%s9815_s17] sm:$0xff] (!%p880_p9)  ;;  %v1059_v1 = vld [vmem:[%s9815_s17 + $0x8] sm:$0xff] (!%p880_p9)  ;;  %v8797_v3 = vmov (!%p880_p9), 0.0|0.0   ;;  %v1060_v6 = vld [vmem:[%s9815_s17 + $0x10] sm:$0xff] (!%p880_p9)  ;;  %p967_p10 = scmp.lt.s32.totalorder (!%p880_p9), %s8989_s0, 1  ;;  %s9825_s5 = sld [smem:[#allocation9_spill]] (!%p880_p9) }
  0x4e   : > { %883 = sbr.rel (%p880_p9) target bundleno = 12131 (0x2f63), region = 136  ;;  %v973_v2 = vld [vmem:[%s9819_s9] sm:$0xff] (!%p880_p9)  ;;  %8277 = vmatprep.subr.bf16.mxu1 (!%p880_p9), %v8797_v3  ;;  %v8278_v4 = vpack.c.bf16 (!%p880_p9), %v1059_v1, %v1058_v0  ;;  %8271 = vmatprep.subr.bf16.mxu0 (!%p880_p9), %v8797_v3  ;;  %v974_v5 = vld [vmem:[%s9819_s9 + $0x8] sm:$0xff] (!%p880_p9)  ;;  %v1061_v7 = vld [vmem:[%s9815_s17 + $0x18] sm:$0xff] (!%p880_p9)  ;;  %vm8798_vm0 = vmmov (!%p880_p9), 0   ;;  %v8799_v11 = vmov (!%p880_p9), 0.0  }
  0x4f   : > { %v8272_v8 = vpack.c.bf16 (!%p880_p9), %v974_v5, %v973_v2  ;;  %v975_v9 = vld [vmem:[%s9819_s9 + $0x10] sm:$0xff] (!%p880_p9)  ;;  %v976_v10 = vld [vmem:[%s9819_s9 + $0x18] sm:$0xff] (!%p880_p9)  ;;  %7696 = vmatprep.mubr.msk.f32.mxu1 (!%p880_p9), %vm8798_vm0, %v8799_v11  ;;  %7685 = vmatprep.mubr.msk.f32.mxu0 (!%p880_p9), %vm8798_vm0, %v8799_v11  ;;  %v8281_v12 = vpack.c.bf16 (!%p880_p9), %v1061_v7, %v1060_v6  ;;  %vm984_vm1 = vcmask (!%p880_p9), 261120   ;;  %v7133_v15 = vld [vmem:[%s8831_s21] ss:$0 sm:$0xff] (!%p880_p9)  ;;  %vm1220_vm2 = vcmask (!%p880_p9), 64512  }
  0x50   : > { %8279 = vmatpush3.bf16.msra.mxu1 (!%p880_p9), %v8278_v4  ;;  %v8275_v13 = vpack.c.bf16 (!%p880_p9), %v976_v10, %v975_v9  ;;  %v7131_v16 = vld [vmem:[%s9817_s13] ss:$0 sm:$0xff] (!%p880_p9)  ;;  %v1140_v24 = vld [vmem:[%s8836_s25 + $0x8] sm:$0xff] (!%p880_p9)  ;;  %v1141_v25 = vld [vmem:[%s8836_s25 + $0x10] sm:$0xff] (!%p880_p9)  ;;  %vm3052_vm3 = vcmask (!%p880_p9), 523264   ;;  %s9829_s1 = sld [smem:[#allocation21_spill]] (!%p880_p9) }
  0x51   : > { %8273 = vmatpush3.bf16.msra.mxu0 (!%p880_p9), %v8272_v8  ;;  %8280 = vmatprep.subr.bf16.mxu1 (!%p880_p9), %v8797_v3  ;;  %v1139_v23 = vld [vmem:[%s8836_s25] sm:$0xff] (!%p880_p9)  ;;  %v1142_v27 = vld [vmem:[%s8836_s25 + $0x18] sm:$0xff] (!%p880_p9)  ;;  %v7143_v47 = vld [vmem:[%s9819_s9 + $0x28] sm:$0xff] (!%p880_p9)  ;;  %vm6215_vm9 = vcmask (!%p880_p9), 130048   ;;  %vm6600_vm10 = vcmask (!%p880_p9), 57344  }
  0x52   : > { %8274 = vmatprep.subr.bf16.mxu0 (!%p880_p9), %v8797_v3  ;;  %v8284_v26 = vpack.c.bf16 (!%p880_p9), %v1140_v24, %v1139_v23  ;;  %v8287_v28 = vpack.c.bf16 (!%p880_p9), %v1142_v27, %v1141_v25  ;;  %v7135_v39 = vld [vmem:[%s8841_s29] ss:$0 sm:$0xff] (!%p880_p9)  ;;  %v7144_v49 = vld [vmem:[%s9819_s9 + $0x30] sm:$0xff] (!%p880_p9)  ;;  %v7145_v50 = vld [vmem:[%s9819_s9 + $0x38] sm:$0xff] (!%p880_p9) }
  0x53   : > { %v1382_v42 = vld [vmem:[%s9822_s3] sm:$0xff] (!%p880_p9)  ;;  %v8293_v51 = vpack.c.bf16 (!%p880_p9), %v7145_v50, %v7144_v49  ;;  %v7150_v53 = vld [vmem:[%s9815_s17 + $0x28] sm:$0xff] (!%p880_p9)  ;;  %v7151_v55 = vld [vmem:[%s9815_s17 + $0x30] sm:$0xff] (!%p880_p9) }
  0x54   : > { %8282 = vmatpush3.bf16.msra.mxu1 (!%p880_p9), %v8281_v12  ;;  %v7142_v46 = vld [vmem:[%s9819_s9 + $0x20] sm:$0xff] (!%p880_p9)  ;;  %v7152_v56 = vld [vmem:[%s9815_s17 + $0x38] sm:$0xff] (!%p880_p9)  ;;  %v7157_v8 = vld [vmem:[%s8836_s25 + $0x28] sm:$0xff] (!%p880_p9) }
  0x55   : > { %s968_s18 = scalar_select %p967_p10, %s8989_s0, 1  ;;  %8276 = vmatpush3.bf16.msra.mxu0 %v8275_v13  ;;  %7710 = vmatprep.subr.mxu1 %v8799_v11  ;;  %v8290_v48 = vpack.c.bf16 %v7143_v47, %v7142_v46  ;;  %v7149_v52 = vld [vmem:[%s9815_s17 + $0x20] sm:$0xff]  ;;  %v8299_v59 = vpack.c.bf16 %v7152_v56, %v7151_v55  ;;  %v7158_v9 = vld [vmem:[%s8836_s25 + $0x30] sm:$0xff]  ;;  %v7159_v12 = vld [vmem:[%s8836_s25 + $0x38] sm:$0xff] }
  0x56   : > { %8283 = vmatprep.subr.bf16.mxu0 %v8797_v3  ;;  %v8296_v54 = vpack.c.bf16 %v7150_v53, %v7149_v52  ;;  %v7154_v0 = vld [vmem:[%s8831_s21 + $0x1] ss:$0 sm:$0xff]  ;;  %v8305_v13 = vpack.c.bf16 %v7159_v12, %v7158_v9  ;;  %v7180_v53 = vld [vmem:[%s8831_s21 + $0x2] ss:$0 sm:$0xff] }
  0x57   : > { %s7130_s7 = sshll.u32 %s968_s18, 3  ;;  %v7147_v1 = vld [vmem:[%s9817_s13 + $0x1] ss:$0 sm:$0xff]  ;;  %s9826_s18 = sld [smem:[#allocation16_spill]] }
  0x58   : > { %s970_s10 = scalar_lea.vmem %s9825_s5, %s7130_s7  ;;  %v7156_v7 = vld [vmem:[%s8836_s25 + $0x20] sm:$0xff]  ;;  %s9827_s7 = sld [smem:[#allocation19_spill]] }
  0x59   : > { %v9037_v14 = vld [vmem:[%s970_s10] sm:$0xff]  ;;  %v8302_v10 = vpack.c.bf16 %v7157_v8, %v7156_v7  ;;  %s9828_s10 = sld [smem:[#allocation20_spill]]  ;;  %s9831_s5 = sld [smem:[#allocation22_spill]] }
  0x5a   : > { %7697 = vmatmul.mubr.msk.f32.vlgmr.msra.gmra.mrb[0].mxu1 %vm984_vm1, %v9037_v14  ;;  %7686 = vmatmul.mubr.msk.f32.vlgmr.msra.gmra.mrb[0].mxu0 %vm984_vm1, %v9037_v14  ;;  %v7161_v25 = vld [vmem:[%s8841_s29 + $0x1] ss:$0 sm:$0xff] }
  0x5b   : > { %7712 = vmatprep.mubr.msk.f32.mxu1 %vm8798_vm0, %v8799_v11  ;;  %7707 = vmatprep.mubr.msk.f32.mxu0 %vm8798_vm0, %v8799_v11 }
  0x5c   : > { %8285 = vmatpush3.bf16.msra.mxu0 %v8284_v26 }
  0x5d   : > { %8286 = vmatprep.subr.bf16.mxu0 %v8797_v3 }
  0x60   : > { %8288 = vmatpush3.bf16.msra.mxu0 %v8287_v28  ;;  %v7166_v28 = vld [vmem:[%s9822_s3 + $0x8] sm:$0xff] }
  0x61   : > { %7720 = vmatprep.subr.mxu0 %v8799_v11 }
  0x63   : > { %7708 = vmatmul.mubr.msk.f32.vlgmr.msra.gmra.mrb[2].mxu0 %vm984_vm1, %v9037_v14 }
  0x64   : > { %7722 = vmatprep.mubr.msk.f32.mxu0 %vm8798_vm0, %v8799_v11  ;;  %7721 = vmatpush3.msra.mxu0 %v1382_v42  ;;  %v7178_v42 = vld [vmem:[%s9815_s17 + $0x58] sm:$0xff] }
  0x65   : > { %8295 = vmatprep.subr.bf16.mxu0 %v8797_v3 }
 0x12d   : > { %v1135_v17 = vpop.f32.mrb[0].mxu1  ;;  %v1054_v20 = vpop.f32.mrb[0].mxu0 }
 0x12e   : > { %v1136_v18 = vadd.f32 %v7133_v15, %v1135_v17  ;;  %v7698_v19 = vpop.f32.mrb[1].mxu1  ;;  %v1055_v21 = vadd.f32 %v7131_v16, %v1054_v20  ;;  %v7687_v22 = vpop.f32.mrb[1].mxu0 }
 0x130   : > { %7711 = vmatpush3.xpose.msk.msra.mxu1 %vm1220_vm2, %v1136_v18 }
 0x131   : > { %7715 = vmatprep.subr.mxu1 %v8799_v11 }
 0x133   : > { %7713 = vmatmul.mubr.msk.f32.vlgmr.msra.gmra.mrb[2].mxu1 %vm1220_vm2, %v1055_v21 }
 0x134   : > { %7717 = vmatprep.mubr.msk.f32.mxu1 %vm8798_vm0, %v8799_v11 }
 0x136   : > { %v1216_v38 = vpop.f32.mrb[2].mxu0 }
 0x137   : > { %v7709_v40 = vpop.f32.mrb[3].mxu0  ;;  %v1217_v41 = vadd.f32 %v7135_v39, %v1216_v38  ;;  %v7175_v38 = vld [vmem:[%s9815_s17 + $0x40] sm:$0xff]  ;;  %v7176_v39 = vld [vmem:[%s9815_s17 + $0x48] sm:$0xff] }
 0x138   : > { %v8314_v40 = vpack.c.bf16 %v7176_v39, %v7175_v38 }
 0x139   : > { %7716 = vmatpush3.msra.mxu1 %v1217_v41  ;;  %v7177_v41 = vld [vmem:[%s9815_s17 + $0x50] sm:$0xff] }
 0x13a   : > { %8289 = vmatprep.subr.bf16.mxu1 %v8797_v3 }
 0x206   : > { %v1293_v29 = vpop.f32.mrb[2].mxu1 }
 0x207   : > { %v1297_v30 = vmul.f32 0.35355338, %v1293_v29  ;;  %v7714_v31 = vpop.f32.mrb[3].mxu1 }
 0x209   : > { %v1298_v32 = vsel %vm1220_vm2, %v1297_v30, -inf }
 0x20a   : > { %1299 = vmax.xlane.f32.xlu0 %v1298_v32  ;;  %v7168_v32 = vld [vmem:[%s9819_s9 + $0x40] sm:$0xff] }
 0x297   : > { %v1300_v33 = vpop.xlane.xlu0 %1299 }
 0x298   : > { %v1301_v34 = vsub.f32 %v1297_v30, %v1300_v33  ;;  %v7169_v33 = vld [vmem:[%s9819_s9 + $0x48] sm:$0xff] }
 0x29a   : > { %v1302_v35 = vmul.f32 1.442695, %v1301_v34  ;;  %v8308_v34 = vpack.c.bf16 %v7169_v33, %v7168_v32 }
 0x29c   : > { %8602 = vpow2.f32 %v1302_v35  ;;  %v7170_v35 = vld [vmem:[%s9819_s9 + $0x50] sm:$0xff] }
 0x2a6   : > { %v8603_v36 = vpop.eup %8602 }
 0x2a7   : > { %v1304_v37 = vsel %vm1220_vm2, %v8603_v36, 0.0 }
 0x2a8   : > { %1305 = vadd.xlane.f32.xlu0 %v1304_v37 }
 0x335   : > { %v1306_v43 = vpop.xlane.xlu0 %1305 }
 0x336   : > { %8604 = vrcp.f32 %v1306_v43 }
 0x340   : > { %v8605_v44 = vpop.eup %8604 }
 0x341   : > { %v1308_v45 = vmul.f32 %v8605_v44, %v8603_v36  ;;  %v7171_v36 = vld [vmem:[%s9819_s9 + $0x58] sm:$0xff] }
 0x342   : > { %v8311_v37 = vpack.c.bf16 %v7171_v36, %v7170_v35 }
 0x343   : > { %7718 = vmatmul.mubr.msk.f32.vlgmr.msra.gmra.mrb[4].mxu1 %vm1220_vm2, %v1308_v45  ;;  %v8317_v45 = vpack.c.bf16 %v7178_v42, %v7177_v41  ;;  %v7199_v41 = vld [vmem:[%s9817_s13 + $0x3] ss:$0 sm:$0xff] }
 0x344   : > { %7733 = vmatprep.mubr.msk.f32.mxu1 %vm8798_vm0, %v8799_v11  ;;  %8291 = vmatpush3.bf16.msra.mxu1 %v8290_v48  ;;  %v7141_v48 = vld [vmem:[%s9820_s8] ss:$0 sm:$0xff] }
 0x345   : > { %8292 = vmatprep.subr.bf16.mxu1 %v8797_v3 }
 0x348   : > { %8294 = vmatpush3.bf16.msra.mxu1 %v8293_v51 }
 0x349   : > { %8301 = vmatprep.subr.bf16.mxu1 %v8797_v3 }
 0x34b   : > { %7734 = vmatmul.mubr.msk.f32.vlgmr.msra.gmra.mrb[6].mxu1 %vm984_vm1, %v9037_v14 }
 0x34c   : > { %7755 = vmatprep.mubr.msk.f32.mxu1 %vm8798_vm0, %v8799_v11  ;;  %8303 = vmatpush3.bf16.msra.mxu1 %v8302_v10 }
 0x34d   : > { %8304 = vmatprep.subr.bf16.mxu1 %v8797_v3 }
 0x350   : > { %8306 = vmatpush3.bf16.msra.mxu1 %v8305_v13  ;;  %v7187_v13 = vld [vmem:[%s8841_s29 + $0x2] ss:$0 sm:$0xff] }
 0x351   : > { %7768 = vmatprep.subr.mxu1 %v8799_v11 }
 0x353   : > { %7756 = vmatmul.mubr.msk.f32.vlgmr.msra.gmra.mrb[8].mxu1 %vm984_vm1, %v9037_v14 }
 0x354   : > { %7770 = vmatprep.mubr.msk.f32.mxu1 %vm8798_vm0, %v8799_v11  ;;  %7769 = vmatpush3.msra.mxu1 %v7166_v28  ;;  %v7202_v28 = vld [vmem:[%s9815_s17 + $0x68] sm:$0xff] }
 0x355   : > { %8313 = vmatprep.subr.bf16.mxu1 %v8797_v3 }
 0x416   : > { %v1378_v57 = vpop.f32.mrb[4].mxu1 }
 0x417   : > { %v7719_v58 = vpop.f32.mrb[5].mxu1  ;;  %7723 = vmatmul.mubr.msk.f32.vlgmr.msra.gmra.mrb[4].mxu0 %vm1220_vm2, %v1378_v57 }
 0x418   : > { %8297 = vmatpush3.bf16.msra.mxu0 %v8296_v54  ;;  %7744 = vmatprep.mubr.msk.f32.mxu0 %vm8798_vm0, %v8799_v11  ;;  %v7173_v54 = vld [vmem:[%s9817_s13 + $0x2] ss:$0 sm:$0xff] }
 0x419   : > { %8298 = vmatprep.subr.bf16.mxu0 %v8797_v3 }
 0x41c   : > { %8300 = vmatpush3.bf16.msra.mxu0 %v8299_v59  ;;  %v7182_v59 = vld [vmem:[%s8836_s25 + $0x40] sm:$0xff] }
 0x41d   : > { %7758 = vmatprep.subr.mxu0 %v8799_v11 }
 0x41e   : > { %v1542_v60 = vpop.f32.mrb[6].mxu1 }
 0x41f   : > { %7745 = vmatmul.mubr.msk.f32.vlgmr.msra.gmra.mrb[6].mxu0 %vm984_vm1, %v9037_v14  ;;  %v7735_v61 = vpop.f32.mrb[7].mxu1  ;;  %v1543_v6 = vadd.f32 %v7147_v1, %v1542_v60  ;;  %v7183_v60 = vld [vmem:[%s8836_s25 + $0x48] sm:$0xff] }
 0x420   : > { %7760 = vmatprep.mubr.msk.f32.mxu0 %vm8798_vm0, %v8799_v11  ;;  %v7184_v61 = vld [vmem:[%s8836_s25 + $0x50] sm:$0xff] }
 0x426   : > { %v1708_v24 = vpop.f32.mrb[8].mxu1 }
 0x427   : > { %v7757_v26 = vpop.f32.mrb[9].mxu1  ;;  %v1709_v27 = vadd.f32 %v7161_v25, %v1708_v24  ;;  %v7196_v24 = vld [vmem:[%s9819_s9 + $0x70] sm:$0xff]  ;;  %v7197_v25 = vld [vmem:[%s9819_s9 + $0x78] sm:$0xff] }
 0x428   : > { %v8329_v26 = vpack.c.bf16 %v7197_v25, %v7196_v24  ;;  %v3037_v25 = vld [vmem:[%s8866_s24] sm:$0xff] }
 0x4ea   : > { %v9098_v62 = vpop.f32.mrb[4].mxu0 }
 0x4eb   : > { %v7724_v63 = vpop.f32.mrb[5].mxu0  ;;  %v1462_v49 = vadd.f32 %v7141_v48, %v9098_v62  ;;  %v8320_v62 = vpack.c.bf16 %v7183_v60, %v7182_v59  ;;  %v7210_v48 = vld [vmem:[%s8836_s25 + $0x70] sm:$0xff] }
 0x4ec   : > { %v7185_v63 = vld [vmem:[%s8836_s25 + $0x58] sm:$0xff] }
 0x4f2   : > { %v1625_v2 = vpop.f32.mrb[6].mxu0 }
 0x4f3   : > { %v1626_v4 = vadd.f32 %v7154_v0, %v1625_v2  ;;  %v7746_v5 = vpop.f32.mrb[7].mxu0  ;;  %v8323_v0 = vpack.c.bf16 %v7185_v63, %v7184_v61 }
 0x4f5   : > { %7759 = vmatpush3.xpose.msk.msra.mxu0 %vm1220_vm2, %v1626_v4 }
 0x4f6   : > { %7763 = vmatprep.subr.mxu0 %v8799_v11 }
 0x4f8   : > { %7761 = vmatmul.mubr.msk.f32.vlgmr.msra.gmra.mrb[8].mxu0 %vm1220_vm2, %v1543_v6 }
 0x4f9   : > { %7765 = vmatprep.mubr.msk.f32.mxu0 %vm8798_vm0, %v8799_v11  ;;  %7764 = vmatpush3.msra.mxu0 %v1709_v27  ;;  %v7201_v27 = vld [vmem:[%s9815_s17 + $0x60] sm:$0xff] }
 0x4fa   : > { %8307 = vmatprep.subr.bf16.mxu0 %v8797_v3 }
 0x5cb   : > { %v1784_v15 = vpop.f32.mrb[8].mxu0 }
 0x5cc   : > { %v1788_v16 = vmul.f32 0.35355338, %v1784_v15  ;;  %v7762_v17 = vpop.f32.mrb[9].mxu0 }
 0x5cd   : > { %v7192_v17 = vld [vmem:[%s9822_s3 + $0x10] sm:$0xff] }
 0x5ce   : > { %v1789_v18 = vsel %vm1220_vm2, %v1788_v16, -inf }
 0x5cf   : > { %1790 = vmax.xlane.f32.xlu1 %v1789_v18 }
 0x65c   : > { %v1791_v19 = vpop.xlane.xlu1 %1790 }
 0x65d   : > { %v1792_v20 = vsub.f32 %v1788_v16, %v1791_v19 }
 0x65f   : > { %v1793_v21 = vmul.f32 1.442695, %v1792_v20 }
 0x661   : > { %8606 = vpow2.f32 %v1793_v21  ;;  %v7194_v21 = vld [vmem:[%s9819_s9 + $0x60] sm:$0xff] }
 0x66b   : > { %v8607_v22 = vpop.eup %8606 }
 0x66c   : > { %v1795_v23 = vsel %vm1220_vm2, %v8607_v22, 0.0 }
 0x66d   : > { %1796 = vadd.xlane.f32.xlu1 %v1795_v23 }
 0x6fa   : > { %v1797_v29 = vpop.xlane.xlu1 %1796 }
 0x6fb   : > { %8608 = vrcp.f32 %v1797_v29  ;;  %v8332_v29 = vpack.c.bf16 %v7202_v28, %v7201_v27  ;;  %v3039_v27 = vld [vmem:[%s8866_s24 + $0x10] sm:$0xff] }
 0x705   : > { %v8609_v30 = vpop.eup %8608 }
 0x706   : > { %v1799_v31 = vmul.f32 %v8609_v30, %v8607_v22  ;;  %v7195_v22 = vld [vmem:[%s9819_s9 + $0x68] sm:$0xff]  ;;  %v7203_v30 = vld [vmem:[%s9815_s17 + $0x70] sm:$0xff] }
 0x707   : > { %v8326_v23 = vpack.c.bf16 %v7195_v22, %v7194_v21  ;;  %v2953_v21 = vld [vmem:[%s9816_s14 + $0x8] sm:$0xff] }
 0x708   : > { %7766 = vmatmul.mubr.msk.f32.vlgmr.msra.gmra.mrb[10].mxu0 %vm1220_vm2, %v1799_v31  ;;  %v7204_v31 = vld [vmem:[%s9815_s17 + $0x78] sm:$0xff] }
 0x709   : > { %7781 = vmatprep.mubr.msk.f32.mxu0 %vm8798_vm0, %v8799_v11  ;;  %8309 = vmatpush3.bf16.msra.mxu0 %v8308_v34  ;;  %v8335_v34 = vpack.c.bf16 %v7204_v31, %v7203_v30  ;;  %v3041_v31 = vld [vmem:[%s8866_s24 + $0x20] sm:$0xff] }
 0x70a   : > { %8310 = vmatprep.subr.bf16.mxu0 %v8797_v3 }
 0x70d   : > { %8312 = vmatpush3.bf16.msra.mxu0 %v8311_v37 }
 0x70e   : > { %8319 = vmatprep.subr.bf16.mxu0 %v8797_v3 }
 0x710   : > { %7782 = vmatmul.mubr.msk.f32.vlgmr.msra.gmra.mrb[12].mxu0 %vm984_vm1, %v9037_v14 }
 0x711   : > { %7803 = vmatprep.mubr.msk.f32.mxu0 %vm8798_vm0, %v8799_v11  ;;  %8321 = vmatpush3.bf16.msra.mxu0 %v8320_v62  ;;  %v7213_v62 = vld [vmem:[%s8841_s29 + $0x3] ss:$0 sm:$0xff] }
 0x712   : > { %8322 = vmatprep.subr.bf16.mxu0 %v8797_v3 }
 0x715   : > { %8324 = vmatpush3.bf16.msra.mxu0 %v8323_v0 }
 0x716   : > { %7816 = vmatprep.subr.mxu0 %v8799_v11 }
 0x718   : > { %7804 = vmatmul.mubr.msk.f32.vlgmr.msra.gmra.mrb[14].mxu0 %vm984_vm1, %v9037_v14 }
 0x719   : > { %7818 = vmatprep.mubr.msk.f32.mxu0 %vm8798_vm0, %v8799_v11  ;;  %7817 = vmatpush3.msra.mxu0 %v7192_v17 }
 0x71a   : > { %8331 = vmatprep.subr.bf16.mxu0 %v8797_v3 }
 0x7db   : > { %v1869_v43 = vpop.f32.mrb[10].mxu0 }
 0x7dc   : > { %v7767_v44 = vpop.f32.mrb[11].mxu0  ;;  %7771 = vmatmul.mubr.msk.f32.vlgmr.msra.gmra.mrb[10].mxu1 %vm1220_vm2, %v1869_v43 }
 0x7dd   : > { %8315 = vmatpush3.bf16.msra.mxu1 %v8314_v40  ;;  %7792 = vmatprep.mubr.msk.f32.mxu1 %vm8798_vm0, %v8799_v11  ;;  %v7206_v40 = vld [vmem:[%s8831_s21 + $0x3] ss:$0 sm:$0xff] }
 0x7de   : > { %8316 = vmatprep.subr.bf16.mxu1 %v8797_v3 }
 0x7e1   : > { %8318 = vmatpush3.bf16.msra.mxu1 %v8317_v45 }
 0x7e2   : > { %7806 = vmatprep.subr.mxu1 %v8799_v11 }
 0x7e3   : > { %v2028_v46 = vpop.f32.mrb[12].mxu0 }
 0x7e4   : > { %7793 = vmatmul.mubr.msk.f32.vlgmr.msra.gmra.mrb[12].mxu1 %vm984_vm1, %v9037_v14  ;;  %v7783_v47 = vpop.f32.mrb[13].mxu0  ;;  %v2029_v58 = vadd.f32 %v7173_v54, %v2028_v46  ;;  %v7208_v46 = vld [vmem:[%s8836_s25 + $0x60] sm:$0xff] }
 0x7e5   : > { %7808 = vmatprep.mubr.msk.f32.mxu1 %vm8798_vm0, %v8799_v11  ;;  %v7209_v47 = vld [vmem:[%s8836_s25 + $0x68] sm:$0xff] }
 0x7eb   : > { %v2194_v12 = vpop.f32.mrb[14].mxu0 }
 0x7ec   : > { %v7805_v15 = vpop.f32.mrb[15].mxu0  ;;  %v2195_v16 = vadd.f32 %v7187_v13, %v2194_v12 }
 0x8af   : > { %v1944_v50 = vpop.f32.mrb[10].mxu1 }
 0x8b0   : > { %v9151_v51 = vadd.f32 %v1944_v50, %v1462_v49  ;;  %v7772_v52 = vpop.f32.mrb[11].mxu1  ;;  %v8338_v49 = vpack.c.bf16 %v7209_v47, %v7208_v46  ;;  %v7211_v50 = vld [vmem:[%s8836_s25 + $0x78] sm:$0xff]  ;;  %v7222_v46 = vld [vmem:[%s8861_s19] ss:$0 sm:$0xff] }
 0x8b7   : > { %v2111_v55 = vpop.f32.mrb[12].mxu1 }
 0x8b8   : > { %v2112_v56 = vadd.f32 %v7180_v53, %v2111_v55  ;;  %v7794_v57 = vpop.f32.mrb[13].mxu1 }
 0x8ba   : > { %7807 = vmatpush3.xpose.msk.msra.mxu1 %vm1220_vm2, %v2112_v56 }
 0x8bb   : > { %7811 = vmatprep.subr.mxu1 %v8799_v11 }
 0x8bd   : > { %7809 = vmatmul.mubr.msk.f32.vlgmr.msra.gmra.mrb[14].mxu1 %vm1220_vm2, %v2029_v58 }
 0x8be   : > { %7813 = vmatprep.mubr.msk.f32.mxu1 %vm8798_vm0, %v8799_v11  ;;  %7812 = vmatpush3.msra.mxu1 %v2195_v16 }
 0x8bf   : > { %8325 = vmatprep.subr.bf16.mxu1 %v8797_v3 }
 0x990   : > { %v2270_v1 = vpop.f32.mrb[14].mxu1 }
 0x991   : > { %v2274_v2 = vmul.f32 0.35355338, %v2270_v1  ;;  %v7810_v4 = vpop.f32.mrb[15].mxu1 }
 0x993   : > { %v2275_v5 = vsel %vm1220_vm2, %v2274_v2, -inf }
 0x994   : > { %2276 = vmax.xlane.f32.xlu0 %v2275_v5  ;;  %v7218_v5 = vld [vmem:[%s9822_s3 + $0x18] sm:$0xff] }
 0xa21   : > { %v2277_v6 = vpop.xlane.xlu0 %2276 }
 0xa22   : > { %v2278_v7 = vsub.f32 %v2274_v2, %v2277_v6 }
 0xa24   : > { %v2279_v8 = vmul.f32 1.442695, %v2278_v7 }
 0xa26   : > { %8610 = vpow2.f32 %v2279_v8 }
 0xa30   : > { %v8611_v9 = vpop.eup %8610 }
 0xa31   : > { %v2281_v10 = vsel %vm1220_vm2, %v8611_v9, 0.0 }
 0xa32   : > { %2282 = vadd.xlane.f32.xlu1 %v2281_v10 }
 0xabf   : > { %v2283_v18 = vpop.xlane.xlu1 %2282 }
 0xac0   : > { %8612 = vrcp.f32 %v2283_v18 }
 0xaca   : > { %v8613_v19 = vpop.eup %8612 }
 0xacb   : > { %v2285_v20 = vmul.f32 %v8613_v19, %v8611_v9 }
 0xacd   : > { %7814 = vmatmul.mubr.msk.f32.vlgmr.msra.gmra.mrb[16].mxu1 %vm1220_vm2, %v2285_v20  ;;  %v2952_v20 = vld [vmem:[%s9816_s14] sm:$0xff] }
 0xace   : > { %7829 = vmatprep.mubr.msk.f32.mxu1 %vm8798_vm0, %v8799_v11  ;;  %8327 = vmatpush3.bf16.msra.mxu1 %v8326_v23  ;;  %v8344_v22 = vpack.c.bf16 %v2953_v21, %v2952_v20  ;;  %v2955_v23 = vld [vmem:[%s9816_s14 + $0x18] sm:$0xff]  ;;  %v7237_v20 = vld [vmem:[%s9815_s17 + $0x88] sm:$0xff]  ;;  %v7227_v21 = vld [vmem:[%s9828_s10] ss:$0 sm:$0xff] }
 0xacf   : > { %8328 = vmatprep.subr.bf16.mxu1 %v8797_v3 }
 0xad2   : > { %8330 = vmatpush3.bf16.msra.mxu1 %v8329_v26  ;;  %v3038_v26 = vld [vmem:[%s8866_s24 + $0x8] sm:$0xff] }
 0xad3   : > { %8337 = vmatprep.subr.bf16.mxu1 %v8797_v3  ;;  %v8350_v28 = vpack.c.bf16 %v3038_v26, %v3037_v25  ;;  %v7239_v25 = vld [vmem:[%s9815_s17 + $0x98] sm:$0xff] }
 0xad5   : > { %7830 = vmatmul.mubr.msk.f32.vlgmr.msra.gmra.mrb[18].mxu1 %vm984_vm1, %v9037_v14 }
 0xad6   : > { %7851 = vmatprep.mubr.msk.f32.mxu1 %vm8798_vm0, %v8799_v11  ;;  %8339 = vmatpush3.bf16.msra.mxu1 %v8338_v49 }
 0xad7   : > { %8340 = vmatprep.subr.bf16.mxu1 %v8797_v3 }
 0xba0   : > { %v2355_v32 = vpop.f32.mrb[16].mxu1 }
 0xba1   : > { %v7815_v33 = vpop.f32.mrb[17].mxu1  ;;  %7819 = vmatmul.mubr.msk.f32.vlgmr.msra.gmra.mrb[16].mxu0 %vm1220_vm2, %v2355_v32  ;;  %v3042_v32 = vld [vmem:[%s8866_s24 + $0x28] sm:$0xff] }
 0xba2   : > { %8333 = vmatpush3.bf16.msra.mxu0 %v8332_v29  ;;  %7840 = vmatprep.mubr.msk.f32.mxu0 %vm8798_vm0, %v8799_v11  ;;  %v3040_v29 = vld [vmem:[%s8866_s24 + $0x18] sm:$0xff]  ;;  %v8356_v33 = vpack.c.bf16 %v3042_v32, %v3041_v31 }
 0xba3   : > { %8334 = vmatprep.subr.bf16.mxu0 %v8797_v3  ;;  %v8353_v30 = vpack.c.bf16 %v3040_v29, %v3039_v27  ;;  %v7248_v27 = vld [vmem:[%s8841_s29 + $0x4] ss:$0 sm:$0xff] }
 0xba6   : > { %8336 = vmatpush3.bf16.msra.mxu0 %v8335_v34 }
 0xba7   : > { %7854 = vmatprep.subr.mxu0 %v8799_v11 }
 0xba8   : > { %v2514_v35 = vpop.f32.mrb[18].mxu1 }
 0xba9   : > { %7841 = vmatmul.mubr.msk.f32.vlgmr.msra.gmra.mrb[18].mxu0 %vm984_vm1, %v9037_v14  ;;  %v7831_v36 = vpop.f32.mrb[19].mxu1  ;;  %v2515_v45 = vadd.f32 %v7199_v41, %v2514_v35 }
 0xbaa   : > { %7856 = vmatprep.mubr.msk.f32.mxu0 %vm8798_vm0, %v8799_v11 }
 0xc74   : > { %v2430_v37 = vpop.f32.mrb[16].mxu0 }
 0xc75   : > { %v2434_v38 = vadd.f32 %v2430_v37, %v9151_v51  ;;  %v7820_v39 = vpop.f32.mrb[17].mxu0  ;;  %v8341_v51 = vpack.c.bf16 %v7211_v50, %v7210_v48 }
 0xc77   : > { %8342 = vmatpush3.bf16.msra.mxu1 %v8341_v51  ;;  %v7224_v51 = vld [vmem:[%s9826_s18] ss:$0 sm:$0xff] }
 0xc78   : > { %7864 = vmatprep.subr.mxu1 %v8799_v11 }
 0xc7a   : > { %7852 = vmatmul.mubr.msk.f32.vlgmr.msra.gmra.mrb[20].mxu1 %vm984_vm1, %v9037_v14 }
 0xc7b   : > { %7866 = vmatprep.mubr.msk.f32.mxu1 %vm8798_vm0, %v8799_v11  ;;  %7865 = vmatpush3.msra.mxu1 %v7218_v5  ;;  %v7231_v5 = vld [vmem:[%s9819_s9 + $0x90] sm:$0xff] }
 0xc7c   : > { %v2597_v42 = vpop.f32.mrb[18].mxu0  ;;  %8349 = vmatprep.subr.bf16.mxu1 %v8797_v3 }
 0xc7d   : > { %v2598_v43 = vadd.f32 %v7206_v40, %v2597_v42  ;;  %v7842_v44 = vpop.f32.mrb[19].mxu0  ;;  %v7221_v40 = vld [vmem:[%s9818_s12] ss:$0 sm:$0xff] }
 0xc7e   : > { %v3044_v44 = vld [vmem:[%s8866_s24 + $0x38] sm:$0xff] }
 0xc7f   : > { %7855 = vmatpush3.xpose.msk.msra.mxu0 %vm1220_vm2, %v2598_v43  ;;  %v3043_v43 = vld [vmem:[%s8866_s24 + $0x30] sm:$0xff] }
 0xc80   : > { %7859 = vmatprep.subr.mxu0 %v8799_v11 }
 0xc82   : > { %7857 = vmatmul.mubr.msk.f32.vlgmr.msra.gmra.mrb[20].mxu0 %vm1220_vm2, %v2515_v45  ;;  %v8359_v45 = vpack.c.bf16 %v3044_v44, %v3043_v43 }
 0xc83   : > { %7861 = vmatprep.mubr.msk.f32.mxu0 %vm8798_vm0, %v8799_v11 }
 0xd4d   : > { %v2680_v61 = vpop.f32.mrb[20].mxu1 }
 0xd4e   : > { %v7853_v63 = vpop.f32.mrb[21].mxu1  ;;  %v2681_v0 = vadd.f32 %v7213_v62, %v2680_v61  ;;  %v7229_v62 = vld [vmem:[%s9819_s9 + $0x80] sm:$0xff] }
 0xd4f   : > { %v7230_v63 = vld [vmem:[%s9819_s9 + $0x88] sm:$0xff] }
 0xd50   : > { %7860 = vmatpush3.msra.mxu0 %v2681_v0  ;;  %v8362_v0 = vpack.c.bf16 %v7230_v63, %v7229_v62  ;;  %v7273_v62 = vld [vmem:[%s8836_s25 + $0xb8] sm:$0xff] }
 0xd51   : > { %8343 = vmatprep.subr.bf16.mxu0 %v8797_v3 }
 0xd55   : > { %v2756_v52 = vpop.f32.mrb[20].mxu0 }
 0xd56   : > { %v2760_v53 = vmul.f32 0.35355338, %v2756_v52  ;;  %v7858_v54 = vpop.f32.mrb[21].mxu0 }
 0xd58   : > { %v2761_v55 = vsel %vm1220_vm2, %v2760_v53, -inf }
 0xd59   : > { %2762 = vmax.xlane.f32.xlu0 %v2761_v55 }
 0xde6   : > { %v2763_v56 = vpop.xlane.xlu0 %2762 }
 0xde7   : > { %v2764_v57 = vsub.f32 %v2760_v53, %v2763_v56 }
 0xde9   : > { %v2765_v58 = vmul.f32 1.442695, %v2764_v57 }
 0xdeb   : > { %8614 = vpow2.f32 %v2765_v58 }
 0xdf5   : > { %v8615_v59 = vpop.eup %8614 }
 0xdf6   : > { %v2767_v60 = vsel %vm1220_vm2, %v8615_v59, 0.0 }
 0xdf7   : > { %2768 = vadd.xlane.f32.xlu1 %v2767_v60 }
 0xe84   : > { %v2769_v1 = vpop.xlane.xlu1 %2768 }
 0xe85   : > { %8616 = vrcp.f32 %v2769_v1  ;;  %v7243_v1 = vld [vmem:[%s8836_s25 + $0x80] sm:$0xff] }
 0xe8f   : > { %v8617_v2 = vpop.eup %8616 }
 0xe90   : > { %v2771_v4 = vmul.f32 %v8617_v2, %v8615_v59  ;;  %v7244_v2 = vld [vmem:[%s8836_s25 + $0x88] sm:$0xff] }
 0xe92   : > { %7862 = vmatmul.mubr.msk.f32.vlgmr.msra.gmra.mrb[22].mxu0 %vm1220_vm2, %v2771_v4  ;;  %v8374_v4 = vpack.c.bf16 %v7244_v2, %v7243_v1  ;;  %v7264_v1 = vld [vmem:[%s9815_s17 + $0xa8] sm:$0xff] }
 0xe93   : > { %7877 = vmatprep.mubr.msk.f32.mxu0 %vm8798_vm0, %v8799_v11  ;;  %8345 = vmatpush3.bf16.msra.mxu0 %v8344_v22 }
 0xe94   : > { %8346 = vmatprep.subr.bf16.mxu0 %v8797_v3 }
 0xf65   : > { %v2841_v6 = vpop.f32.mrb[22].mxu0 }
 0xf66   : > { %v7863_v7 = vpop.f32.mrb[23].mxu0  ;;  %7867 = vmatmul.mubr.msk.f32.vlgmr.msra.gmra.mrb[22].mxu1 %vm1220_vm2, %v2841_v6  ;;  %v7232_v6 = vld [vmem:[%s9819_s9 + $0x98] sm:$0xff] }
 0xf67   : > { %7896 = vmatprep.mubr.msk.f32.mxu1 %vm8798_vm0, %v8799_v11  ;;  %8351 = vmatpush3.bf16.msra.mxu1 %v8350_v28  ;;  %v8365_v7 = vpack.c.bf16 %v7232_v6, %v7231_v5  ;;  %v7266_v5 = vld [vmem:[%s9815_s17 + $0xb8] sm:$0xff] }
 0xf68   : > { %8352 = vmatprep.subr.bf16.mxu1 %v8797_v3 }
 0xf6b   : > { %8354 = vmatpush3.bf16.msra.mxu1 %v8353_v30 }
 0xf6c   : > { %8355 = vmatprep.subr.bf16.mxu1 %v8797_v3 }
 0xf6f   : > { %8357 = vmatpush3.bf16.msra.mxu1 %v8356_v33  ;;  %v7241_v33 = vld [vmem:[%s8831_s21 + $0x4] ss:$0 sm:$0xff] }
 0xf70   : > { %8358 = vmatprep.subr.bf16.mxu1 %v8797_v3 }
 0xf73   : > { %8360 = vmatpush3.bf16.msra.mxu1 %v8359_v45 }
 0xf74   : > { %8373 = vmatprep.subr.bf16.mxu1 %v8797_v3 }
0x1039   : > { %v2916_v8 = vpop.f32.mrb[22].mxu1 }
0x103a   : > { %v2920_v9 = vadd.f32 %v2916_v8, %v2434_v38  ;;  %v7868_v10 = vpop.f32.mrb[23].mxu1  ;;  %v7220_v38 = vld [vmem:[%s9821_s6] ss:$0 sm:$0xff]  ;;  %v7245_v8 = vld [vmem:[%s8836_s25 + $0x90] sm:$0xff] }
0x103c   : > { %v2921_v12 = vadd.f32 %v2920_v9, %v9037_v14  ;;  %v2954_v14 = vld [vmem:[%s9816_s14 + $0x10] sm:$0xff]  ;;  %v7246_v9 = vld [vmem:[%s8836_s25 + $0x98] sm:$0xff] }
0x103d   : > { %v8347_v24 = vpack.c.bf16 %v2955_v23, %v2954_v14  ;;  %v8377_v10 = vpack.c.bf16 %v7246_v9, %v7245_v8 }
0x103e   : > { %v2924_v13 = vsel %vm984_vm1, %v2921_v12, 0.0 }
0x103f   : > { %2925 = vadd.xlane.f32.xlu0 %v2924_v13  ;;  %8348 = vmatpush3.bf16.msra.mxu0 %v8347_v24  ;;  %v7238_v24 = vld [vmem:[%s9815_s17 + $0x90] sm:$0xff] }
0x1040   : > { %8361 = vmatprep.subr.bf16.mxu0 %v8797_v3  ;;  %v8371_v26 = vpack.c.bf16 %v7239_v25, %v7238_v24 }
0x10cc   : > { %v2926_v15 = vpop.xlane.xlu0 %2925 }
0x10cd   : > { %v2928_v16 = vmul.f32 0.03125, %v2926_v15 }
0x10cf   : > { %v2929_v17 = vsub.f32 %v2921_v12, %v2928_v16 }
0x10d1   : > { %v2930_v18 = vmul.f32 %v2929_v17, %v2929_v17 }
0x10d3   : > { %v2931_v19 = vsel %vm984_vm1, %v2930_v18, 0.0 }
0x10d4   : > { %2932 = vadd.xlane.f32.xlu1 %v2931_v19  ;;  %v7236_v19 = vld [vmem:[%s9815_s17 + $0x80] sm:$0xff] }
0x10d5   : > { %v8368_v14 = vpack.c.bf16 %v7237_v20, %v7236_v19  ;;  %v7261_v19 = vld [vmem:[%s9817_s13 + $0x5] ss:$0 sm:$0xff] }
0x1161   : > { %v2933_v34 = vpop.xlane.xlu1 %2932 }
0x1162   : > { %v2934_v35 = vmul.f32 0.03125, %v2933_v34 }
0x1164   : > { %v2935_v36 = vadd.f32 1e-05, %v2934_v35  ;;  %v7234_v35 = vld [vmem:[%s9817_s13 + $0x4] ss:$0 sm:$0xff] }
0x1166   : > { %8618 = vrsqrt.f32 %v2935_v36 }
0x1170   : > { %v8619_v37 = vpop.eup %8618 }
0x1171   : > { %v2937_v39 = vmul.f32 %v8619_v37, %v2929_v17  ;;  %v7226_v17 = vld [vmem:[%s9827_s7] ss:$0 sm:$0xff] }
0x1173   : > { %v2944_v41 = vmul.f32 %v7220_v38, %v2937_v39 }
0x1175   : > { %v2951_v42 = vadd.f32 %v7221_v40, %v2944_v41 }
0x1177   : > { %7878 = vmatmul.mubr.msk.f32.vlgmr.msra.gmra.mrb[24].mxu0 %vm984_vm1, %v2951_v42 }
0x1178   : > { %7907 = vmatprep.mubr.msk.f32.mxu0 %vm8798_vm0, %v8799_v11  ;;  %8363 = vmatpush3.bf16.msra.mxu0 %v8362_v0  ;;  %v7263_v0 = vld [vmem:[%s9815_s17 + $0xa0] sm:$0xff] }
0x1179   : > { %8364 = vmatprep.subr.bf16.mxu0 %v8797_v3  ;;  %v8386_v2 = vpack.c.bf16 %v7264_v1, %v7263_v0 }
0x117c   : > { %8366 = vmatpush3.bf16.msra.mxu0 %v8365_v7 }
0x117d   : > { %8367 = vmatprep.subr.bf16.mxu0 %v8797_v3 }
0x124a   : > { %v3032_v47 = vpop.f32.mrb[24].mxu0 }
0x124b   : > { %v3033_v48 = vadd.f32 %v7222_v46, %v3032_v47  ;;  %v7879_v49 = vpop.f32.mrb[25].mxu0 }
0x124d   : > { %v3036_v50 = vmax.f32 %v3033_v48, 0.0  ;;  %v7253_v48 = vld [vmem:[%s9822_s3 + $0x20] sm:$0xff] }
0x124f   : > { %7897 = vmatmul.mubr.msk.f32.vlgmr.msra.gmra.mrb[24].mxu1 %vm3052_vm3, %v3036_v50  ;;  %v7256_v50 = vld [vmem:[%s9819_s9 + $0xa0] sm:$0xff] }
0x1250   : > { %7929 = vmatprep.mubr.msk.f32.mxu1 %vm8798_vm0, %v8799_v11  ;;  %8375 = vmatpush3.bf16.msra.mxu1 %v8374_v4  ;;  %v7265_v4 = vld [vmem:[%s9815_s17 + $0xb0] sm:$0xff] }
0x1251   : > { %8376 = vmatprep.subr.bf16.mxu1 %v8797_v3  ;;  %v8389_v8 = vpack.c.bf16 %v7266_v5, %v7265_v4  ;;  %v7294_v4 = vld [vmem:[%s8831_s21 + $0x6] ss:$0 sm:$0xff] }
0x1254   : > { %8378 = vmatpush3.bf16.msra.mxu1 %v8377_v10 }
0x1255   : > { %7937 = vmatprep.subr.mxu1 %v8799_v11 }
0x1322   : > { %v3122_v52 = vpop.f32.mrb[24].mxu1 }
0x1323   : > { %v3123_v53 = vadd.f32 %v7224_v51, %v3122_v52  ;;  %v7898_v54 = vpop.f32.mrb[25].mxu1  ;;  %v7257_v51 = vld [vmem:[%s9819_s9 + $0xa8] sm:$0xff] }
0x1325   : > { %v3126_v55 = vadd.f32 %v3123_v53, %v2951_v42  ;;  %v8380_v53 = vpack.c.bf16 %v7257_v51, %v7256_v50  ;;  %v7289_v50 = vld [vmem:[%s9815_s17 + $0xc0] sm:$0xff]  ;;  %v7290_v51 = vld [vmem:[%s9815_s17 + $0xc8] sm:$0xff] }
0x1327   : > { %v3129_v56 = vsel %vm984_vm1, %v3126_v55, 0.0 }
0x1328   : > { %3130 = vadd.xlane.f32.xlu0 %v3129_v56  ;;  %v7259_v56 = vld [vmem:[%s9819_s9 + $0xb8] sm:$0xff] }
0x13b5   : > { %v3131_v57 = vpop.xlane.xlu0 %3130 }
0x13b6   : > { %v3132_v58 = vmul.f32 0.03125, %v3131_v57 }
0x13b8   : > { %v3133_v59 = vsub.f32 %v3126_v55, %v3132_v58  ;;  %v7258_v55 = vld [vmem:[%s9819_s9 + $0xb0] sm:$0xff]  ;;  %v7270_v58 = vld [vmem:[%s8836_s25 + $0xa0] sm:$0xff] }
0x13b9   : > { %v8383_v57 = vpack.c.bf16 %v7259_v56, %v7258_v55 }
0x13ba   : > { %v3134_v60 = vmul.f32 %v3133_v59, %v3133_v59 }
0x13bc   : > { %v3135_v61 = vsel %vm984_vm1, %v3134_v60, 0.0 }
0x13bd   : > { %3136 = vadd.xlane.f32.xlu1 %v3135_v61  ;;  %v7272_v61 = vld [vmem:[%s8836_s25 + $0xb0] sm:$0xff] }
0x13be   : > { %v8395_v63 = vpack.c.bf16 %v7273_v62, %v7272_v61  ;;  %v7255_v62 = vld [vmem:[%s9820_s8 + $0x1] ss:$0 sm:$0xff]  ;;  %s9838_s8 = sld [smem:[#allocation28_spill]] }
0x144a   : > { %v3137_v12 = vpop.xlane.xlu1 %3136 }
0x144b   : > { %v3138_v13 = vmul.f32 0.03125, %v3137_v12 }
0x144d   : > { %v3139_v15 = vadd.f32 1e-05, %v3138_v13 }
0x144f   : > { %8620 = vrsqrt.f32 %v3139_v15 }
0x1459   : > { %v8621_v16 = vpop.eup %8620 }
0x145a   : > { %v3141_v18 = vmul.f32 %v8621_v16, %v3133_v59  ;;  %v7271_v59 = vld [vmem:[%s8836_s25 + $0xa8] sm:$0xff] }
0x145b   : > { %v8392_v60 = vpack.c.bf16 %v7271_v59, %v7270_v58 }
0x145c   : > { %v3148_v22 = vmul.f32 %v7226_v17, %v3141_v18  ;;  %v7268_v17 = vld [vmem:[%s8831_s21 + $0x5] ss:$0 sm:$0xff] }
0x145e   : > { %v9281_v23 = vadd.f32 %v7227_v21, %v3148_v22  ;;  %v7275_v22 = vld [vmem:[%s8841_s29 + $0x5] ss:$0 sm:$0xff] }
0x1460   : > { %7908 = vmatmul.mubr.msk.f32.vlgmr.msra.gmra.mrb[26].mxu0 %vm984_vm1, %v9281_v23  ;;  %7930 = vmatmul.mubr.msk.f32.vlgmr.msra.gmra.mrb[26].mxu1 %vm984_vm1, %v9281_v23 }
0x1461   : > { %8369 = vmatpush3.bf16.msra.mxu0 %v8368_v14  ;;  %7918 = vmatprep.mubr.msk.f32.mxu0 %vm8798_vm0, %v8799_v11 }
0x1462   : > { %8370 = vmatprep.subr.bf16.mxu0 %v8797_v3  ;;  %7939 = vmatprep.mubr.msk.f32.mxu1 %vm8798_vm0, %v8799_v11 }
0x1465   : > { %8372 = vmatpush3.bf16.msra.mxu0 %v8371_v26 }
0x1466   : > { %7932 = vmatprep.subr.mxu0 %v8799_v11 }
0x1468   : > { %7919 = vmatmul.mubr.msk.f32.vlgmr.msra.gmra.mrb[28].mxu0 %vm984_vm1, %v9281_v23 }
0x1469   : > { %7934 = vmatprep.mubr.msk.f32.mxu0 %vm8798_vm0, %v8799_v11 }
0x1533   : > { %v3240_v28 = vpop.f32.mrb[26].mxu0  ;;  %v3406_v29 = vpop.f32.mrb[26].mxu1 }
0x1534   : > { %v3407_v30 = vadd.f32 %v7248_v27, %v3406_v29  ;;  %v7909_v31 = vpop.f32.mrb[27].mxu0  ;;  %v7931_v32 = vpop.f32.mrb[27].mxu1  ;;  %v3241_v38 = vadd.f32 %v7234_v35, %v3240_v28 }
0x1536   : > { %7938 = vmatpush3.msra.mxu1 %v3407_v30 }
0x1537   : > { %8379 = vmatprep.subr.bf16.mxu1 %v8797_v3 }
0x153b   : > { %v3323_v34 = vpop.f32.mrb[28].mxu0 }
0x153c   : > { %v3324_v36 = vadd.f32 %v7241_v33, %v3323_v34  ;;  %v7920_v37 = vpop.f32.mrb[29].mxu0  ;;  %v7280_v34 = vld [vmem:[%s9822_s3 + $0x28] sm:$0xff] }
0x153d   : > { %v7283_v37 = vld [vmem:[%s9819_s9 + $0xc8] sm:$0xff] }
0x153e   : > { %7933 = vmatpush3.xpose.msk.msra.mxu0 %vm1220_vm2, %v3324_v36  ;;  %v7282_v36 = vld [vmem:[%s9819_s9 + $0xc0] sm:$0xff] }
0x153f   : > { %7942 = vmatprep.subr.mxu0 %v8799_v11 }
0x1541   : > { %7935 = vmatmul.mubr.msk.f32.vlgmr.msra.gmra.mrb[30].mxu0 %vm1220_vm2, %v3241_v38 }
0x1542   : > { %7944 = vmatprep.mubr.msk.f32.mxu0 %vm8798_vm0, %v8799_v11  ;;  %7943 = vmatpush3.msra.mxu0 %v7253_v48  ;;  %v7299_v48 = vld [vmem:[%s8836_s25 + $0xd8] sm:$0xff] }
0x1543   : > { %8385 = vmatprep.subr.bf16.mxu0 %v8797_v3 }
0x1614   : > { %v3482_v39 = vpop.f32.mrb[30].mxu0 }
0x1615   : > { %v3486_v40 = vmul.f32 0.35355338, %v3482_v39  ;;  %v7936_v41 = vpop.f32.mrb[31].mxu0  ;;  %v8398_v39 = vpack.c.bf16 %v7283_v37, %v7282_v36  ;;  %v7324_v36 = vld [vmem:[%s8836_s25 + $0xf0] sm:$0xff]  ;;  %v7325_v37 = vld [vmem:[%s8836_s25 + $0xf8] sm:$0xff] }
0x1616   : > { %v7284_v41 = vld [vmem:[%s9819_s9 + $0xd0] sm:$0xff] }
0x1617   : > { %v3487_v42 = vsel %vm1220_vm2, %v3486_v40, -inf }
0x1618   : > { %3488 = vmax.xlane.f32.xlu0 %v3487_v42  ;;  %v7285_v42 = vld [vmem:[%s9819_s9 + $0xd8] sm:$0xff] }
0x16a5   : > { %v3489_v43 = vpop.xlane.xlu0 %3488 }
0x16a6   : > { %v3490_v44 = vsub.f32 %v3486_v40, %v3489_v43  ;;  %v8401_v43 = vpack.c.bf16 %v7285_v42, %v7284_v41  ;;  %v7317_v42 = vld [vmem:[%s9815_s17 + $0xf0] sm:$0xff] }
0x16a8   : > { %v3491_v45 = vmul.f32 1.442695, %v3490_v44  ;;  %v7296_v44 = vld [vmem:[%s8836_s25 + $0xc0] sm:$0xff] }
0x16aa   : > { %8622 = vpow2.f32 %v3491_v45  ;;  %v7297_v45 = vld [vmem:[%s8836_s25 + $0xc8] sm:$0xff] }
0x16b4   : > { %v8623_v46 = vpop.eup %8622 }
0x16b5   : > { %v3493_v47 = vsel %vm1220_vm2, %v8623_v46, 0.0 }
0x16b6   : > { %3494 = vadd.xlane.f32.xlu1 %v3493_v47  ;;  %v7298_v47 = vld [vmem:[%s8836_s25 + $0xd0] sm:$0xff] }
0x1743   : > { %v3495_v49 = vpop.xlane.xlu1 %3494 }
0x1744   : > { %8624 = vrcp.f32 %v3495_v49  ;;  %v8413_v49 = vpack.c.bf16 %v7299_v48, %v7298_v47 }
0x174e   : > { %v8625_v52 = vpop.eup %8624 }
0x174f   : > { %v3497_v54 = vmul.f32 %v8625_v52, %v8623_v46  ;;  %v8410_v46 = vpack.c.bf16 %v7297_v45, %v7296_v44  ;;  %v8404_v52 = vpack.c.bf16 %v7290_v51, %v7289_v50 }
0x1751   : > { %7940 = vmatmul.mubr.msk.f32.vlgmr.msra.gmra.mrb[28].mxu1 %vm1220_vm2, %v3497_v54  ;;  %v7292_v54 = vld [vmem:[%s9815_s17 + $0xd8] sm:$0xff] }
0x1752   : > { %8381 = vmatpush3.bf16.msra.mxu1 %v8380_v53  ;;  %7955 = vmatprep.mubr.msk.f32.mxu1 %vm8798_vm0, %v8799_v11  ;;  %v7291_v53 = vld [vmem:[%s9815_s17 + $0xd0] sm:$0xff] }
0x1753   : > { %8382 = vmatprep.subr.bf16.mxu1 %v8797_v3 }
0x1756   : > { %8384 = vmatpush3.bf16.msra.mxu1 %v8383_v57  ;;  %v8407_v57 = vpack.c.bf16 %v7292_v54, %v7291_v53  ;;  %v7320_v54 = vld [vmem:[%s8831_s21 + $0x7] ss:$0 sm:$0xff] }
0x1757   : > { %8391 = vmatprep.subr.bf16.mxu1 %v8797_v3 }
0x1759   : > { %7956 = vmatmul.mubr.msk.f32.vlgmr.msra.gmra.mrb[30].mxu1 %vm984_vm1, %v9281_v23 }
0x175a   : > { %8393 = vmatpush3.bf16.msra.mxu1 %v8392_v60  ;;  %7977 = vmatprep.mubr.msk.f32.mxu1 %vm8798_vm0, %v8799_v11 }
0x175b   : > { %8394 = vmatprep.subr.bf16.mxu1 %v8797_v3 }
0x175e   : > { %8396 = vmatpush3.bf16.msra.mxu1 %v8395_v63 }
0x175f   : > { %7990 = vmatprep.subr.mxu1 %v8799_v11 }
0x1761   : > { %7978 = vmatmul.mubr.msk.f32.vlgmr.msra.gmra.mrb[32].mxu1 %vm984_vm1, %v9281_v23 }
0x1762   : > { %7992 = vmatprep.mubr.msk.f32.mxu1 %vm8798_vm0, %v8799_v11  ;;  %7991 = vmatpush3.msra.mxu1 %v7280_v34  ;;  %v7323_v34 = vld [vmem:[%s8836_s25 + $0xe8] sm:$0xff] }
0x1763   : > { %8403 = vmatprep.subr.bf16.mxu1 %v8797_v3 }
0x1824   : > { %v3567_v6 = vpop.f32.mrb[28].mxu1 }
0x1825   : > { %v7941_v7 = vpop.f32.mrb[29].mxu1  ;;  %7945 = vmatmul.mubr.msk.f32.vlgmr.msra.gmra.mrb[32].mxu0 %vm1220_vm2, %v3567_v6  ;;  %v7287_v6 = vld [vmem:[%s9817_s13 + $0x6] ss:$0 sm:$0xff] }
0x1826   : > { %8387 = vmatpush3.bf16.msra.mxu0 %v8386_v2  ;;  %7966 = vmatprep.mubr.msk.f32.mxu0 %vm8798_vm0, %v8799_v11 }
0x1827   : > { %8388 = vmatprep.subr.bf16.mxu0 %v8797_v3 }
0x182a   : > { %8390 = vmatpush3.bf16.msra.mxu0 %v8389_v8 }
0x182b   : > { %7980 = vmatprep.subr.mxu0 %v8799_v11 }
0x182c   : > { %v3732_v9 = vpop.f32.mrb[30].mxu1 }
0x182d   : > { %v7957_v10 = vpop.f32.mrb[31].mxu1  ;;  %7967 = vmatmul.mubr.msk.f32.vlgmr.msra.gmra.mrb[34].mxu0 %vm984_vm1, %v9281_v23  ;;  %v3733_v14 = vadd.f32 %v7261_v19, %v3732_v9  ;;  %v7301_v9 = vld [vmem:[%s8841_s29 + $0x6] ss:$0 sm:$0xff] }
0x182e   : > { %7982 = vmatprep.mubr.msk.f32.mxu0 %vm8798_vm0, %v8799_v11 }
0x1834   : > { %v3898_v12 = vpop.f32.mrb[32].mxu1 }
0x1835   : > { %v7979_v13 = vpop.f32.mrb[33].mxu1  ;;  %v3899_v24 = vadd.f32 %v7275_v22, %v3898_v12 }
0x18f8   : > { %v9348_v15 = vpop.f32.mrb[32].mxu0 }
0x18f9   : > { %v7946_v16 = vpop.f32.mrb[33].mxu0  ;;  %v3652_v63 = vadd.f32 %v7255_v62, %v9348_v15 }
0x1900   : > { %v3815_v18 = vpop.f32.mrb[34].mxu0 }
0x1901   : > { %v3816_v20 = vadd.f32 %v7268_v17, %v3815_v18  ;;  %v7968_v21 = vpop.f32.mrb[35].mxu0 }
0x1903   : > { %7981 = vmatpush3.xpose.msk.msra.mxu0 %vm1220_vm2, %v3816_v20 }
0x1904   : > { %7985 = vmatprep.subr.mxu0 %v8799_v11 }
0x1906   : > { %7983 = vmatmul.mubr.msk.f32.vlgmr.msra.gmra.mrb[36].mxu0 %vm1220_vm2, %v3733_v14  ;;  %v7306_v14 = vld [vmem:[%s9822_s3 + $0x30] sm:$0xff] }
0x1907   : > { %7986 = vmatpush3.msra.mxu0 %v3899_v24  ;;  %7987 = vmatprep.mubr.msk.f32.mxu0 %vm8798_vm0, %v8799_v11 }
0x1908   : > { %8397 = vmatprep.subr.bf16.mxu0 %v8797_v3 }
0x19d9   : > { %v3974_v25 = vpop.f32.mrb[36].mxu0 }
0x19da   : > { %v3978_v26 = vmul.f32 0.35355338, %v3974_v25  ;;  %v7984_v27 = vpop.f32.mrb[37].mxu0  ;;  %v7308_v25 = vld [vmem:[%s9819_s9 + $0xe0] sm:$0xff] }
0x19dc   : > { %v3979_v28 = vsel %vm1220_vm2, %v3978_v26, -inf }
0x19dd   : > { %3980 = vmax.xlane.f32.xlu0 %v3979_v28 }
0x1a6a   : > { %v3981_v29 = vpop.xlane.xlu0 %3980 }
0x1a6b   : > { %v3982_v30 = vsub.f32 %v3978_v26, %v3981_v29  ;;  %v7309_v26 = vld [vmem:[%s9819_s9 + $0xe8] sm:$0xff] }
0x1a6c   : > { %v8416_v28 = vpack.c.bf16 %v7309_v26, %v7308_v25  ;;  %v7338_v26 = vld [vmem:[%s9816_s14 + $0x20] sm:$0xff] }
0x1a6d   : > { %v3983_v31 = vmul.f32 1.442695, %v3982_v30  ;;  %v7310_v30 = vld [vmem:[%s9819_s9 + $0xf0] sm:$0xff] }
0x1a6f   : > { %8626 = vpow2.f32 %v3983_v31  ;;  %v7311_v31 = vld [vmem:[%s9819_s9 + $0xf8] sm:$0xff]  ;;  %s7412_s9 = sshll.u32 %s8989_s0, 4 }
0x1a79   : > { %v8627_v32 = vpop.eup %8626 }
0x1a7a   : > { %v3985_v33 = vsel %vm1220_vm2, %v8627_v32, 0.0 }
0x1a7b   : > { %3986 = vadd.xlane.f32.xlu1 %v3985_v33  ;;  %v7322_v33 = vld [vmem:[%s8836_s25 + $0xe0] sm:$0xff] }
0x1b08   : > { %v3987_v35 = vpop.xlane.xlu1 %3986 }
0x1b09   : > { %8628 = vrcp.f32 %v3987_v35  ;;  %v8428_v35 = vpack.c.bf16 %v7323_v34, %v7322_v33  ;;  %v7347_v33 = vld [vmem:[%s8866_s24 + $0x50] sm:$0xff] }
0x1b13   : > { %v8629_v38 = vpop.eup %8628 }
0x1b14   : > { %v3989_v40 = vmul.f32 %v8629_v38, %v8627_v32  ;;  %v8419_v32 = vpack.c.bf16 %v7311_v31, %v7310_v30  ;;  %v8431_v38 = vpack.c.bf16 %v7325_v37, %v7324_v36  ;;  %v7345_v31 = vld [vmem:[%s8866_s24 + $0x40] sm:$0xff] }
0x1b15   : > { %v7349_v37 = vld [vmem:[%s8866_s24 + $0x60] sm:$0xff] }
0x1b16   : > { %7988 = vmatmul.mubr.msk.f32.vlgmr.msra.gmra.mrb[38].mxu0 %vm1220_vm2, %v3989_v40  ;;  %v7316_v40 = vld [vmem:[%s9815_s17 + $0xe8] sm:$0xff] }
0x1b17   : > { %8399 = vmatpush3.bf16.msra.mxu0 %v8398_v39  ;;  %8003 = vmatprep.mubr.msk.f32.mxu0 %vm8798_vm0, %v8799_v11  ;;  %v7315_v39 = vld [vmem:[%s9815_s17 + $0xe0] sm:$0xff] }
0x1b18   : > { %8400 = vmatprep.subr.bf16.mxu0 %v8797_v3  ;;  %v8422_v41 = vpack.c.bf16 %v7316_v40, %v7315_v39 }
0x1b1b   : > { %8402 = vmatpush3.bf16.msra.mxu0 %v8401_v43  ;;  %v7318_v43 = vld [vmem:[%s9815_s17 + $0xf8] sm:$0xff] }
0x1b1c   : > { %8409 = vmatprep.subr.bf16.mxu0 %v8797_v3 }
0x1b1e   : > { %8004 = vmatmul.mubr.msk.f32.vlgmr.msra.gmra.mrb[40].mxu0 %vm984_vm1, %v9281_v23 }
0x1b1f   : > { %8411 = vmatpush3.bf16.msra.mxu0 %v8410_v46  ;;  %8025 = vmatprep.mubr.msk.f32.mxu0 %vm8798_vm0, %v8799_v11  ;;  %v8425_v46 = vpack.c.bf16 %v7318_v43, %v7317_v42 }
0x1b20   : > { %8412 = vmatprep.subr.bf16.mxu0 %v8797_v3 }
0x1b23   : > { %8414 = vmatpush3.bf16.msra.mxu0 %v8413_v49 }
0x1b24   : > { %8038 = vmatprep.subr.mxu0 %v8799_v11 }
0x1b26   : > { %8026 = vmatmul.mubr.msk.f32.vlgmr.msra.gmra.mrb[42].mxu0 %vm984_vm1, %v9281_v23 }
0x1b27   : > { %8040 = vmatprep.mubr.msk.f32.mxu0 %vm8798_vm0, %v8799_v11  ;;  %8039 = vmatpush3.msra.mxu0 %v7306_v14 }
0x1b28   : > { %8421 = vmatprep.subr.bf16.mxu0 %v8797_v3 }
0x1be9   : > { %v4059_v55 = vpop.f32.mrb[38].mxu0 }
0x1bea   : > { %v7989_v56 = vpop.f32.mrb[39].mxu0  ;;  %7993 = vmatmul.mubr.msk.f32.vlgmr.msra.gmra.mrb[34].mxu1 %vm1220_vm2, %v4059_v55 }
0x1beb   : > { %8405 = vmatpush3.bf16.msra.mxu1 %v8404_v52  ;;  %8014 = vmatprep.mubr.msk.f32.mxu1 %vm8798_vm0, %v8799_v11  ;;  %v7313_v56 = vld [vmem:[%s9817_s13 + $0x7] ss:$0 sm:$0xff] }
0x1bec   : > { %8406 = vmatprep.subr.bf16.mxu1 %v8797_v3 }
0x1bef   : > { %8408 = vmatpush3.bf16.msra.mxu1 %v8407_v57 }
0x1bf0   : > { %8028 = vmatprep.subr.mxu1 %v8799_v11 }
0x1bf1   : > { %v4218_v58 = vpop.f32.mrb[40].mxu0 }
0x1bf2   : > { %v8005_v59 = vpop.f32.mrb[41].mxu0  ;;  %8015 = vmatmul.mubr.msk.f32.vlgmr.msra.gmra.mrb[36].mxu1 %vm984_vm1, %v9281_v23  ;;  %v4219_v10 = vadd.f32 %v7287_v6, %v4218_v58 }
0x1bf3   : > { %8030 = vmatprep.mubr.msk.f32.mxu1 %vm8798_vm0, %v8799_v11  ;;  %v7327_v59 = vld [vmem:[%s8841_s29 + $0x7] ss:$0 sm:$0xff] }
0x1bf9   : > { %v4384_v60 = vpop.f32.mrb[42].mxu0 }
0x1bfa   : > { %v8027_v61 = vpop.f32.mrb[43].mxu0  ;;  %v4385_v12 = vadd.f32 %v7301_v9, %v4384_v60 }
0x1cbd   : > { %v4134_v0 = vpop.f32.mrb[34].mxu1 }
0x1cbe   : > { %v9401_v1 = vadd.f32 %v4134_v0, %v3652_v63  ;;  %v7994_v2 = vpop.f32.mrb[35].mxu1 }
0x1cc5   : > { %v4301_v5 = vpop.f32.mrb[36].mxu1 }
0x1cc6   : > { %v4302_v7 = vadd.f32 %v7294_v4, %v4301_v5  ;;  %v8016_v8 = vpop.f32.mrb[37].mxu1 }
0x1cc8   : > { %8029 = vmatpush3.xpose.msk.msra.mxu1 %vm1220_vm2, %v4302_v7 }
0x1cc9   : > { %8033 = vmatprep.subr.mxu1 %v8799_v11 }
0x1ccb   : > { %8031 = vmatmul.mubr.msk.f32.vlgmr.msra.gmra.mrb[38].mxu1 %vm1220_vm2, %v4219_v10 }
0x1ccc   : > { %8034 = vmatpush3.msra.mxu1 %v4385_v12  ;;  %8035 = vmatprep.mubr.msk.f32.mxu1 %vm8798_vm0, %v8799_v11  ;;  %v7332_v12 = vld [vmem:[%s9822_s3 + $0x38] sm:$0xff]  ;;  %s9830_s3 = sld [smem:[#allocation25_spill]] }
0x1ccd   : > { %8415 = vmatprep.subr.bf16.mxu1 %v8797_v3 }
0x1d9e   : > { %v4460_v13 = vpop.f32.mrb[38].mxu1 }
0x1d9f   : > { %v4464_v15 = vmul.f32 0.35355338, %v4460_v13  ;;  %v8032_v16 = vpop.f32.mrb[39].mxu1 }
0x1da1   : > { %v4465_v17 = vsel %vm1220_vm2, %v4464_v15, -inf }
0x1da2   : > { %4466 = vmax.xlane.f32.xlu0 %v4465_v17 }
0x1e2f   : > { %v4467_v18 = vpop.xlane.xlu0 %4466 }
0x1e30   : > { %v4468_v19 = vsub.f32 %v4464_v15, %v4467_v18 }
0x1e32   : > { %v4469_v20 = vmul.f32 1.442695, %v4468_v19 }
0x1e34   : > { %8630 = vpow2.f32 %v4469_v20 }
0x1e3e   : > { %v8631_v21 = vpop.eup %8630 }
0x1e3f   : > { %v4471_v22 = vsel %vm1220_vm2, %v8631_v21, 0.0 }
0x1e40   : > { %4472 = vadd.xlane.f32.xlu1 %v4471_v22 }
0x1ecd   : > { %v4473_v24 = vpop.xlane.xlu1 %4472 }
0x1ece   : > { %8632 = vrcp.f32 %v4473_v24 }
0x1ed8   : > { %v8633_v27 = vpop.eup %8632 }
0x1ed9   : > { %v4475_v29 = vmul.f32 %v8633_v27, %v8631_v21  ;;  %v7339_v27 = vld [vmem:[%s9816_s14 + $0x28] sm:$0xff] }
0x1edb   : > { %8036 = vmatmul.mubr.msk.f32.vlgmr.msra.gmra.mrb[40].mxu1 %vm1220_vm2, %v4475_v29  ;;  %v7341_v29 = vld [vmem:[%s9816_s14 + $0x38] sm:$0xff] }
0x1edc   : > { %8417 = vmatpush3.bf16.msra.mxu1 %v8416_v28  ;;  %8051 = vmatprep.mubr.msk.f32.mxu1 %vm8798_vm0, %v8799_v11  ;;  %v8434_v28 = vpack.c.bf16 %v7339_v27, %v7338_v26  ;;  %v5436_v27 = vld [vmem:[%s9829_s1 + $0x10] sm:$0xff] }
0x1edd   : > { %8418 = vmatprep.subr.bf16.mxu1 %v8797_v3 }
0x1ee0   : > { %8420 = vmatpush3.bf16.msra.mxu1 %v8419_v32  ;;  %v7346_v32 = vld [vmem:[%s8866_s24 + $0x48] sm:$0xff] }
0x1ee1   : > { %8427 = vmatprep.subr.bf16.mxu1 %v8797_v3  ;;  %v8440_v34 = vpack.c.bf16 %v7346_v32, %v7345_v31 }
0x1ee3   : > { %8052 = vmatmul.mubr.msk.f32.vlgmr.msra.gmra.mrb[42].mxu1 %vm984_vm1, %v9281_v23 }
0x1ee4   : > { %8429 = vmatpush3.bf16.msra.mxu1 %v8428_v35  ;;  %8073 = vmatprep.mubr.msk.f32.mxu1 %vm8798_vm0, %v8799_v11  ;;  %v7348_v35 = vld [vmem:[%s8866_s24 + $0x58] sm:$0xff] }
0x1ee5   : > { %8430 = vmatprep.subr.bf16.mxu1 %v8797_v3  ;;  %v8443_v36 = vpack.c.bf16 %v7348_v35, %v7347_v33  ;;  %v7366_v33 = vld [vmem:[%s9829_s1 + $0x20] sm:$0xff] }
0x1ee8   : > { %8432 = vmatpush3.bf16.msra.mxu1 %v8431_v38  ;;  %v7350_v38 = vld [vmem:[%s8866_s24 + $0x68] sm:$0xff] }
0x1ee9   : > { %8086 = vmatprep.subr.mxu1 %v8799_v11  ;;  %v8446_v39 = vpack.c.bf16 %v7350_v38, %v7349_v37  ;;  %v7369_v37 = vld [vmem:[%s9829_s1 + $0x38] sm:$0xff] }
0x1eeb   : > { %8074 = vmatmul.mubr.msk.f32.vlgmr.msra.gmra.mrb[44].mxu1 %vm984_vm1, %v9281_v23 }
0x1eec   : > { %8088 = vmatprep.mubr.msk.f32.mxu1 %vm8798_vm0, %v8799_v11  ;;  %8087 = vmatpush3.msra.mxu1 %v7332_v12 }
0x1eed   : > { %8439 = vmatprep.subr.bf16.mxu1 %v8797_v3 }
0x1fae   : > { %v4545_v44 = vpop.f32.mrb[40].mxu1 }
0x1faf   : > { %v8037_v45 = vpop.f32.mrb[41].mxu1  ;;  %8041 = vmatmul.mubr.msk.f32.vlgmr.msra.gmra.mrb[44].mxu0 %vm1220_vm2, %v4545_v44  ;;  %v7336_v44 = vld [vmem:[%s9821_s6 + $0x1] ss:$0 sm:$0xff]  ;;  %s9832_s6 = sld [smem:[#allocation23_spill]] }
0x1fb0   : > { %8423 = vmatpush3.bf16.msra.mxu0 %v8422_v41  ;;  %8062 = vmatprep.mubr.msk.f32.mxu0 %vm8798_vm0, %v8799_v11 }
0x1fb1   : > { %8424 = vmatprep.subr.bf16.mxu0 %v8797_v3 }
0x1fb4   : > { %8426 = vmatpush3.bf16.msra.mxu0 %v8425_v46  ;;  %v7337_v46 = vld [vmem:[%s9818_s12 + $0x1] ss:$0 sm:$0xff] }
0x1fb5   : > { %8076 = vmatprep.subr.mxu0 %v8799_v11 }
0x1fb6   : > { %v4704_v47 = vpop.f32.mrb[42].mxu1 }
0x1fb7   : > { %v8053_v48 = vpop.f32.mrb[43].mxu1  ;;  %8063 = vmatmul.mubr.msk.f32.vlgmr.msra.gmra.mrb[46].mxu0 %vm984_vm1, %v9281_v23  ;;  %v4705_v60 = vadd.f32 %v7313_v56, %v4704_v47 }
0x1fb8   : > { %8078 = vmatprep.mubr.msk.f32.mxu0 %vm8798_vm0, %v8799_v11 }
0x1fbe   : > { %v4870_v49 = vpop.f32.mrb[44].mxu1 }
0x1fbf   : > { %v8075_v50 = vpop.f32.mrb[45].mxu1  ;;  %v4871_v61 = vadd.f32 %v7327_v59, %v4870_v49  ;;  %v7351_v49 = vld [vmem:[%s8866_s24 + $0x70] sm:$0xff] }
0x1fc0   : > { %v7352_v50 = vld [vmem:[%s8866_s24 + $0x78] sm:$0xff] }
0x2082   : > { %v4620_v51 = vpop.f32.mrb[44].mxu0 }
0x2083   : > { %v4624_v52 = vadd.f32 %v4620_v51, %v9401_v1  ;;  %v8042_v53 = vpop.f32.mrb[45].mxu0  ;;  %v8449_v51 = vpack.c.bf16 %v7352_v50, %v7351_v49  ;;  %v7376_v49 = vld [vmem:[%s9829_s1 + $0x58] sm:$0xff] }
0x208a   : > { %v4787_v55 = vpop.f32.mrb[46].mxu0 }
0x208b   : > { %v4788_v57 = vadd.f32 %v7320_v54, %v4787_v55  ;;  %v8064_v58 = vpop.f32.mrb[47].mxu0 }
0x208d   : > { %8077 = vmatpush3.xpose.msk.msra.mxu0 %vm1220_vm2, %v4788_v57  ;;  %v7354_v57 = vld [vmem:[%s9826_s18 + $0x1] ss:$0 sm:$0xff] }
0x208e   : > { %8081 = vmatprep.subr.mxu0 %v8799_v11 }
0x2090   : > { %8079 = vmatmul.mubr.msk.f32.vlgmr.msra.gmra.mrb[48].mxu0 %vm1220_vm2, %v4705_v60 }
0x2091   : > { %8082 = vmatpush3.msra.mxu0 %v4871_v61  ;;  %8083 = vmatprep.mubr.msk.f32.mxu0 %vm8798_vm0, %v8799_v11 }
0x2092   : > { %8433 = vmatprep.subr.bf16.mxu0 %v8797_v3 }
0x2163   : > { %v4946_v62 = vpop.f32.mrb[48].mxu0 }
0x2164   : > { %v4950_v63 = vmul.f32 0.35355338, %v4946_v62  ;;  %v8080_v0 = vpop.f32.mrb[49].mxu0 }
0x2166   : > { %v4951_v1 = vsel %vm1220_vm2, %v4950_v63, -inf }
0x2167   : > { %4952 = vmax.xlane.f32.xlu0 %v4951_v1 }
0x21f4   : > { %v4953_v2 = vpop.xlane.xlu0 %4952 }
0x21f5   : > { %v4954_v4 = vsub.f32 %v4950_v63, %v4953_v2 }
0x21f7   : > { %v4955_v5 = vmul.f32 1.442695, %v4954_v4 }
0x21f9   : > { %8634 = vpow2.f32 %v4955_v5 }
0x2203   : > { %v8635_v6 = vpop.eup %8634 }
0x2204   : > { %v4957_v7 = vsel %vm1220_vm2, %v8635_v6, 0.0 }
0x2205   : > { %4958 = vadd.xlane.f32.xlu1 %v4957_v7 }
0x2292   : > { %v4959_v8 = vpop.xlane.xlu1 %4958 }
0x2293   : > { %8636 = vrcp.f32 %v4959_v8  ;;  %v5353_v8 = vlaneseq }
0x229d   : > { %v8637_v9 = vpop.eup %8636 }
0x229e   : > { %v4961_v10 = vmul.f32 %v8637_v9, %v8635_v6  ;;  %v9505_v9 = vshrl.u32 %v5353_v8, 7 }
0x22a0   : > { %8084 = vmatmul.mubr.msk.f32.vlgmr.msra.gmra.mrb[50].mxu0 %vm1220_vm2, %v4961_v10  ;;  %v5356_v10 = vand.u32 127, %v5353_v8  ;;  %v5357_v12 = vadd.s32 4294967294, %v9505_v9  ;;  %v6605_v8 = vld [vmem:[%s9830_s3 + $0x18] sm:$0xff] }
0x22a1   : > { %8099 = vmatprep.mubr.msk.f32.mxu0 %vm8798_vm0, %v8799_v11  ;;  %8435 = vmatpush3.bf16.msra.mxu0 %v8434_v28  ;;  %v5437_v28 = vld [vmem:[%s9829_s1 + $0x18] sm:$0xff] }
0x22a2   : > { %8436 = vmatprep.subr.bf16.mxu0 %v8797_v3  ;;  %vm5358_vm4 = vcmp.eq.s32.totalorder %v5356_v10, %v5357_v12  ;;  %vm5674_vm6 = vcmp.eq.s32.totalorder %v5356_v10, %v9505_v9  ;;  %v7363_v12 = vld [vmem:[%s9831_s5] ss:$0 sm:$0xff]  ;;  %s9833_s5 = sld [smem:[#allocation27_spill]] }
0x2373   : > { %v5031_v13 = vpop.f32.mrb[50].mxu0 }
0x2374   : > { %v8085_v15 = vpop.f32.mrb[51].mxu0  ;;  %8089 = vmatmul.mubr.msk.f32.vlgmr.msra.gmra.mrb[46].mxu1 %vm1220_vm2, %v5031_v13  ;;  %v5518_v13 = vadd.s32 4294967295, %v9505_v9 }
0x2375   : > { %8118 = vmatprep.mubr.msk.f32.mxu1 %vm8798_vm0, %v8799_v11  ;;  %8441 = vmatpush3.bf16.msra.mxu1 %v8440_v34  ;;  %v7367_v34 = vld [vmem:[%s9829_s1 + $0x28] sm:$0xff] }
0x2376   : > { %8442 = vmatprep.subr.bf16.mxu1 %v8797_v3  ;;  %vm5519_vm5 = vcmp.eq.s32.totalorder %v5356_v10, %v5518_v13  ;;  %v8458_v35 = vpack.c.bf16 %v7367_v34, %v7366_v33  ;;  %v6687_v33 = vld [vmem:[%s9833_s5] sm:$0xff]  ;;  %v6688_v34 = vld [vmem:[%s9833_s5 + $0x8] sm:$0xff] }
0x2379   : > { %8444 = vmatpush3.bf16.msra.mxu1 %v8443_v36  ;;  %v7368_v36 = vld [vmem:[%s9829_s1 + $0x30] sm:$0xff] }
0x237a   : > { %8445 = vmatprep.subr.bf16.mxu1 %v8797_v3 }
0x237d   : > { %8447 = vmatpush3.bf16.msra.mxu1 %v8446_v39 }
0x237e   : > { %8448 = vmatprep.subr.bf16.mxu1 %v8797_v3 }
0x2381   : > { %8450 = vmatpush3.bf16.msra.mxu1 %v8449_v51 }
0x2382   : > { %8137 = vmatprep.subr.mxu1 %v8799_v11 }
0x2447   : > { %v5106_v16 = vpop.f32.mrb[46].mxu1 }
0x2448   : > { %v5110_v17 = vadd.f32 %v5106_v16, %v4624_v52  ;;  %v8090_v18 = vpop.f32.mrb[47].mxu1  ;;  %v7343_v52 = vld [vmem:[%s8861_s19 + $0x1] ss:$0 sm:$0xff] }
0x2449   : > { %v7358_v16 = vld [vmem:[%s9827_s7 + $0x1] ss:$0 sm:$0xff]  ;;  %s9837_s7 = sld [smem:[#allocation24_spill]] }
0x244a   : > { %v5111_v19 = vadd.f32 %v5110_v17, %v9281_v23  ;;  %v7340_v23 = vld [vmem:[%s9816_s14 + $0x30] sm:$0xff]  ;;  %v7359_v18 = vld [vmem:[%s9828_s10 + $0x1] ss:$0 sm:$0xff]  ;;  %s9676_s10 = scalar_lea.hbm %s8961_s30, %s7412_s9 }
0x244b   : > { %v8437_v30 = vpack.c.bf16 %v7341_v29, %v7340_v23  ;;  %v9532_v23 = vsel %vm5674_vm6, 1.0, %v8799_v11  ;;  %v5985_v29 = vadd.s32 2, %v9505_v9 }
0x244c   : > { %v5116_v20 = vsel %vm984_vm1, %v5111_v19, 0.0 }
0x244d   : > { %5117 = vadd.xlane.f32.xlu0 %v5116_v20  ;;  %8438 = vmatpush3.bf16.msra.mxu0 %v8437_v30  ;;  %v5434_v20 = vld [vmem:[%s9829_s1] sm:$0xff]  ;;  %v8455_v30 = vpack.c.bf16 %v5437_v28, %v5436_v27  ;;  %vm5986_vm8 = vcmp.eq.s32.totalorder %v5356_v10, %v5985_v29  ;;  %v7401_v29 = vld [vmem:[%s9832_s6 + $0x28] sm:$0xff] }
0x244e   : > { %8121 = vmatprep.subr.mxu0 %v8799_v11  ;;  %v7385_v32 = vsel %vm5986_vm8, 1.0, %v8799_v11  ;;  %v7400_v28 = vld [vmem:[%s9832_s6 + $0x20] sm:$0xff] }
0x24da   : > { %v5118_v21 = vpop.xlane.xlu0 %5117 }
0x24db   : > { %v5119_v22 = vmul.f32 0.03125, %v5118_v21  ;;  %v5435_v21 = vld [vmem:[%s9829_s1 + $0x8] sm:$0xff] }
0x24dc   : > { %v8452_v26 = vpack.c.bf16 %v5435_v21, %v5434_v20 }
0x24dd   : > { %v5120_v14 = vsub.f32 %v5111_v19, %v5119_v22 }
0x24df   : > { %v5121_v24 = vmul.f32 %v5120_v14, %v5120_v14 }
0x24e1   : > { %v5122_v25 = vsel %vm984_vm1, %v5121_v24, 0.0  ;;  %v9517_v24 = vsel %vm5519_vm5, 1.0, %v8799_v11 }
0x24e2   : > { %5123 = vadd.xlane.f32.xlu1 %v5122_v25  ;;  %v5829_v25 = vadd.s32 1, %v9505_v9 }
0x24e4   : > { %vm5830_vm7 = vcmp.eq.s32.totalorder %v5356_v10, %v5829_v25  ;;  %v7397_v25 = vld [vmem:[%s9832_s6 + $0x18] sm:$0xff] }
0x24e5   : > { %v9545_v31 = vsel %vm5830_vm7, 1.0, %v8799_v11 }
0x256f   : > { %v5124_v40 = vpop.xlane.xlu1 %5123 }
0x2570   : > { %v5125_v41 = vmul.f32 0.03125, %v5124_v40 }
0x2572   : > { %v5126_v42 = vadd.f32 1e-05, %v5125_v41 }
0x2574   : > { %8638 = vrsqrt.f32 %v5126_v42  ;;  %v8461_v42 = vpack.c.bf16 %v7369_v37, %v7368_v36  ;;  %v8497_v36 = vpack.c.bf16 %v6688_v34, %v6687_v33 }
0x257e   : > { %v8639_v43 = vpop.eup %8638 }
0x257f   : > { %v5128_v45 = vmul.f32 %v8639_v43, %v5120_v14  ;;  %v7360_v14 = vsel %vm5358_vm4, 1.0, %v8799_v11  ;;  %v7373_v43 = vld [vmem:[%s9829_s1 + $0x40] sm:$0xff] }
0x2581   : > { %v5135_v47 = vmul.f32 %v7336_v44, %v5128_v45  ;;  %v7374_v44 = vld [vmem:[%s9829_s1 + $0x48] sm:$0xff] }
0x2583   : > { %v5142_v48 = vadd.f32 %v7337_v46, %v5135_v47  ;;  %v8464_v47 = vpack.c.bf16 %v7374_v44, %v7373_v43  ;;  %v7394_v44 = vld [vmem:[%s9837_s7] ss:$0 sm:$0xff]  ;;  %s9839_s7 = sld [smem:[#allocation30_spill]] }
0x2585   : > { %8100 = vmatmul.mubr.msk.f32.vlgmr.msra.gmra.mrb[52].mxu0 %vm984_vm1, %v5142_v48 }
0x2586   : > { %8123 = vmatprep.mubr.msk.f32.mxu0 %vm8798_vm0, %v8799_v11 }
0x2658   : > { %v5225_v53 = vpop.f32.mrb[52].mxu0 }
0x2659   : > { %v5226_v54 = vadd.f32 %v7343_v52, %v5225_v53  ;;  %v8101_v55 = vpop.f32.mrb[53].mxu0  ;;  %v7380_v53 = vld [vmem:[%s9829_s1 + $0x60] sm:$0xff] }
0x265b   : > { %v5229_v56 = vmax.f32 %v5226_v54, 0.0  ;;  %v7381_v54 = vld [vmem:[%s9829_s1 + $0x68] sm:$0xff] }
0x265d   : > { %8119 = vmatmul.mubr.msk.f32.vlgmr.msra.gmra.mrb[48].mxu1 %vm3052_vm3, %v5229_v56 }
0x265e   : > { %8139 = vmatprep.mubr.msk.f32.mxu1 %vm8798_vm0, %v8799_v11 }
0x2730   : > { %v5316_v58 = vpop.f32.mrb[48].mxu1 }
0x2731   : > { %v5317_v59 = vadd.f32 %v7354_v57, %v5316_v58  ;;  %v8120_v60 = vpop.f32.mrb[49].mxu1  ;;  %v8470_v57 = vpack.c.bf16 %v7381_v54, %v7380_v53  ;;  %v7382_v58 = vld [vmem:[%s9829_s1 + $0x70] sm:$0xff] }
0x2733   : > { %v5320_v61 = vadd.f32 %v5317_v59, %v5142_v48  ;;  %v7375_v48 = vld [vmem:[%s9829_s1 + $0x50] sm:$0xff]  ;;  %v7383_v59 = vld [vmem:[%s9829_s1 + $0x78] sm:$0xff] }
0x2734   : > { %v8467_v52 = vpack.c.bf16 %v7376_v49, %v7375_v48  ;;  %v8473_v60 = vpack.c.bf16 %v7383_v59, %v7382_v58  ;;  %v7405_v48 = vld [vmem:[%s9838_s8] ss:$0 sm:$0xff] }
0x2735   : > { %v5325_v62 = vsel %vm984_vm1, %v5320_v61, 0.0 }
0x2736   : > { %5326 = vadd.xlane.f32.xlu0 %v5325_v62  ;;  %v7388_v62 = vld [vmem:[%s9829_s1 + $0x88] sm:$0xff] }
0x27c3   : > { %v5327_v63 = vpop.xlane.xlu0 %5326 }
0x27c4   : > { %v5328_v0 = vmul.f32 0.03125, %v5327_v63 }
0x27c6   : > { %v5329_v1 = vsub.f32 %v5320_v61, %v5328_v0  ;;  %v7387_v61 = vld [vmem:[%s9829_s1 + $0x80] sm:$0xff]  ;;  %v7389_v0 = vld [vmem:[%s9829_s1 + $0x90] sm:$0xff] }
0x27c7   : > { %v8476_v63 = vpack.c.bf16 %v7388_v62, %v7387_v61  ;;  %v6771_v62 = vld [vmem:[%s9839_s7] sm:$0x1]  ;;  %s8800_s7 = smov [#allocation4]  }
0x27c8   : > { %v5330_v2 = vmul.f32 %v5329_v1, %v5329_v1 }
0x27ca   : > { %v5331_v4 = vsel %vm984_vm1, %v5330_v2, 0.0 }
0x27cb   : > { %5332 = vadd.xlane.f32.xlu1 %v5331_v4  ;;  %v6602_v4 = vld [vmem:[%s9830_s3] sm:$0xff] }
0x2858   : > { %v5333_v5 = vpop.xlane.xlu1 %5332 }
0x2859   : > { %v5334_v6 = vmul.f32 0.03125, %v5333_v5  ;;  %v6603_v5 = vld [vmem:[%s9830_s3 + $0x8] sm:$0xff] }
0x285b   : > { %v5335_v7 = vadd.f32 1e-05, %v5334_v6  ;;  %v8491_v6 = vpack.c.bf16 %v6603_v5, %v6602_v4 }
0x285d   : > { %8640 = vrsqrt.f32 %v5335_v7  ;;  %v6604_v7 = vld [vmem:[%s9830_s3 + $0x10] sm:$0xff]  ;;  %s9835_s3 = sld [smem:[#allocation29_spill]] }
0x285e   : > { %v8494_v10 = vpack.c.bf16 %v6605_v8, %v6604_v7 }
0x2867   : > { %v8641_v15 = vpop.eup %8640 }
0x2868   : > { %v5337_v17 = vmul.f32 %v8641_v15, %v5329_v1  ;;  %v7390_v1 = vld [vmem:[%s9829_s1 + $0x98] sm:$0xff]  ;;  %v6213_v15 = vld [vmem:[%s9832_s6] sm:$0xff]  ;;  %s9834_s1 = sld [smem:[#allocation26_spill]] }
0x2869   : > { %v8479_v2 = vpack.c.bf16 %v7390_v1, %v7389_v0 }
0x286a   : > { %v5344_v19 = vmul.f32 %v7358_v16, %v5337_v17  ;;  %v6214_v16 = vld [vmem:[%s9832_s6 + $0x8] sm:$0xff] }
0x286b   : > { %v8482_v20 = vpack.c.bf16 %v6214_v16, %v6213_v15 }
0x286c   : > { %v9513_v22 = vadd.f32 %v7359_v18, %v5344_v19 }
0x286e   : > { %8122 = vmatpush3.msra.mxu0 %v9513_v22  ;;  %8138 = vmatpush3.msra.mxu1 %v9513_v22 }
0x286f   : > { %8124 = vmatmul.mubr.msk.f32.vlgmr.msra.gmra.mrb[54].mxu0 %vm1220_vm2, %v7360_v14  ;;  %8140 = vmatmul.mubr.msk.f32.vlgmr.msra.gmra.mrb[50].mxu1 %vm1220_vm2, %v9517_v24  ;;  %v7396_v14 = vld [vmem:[%s9832_s6 + $0x10] sm:$0xff]  ;;  %s9836_s6 = sld [smem:[#allocation31_spill]] }
0x2870   : > { %8153 = vmatprep.subr.mxu1 %v8799_v11  ;;  %8155 = vmatprep.mubr.msk.f32.mxu1 %vm8798_vm0, %v8799_v11 }
0x2871   : > { %8154 = vmatpush3.msra.mxu1 %v9513_v22  ;;  %8451 = vmatprep.subr.bf16.mxu0 %v8797_v3 }
0x2872   : > { %8169 = vmatprep.subr.mxu1 %v8799_v11  ;;  %8453 = vmatpush3.bf16.msra.mxu0 %v8452_v26 }
0x2873   : > { %8156 = vmatmul.mubr.msk.f32.vlgmr.msra.gmra.mrb[52].mxu1 %vm1220_vm2, %v9532_v23  ;;  %8454 = vmatprep.subr.bf16.mxu0 %v8797_v3 }
0x2874   : > { %8170 = vmatpush3.msra.mxu1 %v9513_v22  ;;  %8171 = vmatprep.mubr.msk.f32.mxu1 %vm8798_vm0, %v8799_v11 }
0x2875   : > { %8185 = vmatprep.subr.mxu1 %v8799_v11  ;;  %8134 = vmatprep.mubr.msk.f32.mxu0 %vm8798_vm0, %v8799_v11  ;;  %v6847_v59 = vld [vmem:[%s9836_s6 + $0x10] sm:$0xff] }
0x2876   : > { %8456 = vmatpush3.bf16.msra.mxu0 %v8455_v30 }
0x2877   : > { %8172 = vmatmul.mubr.msk.f32.vlgmr.msra.gmra.mrb[54].mxu1 %vm1220_vm2, %v9545_v31  ;;  %8457 = vmatprep.subr.bf16.mxu0 %v8797_v3 }
0x2878   : > { %8186 = vmatpush3.msra.mxu1 %v9513_v22  ;;  %8187 = vmatprep.mubr.msk.f32.mxu1 %vm8798_vm0, %v8799_v11 }
0x2879   : > { %8201 = vmatprep.subr.mxu1 %v8799_v11 }
0x287b   : > { %8188 = vmatmul.mubr.msk.f32.vlgmr.msra.gmra.mrb[56].mxu1 %vm1220_vm2, %v7385_v32 }
0x287c   : > { %8203 = vmatprep.mubr.msk.f32.mxu1 %vm8798_vm0, %v8799_v11 }
0x2942   : > { %v5430_v38 = vpop.f32.mrb[54].mxu0  ;;  %v5591_v39 = vpop.f32.mrb[50].mxu1 }
0x2943   : > { %v8125_v40 = vpop.f32.mrb[55].mxu0  ;;  %8135 = vmatmul.mubr.msk.f32.vlgmr.msra.gmra.mrb[56].mxu0 %vm984_vm1, %v5430_v38  ;;  %v8141_v41 = vpop.f32.mrb[51].mxu1 }
0x2944   : > { %8459 = vmatpush3.bf16.msra.mxu0 %v8458_v35  ;;  %8150 = vmatprep.mubr.msk.f32.mxu0 %vm8798_vm0, %v8799_v11  ;;  %v7403_v35 = vld [vmem:[%s9834_s1] ss:$0 sm:$0xff]  ;;  %s9657_s1 = sand.u32 1, %s8756_s23  }
0x2945   : > { %8460 = vmatprep.subr.bf16.mxu0 %v8797_v3  ;;  %v6770_v40 = vld [vmem:[%s9835_s3] sm:$0xff]  ;;  %s9783_s5 = sshll.u32 %s9657_s1, 3  ;;  %s959_s8 = scalar_lea.vmem [#allocation4], %s9657_s1 }
0x2946   : > { %v5746_v45 = vpop.f32.mrb[52].mxu1  ;;  %v6845_v41 = vld [vmem:[%s9836_s6] sm:$0xff]  ;;  %s9664_s3 = scalar_lea.vmem [#allocation6], %s9783_s5  ;;  %s6933_s5 = sand.u32 1, %s8989_s0  }
0x2947   : > { %v8157_v46 = vpop.f32.mrb[53].mxu1  ;;  %s6977_s12 = sshll.u32 %s9664_s3, 4  ;;  %s6964_s13 = sshll.u32 %s959_s8, 4  ;;  %s6965_s13 = int_to_ptr.vmem [resolvable:$true] %s6964_s13  ;;  %s9697_s12 = int_to_ptr.vmem [resolvable:$true] %s6977_s12 }
0x2948   : > { %8462 = vmatpush3.bf16.msra.mxu0 %v8461_v42  ;;  %v6846_v42 = vld [vmem:[%s9836_s6 + $0x8] sm:$0xff]  ;;  %s9679_s14 = scalar_lea.sflag [#allocation5], %s6933_s5  ;;  %s8642_s17 = scalar_lea.vmem %s6965_s13, 16 }
0x2949   : > { %8463 = vmatprep.subr.bf16.mxu0 %v8797_v3  ;;  %v8500_v43 = vpack.c.bf16 %v6846_v42, %v6845_v41  ;;  %p8643_p11 = scmp.ne.s32.totalorder %s6965_s13, %s8642_s17 }
0x294a   : > { %v5902_v50 = vpop.f32.mrb[54].mxu1 }
0x294b   : > { %8151 = vmatmul.mubr.msk.f32.vlgmr.msra.gmra.mrb[56].mxu0 %vm984_vm1, %v5591_v39  ;;  %v8173_v51 = vpop.f32.mrb[55].mxu1  ;;  %p8644_p12 = pnand %p8643_p11, %p9008_p5 }
0x294c   : > { %8465 = vmatpush3.bf16.msra.mxu0 %v8464_v47  ;;  %8166 = vmatprep.mubr.msk.f32.mxu0 %vm8798_vm0, %v8799_v11 }
0x294d   : > { %8466 = vmatprep.subr.bf16.mxu0 %v8797_v3  ;;  %p8645_p13 = pneg %p8644_p12 }
0x294e   : > { %v6058_v55 = vpop.f32.mrb[56].mxu1 }
0x294f   : > { %v8189_v56 = vpop.f32.mrb[57].mxu1 }
0x2950   : > { %8468 = vmatpush3.bf16.msra.mxu0 %v8467_v52 }
0x2951   : > { %8469 = vmatprep.subr.bf16.mxu0 %v8797_v3 }
0x2953   : > { %8167 = vmatmul.mubr.msk.f32.vlgmr.msra.gmra.mrb[56].mxu0 %vm984_vm1, %v5746_v45 }
0x2954   : > { %8471 = vmatpush3.bf16.msra.mxu0 %v8470_v57  ;;  %8182 = vmatprep.mubr.msk.f32.mxu0 %vm8798_vm0, %v8799_v11 }
0x2955   : > { %8472 = vmatprep.subr.bf16.mxu0 %v8797_v3 }
0x2958   : > { %8474 = vmatpush3.bf16.msra.mxu0 %v8473_v60  ;;  %v6848_v60 = vld [vmem:[%s9836_s6 + $0x18] sm:$0xff]  ;;  %s8646_s6 = sshll.u32 %s8800_s7, 4  ;;  %s8647_s6 = int_to_ptr.vmem [resolvable:$false] %s8646_s6 }
0x2959   : > { %8475 = vmatprep.subr.bf16.mxu0 %v8797_v3  ;;  %v8503_v61 = vpack.c.bf16 %v6848_v60, %v6847_v59  ;;  %s8648_s18 = scalar_lea.vmem %s8647_s6, 32  ;;  %p8649_p0 = scmp.lt.s32.totalorder %s6965_s13, %s8647_s6 }
0x295a   : > { %p8650_p1 = scmp.lt.s32.totalorder %s8648_s18, %s8642_s17 }
0x295b   : > { %8183 = vmatmul.mubr.msk.f32.vlgmr.msra.gmra.mrb[56].mxu0 %vm984_vm1, %v5902_v50 }
0x295c   : > { %8477 = vmatpush3.bf16.msra.mxu0 %v8476_v63  ;;  %8198 = vmatprep.mubr.msk.f32.mxu0 %vm8798_vm0, %v8799_v11  ;;  %p8651_p2 = por %p8650_p1, %p8649_p0 }
0x295d   : > { %8478 = vmatprep.subr.bf16.mxu0 %v8797_v3 }
0x295e   : > { %p8652_p3 = pnand %p8651_p2, %p8645_p13 }
0x2960   : > { %8480 = vmatpush3.bf16.msra.mxu0 %v8479_v2 }
0x2961   : > { %8490 = vmatprep.subr.bf16.mxu0 %v8797_v3 }
0x2963   : > { %8199 = vmatmul.mubr.msk.f32.vlgmr.msra.gmra.mrb[56].mxu0 %vm984_vm1, %v6058_v55 }
0x2964   : > { %8492 = vmatpush3.bf16.msra.mxu0 %v8491_v6  ;;  %8245 = vmatprep.mubr.msk.f32.mxu0 %vm8798_vm0, %v8799_v11 }
0x2965   : > { %8493 = vmatprep.subr.bf16.mxu0 %v8797_v3 }
0x2968   : > { %8495 = vmatpush3.bf16.msra.mxu0 %v8494_v10 }
0x2969   : > { %8255 = vmatprep.subr.mxu0 %v8799_v11 }
0x296b   : > { %8246 = vmatmul.mubr.msk.f32.vlgmr.msra.gmra.mrb[58].mxu0 %vm984_vm1, %v9513_v22 }
0x296c   : > { %8257 = vmatprep.mubr.msk.f32.mxu0 %vm8798_vm0, %v8799_v11  ;;  %8256 = vmatpush3.msra.mxu0 %v6770_v40 }
0x2a36   : > { %v6136_v13 = vpop.f32.mrb[56].mxu0 }
0x2a37   : > { %v8505_v17 = vadd.f32 %v7363_v12, %v6136_v13  ;;  %v8200_v18 = vpop.f32.mrb[57].mxu0 }
0x2a39   : > { %v6141_v19 = vmax.f32 %v8505_v17, 0.0 }
0x2a3b   : > { %8202 = vmatpush3.msra.mxu1 %v6141_v19 }
0x2a3c   : > { %8204 = vmatmul.mubr.msk.f32.vlgmr.msra.gmra.mrb[58].mxu1 %vm1220_vm2, %v9517_v24  ;;  %8481 = vmatprep.subr.bf16.mxu1 %v8797_v3  ;;  %v8485_v24 = vpack.c.bf16 %v7397_v25, %v7396_v14 }
0x2a3d   : > { %8483 = vmatpush3.bf16.msra.mxu1 %v8482_v20  ;;  %8210 = vmatprep.mubr.msk.f32.mxu1 %vm8798_vm0, %v8799_v11 }
0x2a3e   : > { %v6682_v21 = vpop.f32.mrb[58].mxu0  ;;  %8213 = vmatprep.subr.mxu1 %v8799_v11 }
0x2a3f   : > { %v8247_v22 = vpop.f32.mrb[59].mxu0  ;;  %v6683_v37 = vadd.f32 %v7403_v35, %v6682_v21 }
0x2a41   : > { %v6686_v39 = vmax.f32 %v6683_v37, 0.0 }
0x2b0f   : > { %v6209_v26 = vpop.f32.mrb[58].mxu1 }
0x2b10   : > { %8211 = vmatmul.mubr.msk.f32.vlgmr.msra.gmra.mrb[60].mxu1 %vm6215_vm9, %v6209_v26  ;;  %v8205_v27 = vpop.f32.mrb[59].mxu1 }
0x2b11   : > { %8214 = vmatpush3.msra.mxu1 %v6141_v19  ;;  %8215 = vmatprep.mubr.msk.f32.mxu1 %vm8798_vm0, %v8799_v11 }
0x2b12   : > { %8484 = vmatprep.subr.bf16.mxu1 %v8797_v3 }
0x2b14   : > { %8216 = vmatmul.mubr.msk.f32.vlgmr.msra.gmra.mrb[62].mxu1 %vm1220_vm2, %v9532_v23  ;;  %v8488_v23 = vpack.c.bf16 %v7401_v29, %v7400_v28 }
0x2b15   : > { %8486 = vmatpush3.bf16.msra.mxu1 %v8485_v24  ;;  %8222 = vmatprep.mubr.msk.f32.mxu1 %vm8798_vm0, %v8799_v11 }
0x2b16   : > { %8225 = vmatprep.subr.mxu1 %v8799_v11 }
0x2be7   : > { %v6362_v30 = vpop.f32.mrb[62].mxu1 }
0x2be8   : > { %8223 = vmatmul.mubr.msk.f32.vlgmr.msra.gmra.mrb[60].mxu1 %vm6215_vm9, %v6362_v30  ;;  %v8217_v32 = vpop.f32.mrb[63].mxu1 }
0x2be9   : > { %8226 = vmatpush3.msra.mxu1 %v6141_v19  ;;  %8227 = vmatprep.mubr.msk.f32.mxu1 %vm8798_vm0, %v8799_v11 }
0x2bea   : > { %8487 = vmatprep.subr.bf16.mxu1 %v8797_v3 }
0x2bec   : > { %8228 = vmatmul.mubr.msk.f32.vlgmr.msra.gmra.mrb[64].mxu1 %vm1220_vm2, %v9545_v31 }
0x2bed   : > { %8489 = vmatpush3.bf16.msra.mxu1 %v8488_v23  ;;  %8234 = vmatprep.mubr.msk.f32.mxu1 %vm8798_vm0, %v8799_v11 }
0x2bee   : > { %8496 = vmatprep.subr.bf16.mxu1 %v8797_v3 }
0x2cbf   : > { %v6509_v38 = vpop.f32.mrb[64].mxu1 }
0x2cc0   : > { %8235 = vmatmul.mubr.msk.f32.vlgmr.msra.gmra.mrb[60].mxu1 %vm6215_vm9, %v6509_v38  ;;  %v8229_v31 = vpop.f32.mrb[65].mxu1 }
0x2cc1   : > { %8498 = vmatpush3.bf16.msra.mxu1 %v8497_v36  ;;  %8252 = vmatprep.mubr.msk.f32.mxu1 %vm8798_vm0, %v8799_v11 }
0x2cc2   : > { %8499 = vmatprep.subr.bf16.mxu1 %v8797_v3 }
0x2cc4   : > { %8253 = vmatmul.mubr.msk.f32.vlgmr.msra.gmra.mrb[66].mxu1 %vm6215_vm9, %v6686_v39 }
0x2cc5   : > { %8268 = vmatprep.mubr.msk.f32.mxu1 %vm8798_vm0, %v8799_v11  ;;  %8501 = vmatpush3.bf16.msra.mxu1 %v8500_v43 }
0x2cc6   : > { %8502 = vmatprep.subr.bf16.mxu1 %v8797_v3 }
0x2cc9   : > { %8504 = vmatpush3.bf16.msra.mxu1 %v8503_v61 }
0x2d93   : > { %v6585_v45 = vpop.f32.mrb[60].mxu1 }
0x2d94   : > { %v8506_v46 = vadd.f32 %v7394_v44, %v6585_v45  ;;  %v8236_v47 = vpop.f32.mrb[61].mxu1 }
0x2d96   : > { %v6590_v49 = vmax.f32 %v8506_v46, 0.0 }
0x2d97   : > { %v6765_v11 = vpop.f32.mrb[66].mxu1 }
0x2d98   : > { %v6591_v50 = vsel %vm1220_vm2, %v6590_v49, 0.0  ;;  %v6766_v51 = vadd.f32 %v7405_v48, %v6765_v11  ;;  %v8254_v52 = vpop.f32.mrb[67].mxu1 }
0x2d99   : > { %v6592_v3 = vrot.slane %v6591_v50, 4 }
0x2d9a   : > { %6769 = vst [vmem:[%s9664_s3] sm:$0xff] %v6766_v51 }
0x2d9b   : > { %v6593_v53 = vadd.f32 %v6592_v3, %v6591_v50 }
0x2d9d   : > { %v6594_v54 = vrot.slane %v6593_v53, 2 }
0x2d9f   : > { %v6595_v55 = vadd.f32 %v6594_v54, %v6593_v53 }
0x2da1   : > { %v6596_v56 = vrot.slane %v6595_v55, 1 }
0x2da3   : > { %v6597_v57 = vadd.f32 %v6596_v56, %v6595_v55 }
0x2da5   : > { %v6599_v58 = vmul.f32 0.125, %v6597_v57 }
0x2da7   : > { %8258 = vmatmul.mubr.msk.f32.vlgmr.msra.gmra.mrb[60].mxu0 %vm1220_vm2, %v6599_v58  ;;  %6601 = vst.msk [vmem:[%s959_s8] sm:$0x1] %vm6600_vm10, %v6599_v58 }
0x2e7a   : > { %v6841_v63 = vpop.f32.mrb[60].mxu0 }
0x2e7b   : > { %v6842_v0 = vadd.f32 %v6841_v63, %v6771_v62  ;;  %v8259_v1 = vpop.f32.mrb[61].mxu0 }
0x2e7d   : > { %8269 = vmatmul.mubr.msk.f32.vlgmr.msra.gmra.mrb[68].mxu1 %vm984_vm1, %v6842_v0 }
0x2e7e   : > { %8655 = shalt.err (!%p8652_p3)
}
0x2e7f   : > { %s8656_s9 = scalar_lea.hbm %s9676_s10, 16  ;;  %s8660_s5 = scalar_lea.hbm %s8961_s30, 32 }
0x2e80   : > { %p8657_p4 = scmp.ne.s32.totalorder %s9676_s10, %s8656_s9  ;;  %p8661_p9 = scmp.lt.u32.totalorder %s9676_s10, %s8961_s30 }
0x2e81   : > { %p8662_p10 = scmp.lt.u32.totalorder %s8660_s5, %s8656_s9  ;;  %p8664_p12 = scmp.lt.u32.totalorder %s8656_s9, %s9676_s10 }
0x2e82   : > { %p8658_p7 = pnand %p8657_p4, %p9008_p5 }
0x2e83   : > { %p8663_p11 = por %p8662_p10, %p8661_p9 }
0x2e84   : > { %p8659_p8 = pneg %p8658_p7 }
0x2e85   : > { %p8665_p0 = por %p8664_p12, %p8663_p11 }
0x2e87   : > { %p8666_p13 = pnand %p8665_p0, %p8659_p8 }
0x2e89   : > { %8669 = shalt.err (!%p8666_p13)
}
0x2e8a   : > { %8520 = dma.vmem_to_hbm [thread:$0]  (%p9008_p5), %s6965_s13, 16, %s9676_s10, %s9679_s14  }
0x2e8b   : > { %s7411_s17 = sshll.u32 %s8989_s0, 7  ;;  %s8670_s18 = scalar_lea.vmem %s9697_s12, 128 }
0x2e8c   : > { %s6975_s6 = scalar_lea.hbm %s8966_s20, %s7411_s17  ;;  %p8671_p1 = scmp.ne.s32.totalorder %s9697_s12, %s8670_s18 }
0x2e8d   : > { %s8801_s8 = smov [#allocation6]  }
0x2e8e   : > { %p8672_p2 = pnand %p8671_p1, %p9008_p5  ;;  %s8674_s7 = sshll.u32 %s8801_s8, 4  ;;  %s8675_s7 = int_to_ptr.vmem [resolvable:$false] %s8674_s7 }
0x2e8f   : > { %s8676_s9 = scalar_lea.vmem %s8675_s7, 256  ;;  %p8677_p4 = scmp.lt.s32.totalorder %s9697_s12, %s8675_s7 }
0x2e90   : > { %p8673_p3 = pneg %p8672_p2  ;;  %p8678_p7 = scmp.lt.s32.totalorder %s8676_s9, %s8670_s18 }
0x2e92   : > { %p8679_p8 = por %p8678_p7, %p8677_p4 }
0x2e94   : > { %p8680_p9 = pnand %p8679_p8, %p8673_p3 }
0x2e96   : > { %8683 = shalt.err (!%p8680_p9)
}
0x2e97   : > { %s8684_s13 = scalar_lea.hbm %s6975_s6, 128  ;;  %s8688_s10 = scalar_lea.hbm %s8966_s20, 256 }
0x2e98   : > { %p8685_p10 = scmp.ne.s32.totalorder %s6975_s6, %s8684_s13  ;;  %p8689_p0 = scmp.lt.u32.totalorder %s6975_s6, %s8966_s20 }
0x2e99   : > { %p8690_p13 = scmp.lt.u32.totalorder %s8688_s10, %s8684_s13  ;;  %p8692_p2 = scmp.lt.u32.totalorder %s8684_s13, %s6975_s6 }
0x2e9a   : > { %p8686_p11 = pnand %p8685_p10, %p9008_p5 }
0x2e9b   : > { %p8691_p1 = por %p8690_p13, %p8689_p0 }
0x2e9c   : > { %p8687_p12 = pneg %p8686_p11 }
0x2e9d   : > { %p8693_p6 = por %p8692_p2, %p8691_p1 }
0x2e9f   : > { %p8694_p4 = pnand %p8693_p6, %p8687_p12 }
0x2ea1   : > { %8697 = shalt.err (!%p8694_p4)
}
0x2ea2   : > { %8521 = dma.vmem_to_hbm [thread:$0]  (%p9008_p5), %s9697_s12, 128, %s6975_s6, %s9679_s14   ;;  %v6849_v2 = vld [vmem:[%s8951_s27] sm:$0x1]  ;;  %v6925_v4 = vsub.s32 0, %v9505_v9 }
0x2ea3   : > { %s9840_s3 = sshll.u32 %s9657_s1, 3  ;;  %s9723_s8 = scalar_lea.hbm %s8956_s4, %s7411_s17 }
0x2ea4   : > { %s953_s5 = scalar_lea.vmem [#allocation2], %s9840_s3  ;;  %s6929_s14 = scalar_lea.sflag [#allocation3], %s9657_s1 }
0x2ea5   : > { %s6951_s18 = sshll.u32 %s953_s5, 4  ;;  %s8802_s6 = smov [#allocation2]   ;;  %s9725_s18 = int_to_ptr.vmem [resolvable:$true] %s6951_s18 }
0x2ea6   : > { %s8698_s12 = scalar_lea.vmem %s9725_s18, 128  ;;  %s8702_s7 = sshll.u32 %s8802_s6, 4  ;;  %s8703_s7 = int_to_ptr.vmem [resolvable:$false] %s8702_s7 }
0x2ea7   : > { %p8699_p6 = scmp.ne.s32.totalorder %s9725_s18, %s8698_s12  ;;  %s8704_s9 = scalar_lea.vmem %s8703_s7, 256 }
0x2ea8   : > { %p8705_p8 = scmp.lt.s32.totalorder %s9725_s18, %s8703_s7  ;;  %p8706_p9 = scmp.lt.s32.totalorder %s8704_s9, %s8698_s12 }
0x2ea9   : > { %p8700_p3 = pnand %p8699_p6, %p9008_p5 }
0x2eaa   : > { %p8707_p10 = por %p8706_p9, %p8705_p8 }
0x2eab   : > { %p8701_p7 = pneg %p8700_p3 }
0x2ead   : > { %p8708_p11 = pnand %p8707_p10, %p8701_p7 }
0x2f50   : > { %v6919_v5 = vpop.f32.mrb[68].mxu1 }
0x2f51   : > { %v6920_v6 = vadd.f32 %v6919_v5, %v6849_v2  ;;  %v8270_v7 = vpop.f32.mrb[69].mxu1 }
0x2f53   : > { %v6926_v8 = vrot.slane %v6920_v6, %v6925_v4 }
0x2f55   : > { %6927 = vst.msk [vmem:[%s953_s5] sm:$0xff] %vm984_vm1, %v6926_v8 }
0x2f56   : > { %8711 = shalt.err (!%p8708_p11)
}
0x2f57   : > { %s8712_s0 = scalar_lea.hbm %s9723_s8, 128  ;;  %s8716_s1 = scalar_lea.hbm %s8956_s4, 256 }
0x2f58   : > { %p8713_p12 = scmp.ne.s32.totalorder %s9723_s8, %s8712_s0  ;;  %p8717_p1 = scmp.lt.u32.totalorder %s9723_s8, %s8956_s4 }
0x2f59   : > { %p8718_p2 = scmp.lt.u32.totalorder %s8716_s1, %s8712_s0  ;;  %p8720_p6 = scmp.lt.u32.totalorder %s8712_s0, %s9723_s8 }
0x2f5a   : > { %p8714_p0 = pnand %p8713_p12, %p9008_p5 }
0x2f5b   : > { %p8719_p4 = por %p8718_p2, %p8717_p1 }
0x2f5c   : > { %p8715_p13 = pneg %p8714_p0 }
0x2f5d   : > { %p8721_p3 = por %p8720_p6, %p8719_p4 }
0x2f5f   : > { %p8722_p7 = pnand %p8721_p3, %p8715_p13 }
0x2f61   : > { %8725 = shalt.err (!%p8722_p7)
}
0x2f62   : > { %8519 = dma.vmem_to_hbm [thread:$0]  (%p9008_p5), %s9725_s18, 128, %s9723_s8, %s6929_s14  }
0x2f63 PF: > { %p8535_p8 = scmp.ge.s32.totalorder %s8764_s28, 2  ;;  %s6989_s17 = sand.u32 1, %s8752_s22  }
0x2f64   : > { %p9841_p9 = scmp.ne.s32.totalorder %s9824_s16, 0  ;;  %s6990_s13 = scalar_lea.sflag [#allocation3], %s6989_s17 }
0x2f66   : > { %p8526_p10 = pnand %p8535_p8, %p9841_p9 }
0x2f68   : > { %8743 = dma.done.wait (!%p8526_p10), %s6990_s13, 128  }
0x2f69   : > { %8745 = vsyncadd (!%p8526_p10), %s6990_s13, 4294967168  ;;  %s9842_s10 = sadd.s32 4294967294, %s8764_s28  }
0x2f6a   : > { %s6998_s3 = sand.u32 1, %s9842_s10  }
0x2f6b   : > { %s6999_s5 = scalar_lea.sflag [#allocation5], %s6998_s3 }
0x2f6c   : > { %8747 = dma.done.wait (!%p8526_p10), %s6999_s5, 144  }
0x2f6d   : > { %8749 = vsyncadd (!%p8526_p10), %s6999_s5, 4294967152  ;;  %p77_p5 = scmp.ge.s32.totalorder %s8993_s2, 4   ;;  %s9843_s22 = smov %s8756_s23 }
0x2f6e   : > { %s9844_s23 = smov %s8760_s26  ;;  %s9845_s26 = smov %s9006_s11 }
0x2f6f   : > { %s9846_s28 = smov %s8993_s2  ;;  %79 = sbr.rel (!%p77_p5) target bundleno = 63 (0x3f), region = 298 }
0x2f76   :  { %7012 = vsyncpa [#allocation3], 1 }
0x2f77   :  { %7014 = vsyncpa [#allocation3 + $0x1], 1 }
0x2f78   :  { %7015 = vsyncpa [#allocation5], 1 }
0x2f79   :  { %7017 = vsyncpa [#allocation5 + $0x1], 1 }

</bundles_post_ra>
